<compile_context>
chip_gen: v5e
topology: v5e:2x2
jax: 0.10.0
libtpu: 0.0.40
codegen_flags: <defaults>
</compile_context>

<pallas_src>
import functools
import math

import jax
import jax.numpy as jnp
from jax.experimental import pallas as pl
from jax.experimental.pallas import tpu as pltpu


# -----------------------------------------------------------------------------
# Helpers
# -----------------------------------------------------------------------------
def _round_up(n, m):
    return ((n + m - 1) // m) * m


def _largest_tile(c_pad, cap):
    """Largest multiple-of-128 divisor of c_pad (itself a multiple of 128) <= cap."""
    best = 128
    t = 256
    while t <= min(cap, c_pad):
        if c_pad % t == 0:
            best = t
        t += 128
    return best


def _row_tile(ho, row_width, m_cap):
    """Largest divisor tr of ho with tr*row_width <= m_cap (at least 1)."""
    best = 1
    for tr in range(1, ho + 1):
        if ho % tr == 0 and tr * row_width <= m_cap:
            best = tr
    return best


# -----------------------------------------------------------------------------
# Pallas conv kernel: in-kernel im2col (taps folded into K) + one MXU matmul
# -----------------------------------------------------------------------------
def _conv_kernel(x_ref, w_ref, o_ref, *scratch, taps, m_out, tcin, use_lhs, use_acc):
    """One (batch, m-tile, Cout-tile) output block; grid axis 3 reduces over Cin.

    x_ref: (1, 1, m_in, tcin)        bf16 flattened spatial rows (with halo)
    w_ref: (1, ntaps*tcin, tcout)    bf16, rows ordered (tap, channel)
    o_ref: (1, 1, m_out, tcout)      out dtype; VMEM-resident across Cin axis
    scratch: [lhs_ref (m_out, ntaps*tcin) bf16] if ntaps>1,
             [acc_ref (m_out, tcout) f32]       if n_cin_tiles>1
    """
    rest = list(scratch)
    lhs_ref = rest.pop(0) if use_lhs else None
    acc_ref = rest.pop(0) if use_acc else None

    if use_lhs:
        # Build the im2col LHS once per tile in VMEM (static row/lane offsets).
        for t, off in enumerate(taps):
            lhs_ref[:, t * tcin:(t + 1) * tcin] = x_ref[0, 0, off:off + m_out, :]
        lhs = lhs_ref[...]
    else:
        lhs = x_ref[0, 0]                       # 1x1 conv: m_in == m_out

    part = jnp.dot(lhs, w_ref[0], preferred_element_type=jnp.float32)

    if not use_acc:
        o_ref[0, 0] = part.astype(o_ref.dtype)
    else:
        k = pl.program_id(3)

        @pl.when(k == 0)
        def _():
            acc_ref[...] = part

        @pl.when(k > 0)
        def _():
            acc_ref[...] += part

        @pl.when(k == pl.num_programs(3) - 1)
        def _():
            o_ref[0, 0] = acc_ref[...].astype(o_ref.dtype)


def conv2d_pallas(x, w_hwio, padding, *, m_cap=1024, cin_cap=256, cout_cap=256,
                  out_dtype=jnp.bfloat16):
    """Stride-1 2-D convolution, NHWC activations, HWIO weights, bf16 MXU feed.

    x: (B, H, W, Cin).  w_hwio: (kh, kw, Cin, Cout).  padding: int (symmetric,
    PyTorch-style).  Returns (B, Ho, Wo, Cout) in `out_dtype` with
    Ho = H + 2*padding - kh + 1 (== H for 'same' padding with odd kernels).
    """
    B, H, W, Cin = x.shape
    kh, kw, Cin_w, Cout = w_hwio.shape
    assert Cin == Cin_w
    p = int(padding)

    # ---- channel padding / tiling (tiles always divide the padded dims) -----
    if Cin <= cin_cap:
        Cin_pad, tcin, n_k = Cin, Cin, 1
    else:
        Cin_pad = _round_up(Cin, 128)
        tcin = _largest_tile(Cin_pad, cin_cap)
        n_k = Cin_pad // tcin
    Cout_pad = _round_up(Cout, 128)              # lane-dense output stores
    tcout = Cout_pad if Cout_pad <= cout_cap else _largest_tile(Cout_pad, cout_cap)
    n_j = Cout_pad // tcout

    # ---- spatial geometry ----------------------------------------------------
    Hp, Wp = H + 2 * p, W + 2 * p
    Ho, Wo = Hp - kh + 1, Wp - kw + 1
    Wp_pad = _round_up(Wp, 8)                    # 8-aligned row stride -> aligned taps
    extra = 1 if kw > 1 else 0                   # 1 extra row so shifted windows fit

    tr = _row_tile(Ho, Wp_pad, m_cap)            # output rows per spatial tile
    n_m = Ho // tr
    tr_in = tr + kh - 1 + extra
    m_in = tr_in * Wp_pad
    m_out = tr * Wp_pad
    ntaps = kh * kw
    taps = tuple(dy * Wp_pad + dx for dy in range(kh) for dx in range(kw))
    assert taps[-1] + m_out <= m_in

    # ---- pack input: halo pad, lane-align W, channel pad, bf16, row tiles ----
    xb = x.astype(jnp.bfloat16)
    xb = jnp.pad(xb, ((0, 0), (p, p + extra), (p, p + Wp_pad - Wp),
                      (0, Cin_pad - Cin)))
    if n_m == 1:
        xt = xb[:, None]
    else:
        xt = jnp.stack([xb[:, i * tr:i * tr + tr_in] for i in range(n_m)], axis=1)
    xt = xt.reshape(B, n_m, m_in, Cin_pad)

    # ---- pack weights: (n_k, ntaps*tcin, Cout_pad), rows ordered (tap, ch) ---
    wb = jnp.pad(w_hwio, ((0, 0), (0, 0), (0, Cin_pad - Cin),
                          (0, Cout_pad - Cout))).astype(jnp.bfloat16)
    wb = wb.reshape(ntaps, n_k, tcin, Cout_pad).transpose(1, 0, 2, 3)
    wb = wb.reshape(n_k, ntaps * tcin, Cout_pad)

    # ---- scratch / cost ------------------------------------------------------
    use_lhs = ntaps > 1
    use_acc = n_k > 1
    scratch_shapes = []
    if use_lhs:
        scratch_shapes.append(pltpu.VMEM((m_out, ntaps * tcin), jnp.bfloat16))
    if use_acc:
        scratch_shapes.append(pltpu.VMEM((m_out, tcout), jnp.float32))

    out_itemsize = 2 if out_dtype == jnp.bfloat16 else 4
    flops = 2 * B * n_m * m_out * (ntaps * tcin * n_k) * Cout_pad
    bytes_accessed = (xt.size * 2) + (wb.size * 2) + B * n_m * m_out * Cout_pad * out_itemsize

    kernel = functools.partial(_conv_kernel, taps=taps, m_out=m_out, tcin=tcin,
                               use_lhs=use_lhs, use_acc=use_acc)

    out = pl.pallas_call(
        kernel,
        out_shape=jax.ShapeDtypeStruct((B, n_m, m_out, Cout_pad), out_dtype),
        grid_spec=pltpu.PrefetchScalarGridSpec(
            num_scalar_prefetch=0,
            grid=(B, n_m, n_j, n_k),
            in_specs=[
                pl.BlockSpec((1, 1, m_in, tcin), lambda b, m, j, k: (b, m, 0, k)),
                pl.BlockSpec((1, ntaps * tcin, tcout), lambda b, m, j, k: (k, 0, j)),
            ],
            out_specs=pl.BlockSpec((1, 1, m_out, tcout), lambda b, m, j, k: (b, m, 0, j)),
            scratch_shapes=scratch_shapes,
        ),
        compiler_params=pltpu.CompilerParams(
            dimension_semantics=("parallel", "parallel", "parallel", "arbitrary"),
            vmem_limit_bytes=48 * 1024 * 1024),
        cost_estimate=pl.CostEstimate(flops=int(flops), transcendentals=0,
                                      bytes_accessed=int(bytes_accessed)),
    )(xt, wb)

    out = out.reshape(B, Ho, Wp_pad, Cout_pad)
    return out[:, :, :Wo, :Cout]                 # drop garbage cols + channel pad


# -----------------------------------------------------------------------------
# Elementwise / reduction glue (XLA): BatchNorm (batch stats), GELU, MaxPool
# -----------------------------------------------------------------------------
def batchnorm2d(x, gamma, beta, eps=1e-5):
    # training-mode BatchNorm2d forward: statistics over (N, H, W)
    x = x.astype(jnp.float32)
    mean = x.mean(axis=(0, 1, 2), keepdims=True)
    var = ((x - mean) ** 2).mean(axis=(0, 1, 2), keepdims=True)
    return (x - mean) * jax.lax.rsqrt(var + eps) * gamma + beta


def gelu(x):
    return jax.nn.gelu(x, approximate=False)     # exact (erf) GELU, like nn.GELU()


def maxpool2(x):
    B, H, W, C = x.shape
    ho, wo = H // 2, W // 2
    return x[:, :ho * 2, :wo * 2, :].reshape(B, ho, 2, wo, 2, C).max(axis=(2, 4))


# -----------------------------------------------------------------------------
# Parameters (deterministic, gamma=1 / beta=0, conv weights in HWIO layout)
# -----------------------------------------------------------------------------
def _norm(c):
    return {'gamma': jnp.ones((c,), jnp.float32), 'beta': jnp.zeros((c,), jnp.float32)}


def _conv_w(key, kh, kw, cin, cout):
    return jax.random.normal(key, (kh, kw, cin, cout), jnp.float32) / math.sqrt(cin * kh * kw)


def init_unet_downsample(key, cin, cout):
    k = jax.random.split(key, 3)
    rb = {'c1_w': _conv_w(k[0], 3, 3, cin, cout), 'n1': _norm(cout),
          'c2_w': _conv_w(k[1], 3, 3, cout, cout), 'n2': _norm(cout),
          'out_n': _norm(cout)}
    if cin != cout:
        rb['res_w'] = _conv_w(k[2], 1, 1, cin, cout)
        rb['res_n'] = _norm(cout)
    else:
        rb['res_w'] = None
        rb['res_n'] = None
    return {'conv1': rb}


# -----------------------------------------------------------------------------
# Module forward passes
# -----------------------------------------------------------------------------
def residual_block3_forward(p, x):
    # normType='batch'
    if p['res_w'] is not None:
        residual = batchnorm2d(conv2d_pallas(x, p['res_w'], 0),
                               p['res_n']['gamma'], p['res_n']['beta'])
    else:
        residual = x
    y1 = gelu(batchnorm2d(conv2d_pallas(x, p['c1_w'], 1),
                          p['n1']['gamma'], p['n1']['beta']))
    y = gelu(batchnorm2d(conv2d_pallas(y1, p['c2_w'], 1),
                         p['n2']['gamma'], p['n2']['beta']))
    return batchnorm2d(y + residual, p['out_n']['gamma'], p['out_n']['beta'])


def unet_downsample_forward(params, x_nchw):
    x = jnp.transpose(x_nchw, (0, 2, 3, 1)).astype(jnp.float32)   # NCHW -> NHWC
    conv1_out = residual_block3_forward(params['conv1'], x)
    y = maxpool2(conv1_out) + maxpool2(x)
    return jnp.transpose(y, (0, 3, 1, 2))                         # NHWC -> NCHW


# -----------------------------------------------------------------------------
if __name__ == "__main__":
    key = jax.random.PRNGKey(0)
    kx, kw3, kw1, kp, kxin = jax.random.split(key, 5)

    # --- sanity check: Pallas conv vs. lax.conv on the same bf16 inputs -------
    xc = jax.random.normal(kx, (2, 16, 16, 32), jnp.float32)
    wc3 = jax.random.normal(kw3, (3, 3, 32, 48), jnp.float32) * 0.1
    ref3 = jax.lax.conv_general_dilated(
        xc.astype(jnp.bfloat16), wc3.astype(jnp.bfloat16), (1, 1), 'SAME',
        dimension_numbers=('NHWC', 'HWIO', 'NHWC'),
        preferred_element_type=jnp.float32)
    got3 = conv2d_pallas(xc, wc3, 1).astype(jnp.float32)
    assert got3.shape == ref3.shape
    assert jnp.allclose(got3, ref3, atol=5e-2, rtol=5e-2), \
        float(jnp.max(jnp.abs(got3 - ref3)))

    # spatially tiled path (2 row tiles) exercises the halo handling
    got3t = conv2d_pallas(xc, wc3, 1, m_cap=256).astype(jnp.float32)
    assert jnp.allclose(got3t, ref3, atol=5e-2, rtol=5e-2), \
        float(jnp.max(jnp.abs(got3t - ref3)))

    wc1 = jax.random.normal(kw1, (1, 1, 32, 48), jnp.float32) * 0.1
    ref1 = jax.lax.conv_general_dilated(
        xc.astype(jnp.bfloat16), wc1.astype(jnp.bfloat16), (1, 1), 'VALID',
        dimension_numbers=('NHWC', 'HWIO', 'NHWC'),
        preferred_element_type=jnp.float32)
    got1 = conv2d_pallas(xc, wc1, 0).astype(jnp.float32)
    assert jnp.allclose(got1, ref1, atol=5e-2, rtol=5e-2), \
        float(jnp.max(jnp.abs(got1 - ref1)))

    # --- UNetDownsample forward ------------------------------------------------
    # in_channels == out_channels (required by `down(conv1(x)) + down(x)`).
    B, C, H, W = 2, 32, 16, 16
    params = init_unet_downsample(kp, C, C)
    x = jax.random.normal(kxin, (B, C, H, W), jnp.float32)

    fwd = jax.jit(unet_downsample_forward)
    out = jax.block_until_ready(fwd(params, x))

    assert out.shape == (B, C, H // 2, W // 2), out.shape
    assert bool(jnp.all(jnp.isfinite(out)))
    print("KERNEL_OK")
</pallas_src>

<mosaic_0001>
module attributes {stable_mosaic.version = 11 : i64} {
  func.func @_conv_kernel(%arg0: i32, %arg1: i32, %arg2: i32, %arg3: i32, %arg4: memref<1x1x456x32xbf16, #tpu.memory_space<vmem>>, %arg5: memref<1x288x128xbf16, #tpu.memory_space<vmem>>, %arg6: memref<1x1x384x128xbf16, #tpu.memory_space<vmem>>, %arg7: memref<384x288xbf16, #tpu.memory_space<vmem>>) attributes {dimension_semantics = [#tpu.dimension_semantics<parallel>, #tpu.dimension_semantics<parallel>, #tpu.dimension_semantics<parallel>, #tpu.dimension_semantics<arbitrary>], iteration_bounds = array<i64: 2, 1, 1, 1>, scalar_prefetch = 0 : i64, scratch_operands = 1 : i64, tpu.core_type = #tpu.core_type<tc>, window_params = [{transform_indices = @transform_0, window_bounds = array<i64: 1, 1, 456, 32>}, {transform_indices = @transform_1, window_bounds = array<i64: 1, 288, 128>}, {transform_indices = @transform_2, window_bounds = array<i64: 1, 1, 384, 128>}]} {
    %c0 = arith.constant 0 : index
    %c0_0 = arith.constant 0 : index
    %c0_1 = arith.constant 0 : index
    %c0_2 = arith.constant 0 : index
    %0 = vector.load %arg4[%c0, %c0_0, %c0_1, %c0_2] : memref<1x1x456x32xbf16, #tpu.memory_space<vmem>>, vector<1x1x384x32xbf16>
    %1 = vector.shape_cast %0 : vector<1x1x384x32xbf16> to vector<384x32xbf16>
    %c0_3 = arith.constant 0 : index
    %c0_4 = arith.constant 0 : index
    %2 = vector.load %arg7[%c0_3, %c0_4] : memref<384x288xbf16, #tpu.memory_space<vmem>>, vector<384x32xbf16>
    tpu.vector_store %arg7[%c0_3, %c0_4], %1 {strides = array<i32>} : memref<384x288xbf16, #tpu.memory_space<vmem>>, vector<384x32xbf16>,
    %c0_5 = arith.constant 0 : index
    %c0_6 = arith.constant 0 : index
    %c1 = arith.constant 1 : index
    %c0_7 = arith.constant 0 : index
    %3 = vector.load %arg4[%c0_5, %c0_6, %c1, %c0_7] : memref<1x1x456x32xbf16, #tpu.memory_space<vmem>>, vector<1x1x384x32xbf16>
    %4 = vector.shape_cast %3 : vector<1x1x384x32xbf16> to vector<384x32xbf16>
    %c0_8 = arith.constant 0 : index
    %c32 = arith.constant 32 : index
    %5 = vector.load %arg7[%c0_8, %c32] : memref<384x288xbf16, #tpu.memory_space<vmem>>, vector<384x32xbf16>
    tpu.vector_store %arg7[%c0_8, %c32], %4 {strides = array<i32>} : memref<384x288xbf16, #tpu.memory_space<vmem>>, vector<384x32xbf16>,
    %c0_9 = arith.constant 0 : index
    %c0_10 = arith.constant 0 : index
    %c2 = arith.constant 2 : index
    %c0_11 = arith.constant 0 : index
    %6 = vector.load %arg4[%c0_9, %c0_10, %c2, %c0_11] : memref<1x1x456x32xbf16, #tpu.memory_space<vmem>>, vector<1x1x384x32xbf16>
    %7 = vector.shape_cast %6 : vector<1x1x384x32xbf16> to vector<384x32xbf16>
    %c0_12 = arith.constant 0 : index
    %c64 = arith.constant 64 : index
    %8 = vector.load %arg7[%c0_12, %c64] : memref<384x288xbf16, #tpu.memory_space<vmem>>, vector<384x32xbf16>
    tpu.vector_store %arg7[%c0_12, %c64], %7 {strides = array<i32>} : memref<384x288xbf16, #tpu.memory_space<vmem>>, vector<384x32xbf16>,
    %c0_13 = arith.constant 0 : index
    %c0_14 = arith.constant 0 : index
    %c24 = arith.constant 24 : index
    %c0_15 = arith.constant 0 : index
    %9 = vector.load %arg4[%c0_13, %c0_14, %c24, %c0_15] : memref<1x1x456x32xbf16, #tpu.memory_space<vmem>>, vector<1x1x384x32xbf16>
    %10 = vector.shape_cast %9 : vector<1x1x384x32xbf16> to vector<384x32xbf16>
    %c0_16 = arith.constant 0 : index
    %c96 = arith.constant 96 : index
    %11 = vector.load %arg7[%c0_16, %c96] : memref<384x288xbf16, #tpu.memory_space<vmem>>, vector<384x32xbf16>
    tpu.vector_store %arg7[%c0_16, %c96], %10 {strides = array<i32>} : memref<384x288xbf16, #tpu.memory_space<vmem>>, vector<384x32xbf16>,
    %c0_17 = arith.constant 0 : index
    %c0_18 = arith.constant 0 : index
    %c25 = arith.constant 25 : index
    %c0_19 = arith.constant 0 : index
    %12 = vector.load %arg4[%c0_17, %c0_18, %c25, %c0_19] : memref<1x1x456x32xbf16, #tpu.memory_space<vmem>>, vector<1x1x384x32xbf16>
    %13 = vector.shape_cast %12 : vector<1x1x384x32xbf16> to vector<384x32xbf16>
    %c0_20 = arith.constant 0 : index
    %c128 = arith.constant 128 : index
    %14 = vector.load %arg7[%c0_20, %c128] : memref<384x288xbf16, #tpu.memory_space<vmem>>, vector<384x32xbf16>
    tpu.vector_store %arg7[%c0_20, %c128], %13 {strides = array<i32>} : memref<384x288xbf16, #tpu.memory_space<vmem>>, vector<384x32xbf16>,
    %c0_21 = arith.constant 0 : index
    %c0_22 = arith.constant 0 : index
    %c26 = arith.constant 26 : index
    %c0_23 = arith.constant 0 : index
    %15 = vector.load %arg4[%c0_21, %c0_22, %c26, %c0_23] : memref<1x1x456x32xbf16, #tpu.memory_space<vmem>>, vector<1x1x384x32xbf16>
    %16 = vector.shape_cast %15 : vector<1x1x384x32xbf16> to vector<384x32xbf16>
    %c0_24 = arith.constant 0 : index
    %c160 = arith.constant 160 : index
    %17 = vector.load %arg7[%c0_24, %c160] : memref<384x288xbf16, #tpu.memory_space<vmem>>, vector<384x32xbf16>
    tpu.vector_store %arg7[%c0_24, %c160], %16 {strides = array<i32>} : memref<384x288xbf16, #tpu.memory_space<vmem>>, vector<384x32xbf16>,
    %c0_25 = arith.constant 0 : index
    %c0_26 = arith.constant 0 : index
    %c48 = arith.constant 48 : index
    %c0_27 = arith.constant 0 : index
    %18 = vector.load %arg4[%c0_25, %c0_26, %c48, %c0_27] : memref<1x1x456x32xbf16, #tpu.memory_space<vmem>>, vector<1x1x384x32xbf16>
    %19 = vector.shape_cast %18 : vector<1x1x384x32xbf16> to vector<384x32xbf16>
    %c0_28 = arith.constant 0 : index
    %c192 = arith.constant 192 : index
    %20 = vector.load %arg7[%c0_28, %c192] : memref<384x288xbf16, #tpu.memory_space<vmem>>, vector<384x32xbf16>
    tpu.vector_store %arg7[%c0_28, %c192], %19 {strides = array<i32>} : memref<384x288xbf16, #tpu.memory_space<vmem>>, vector<384x32xbf16>,
    %c0_29 = arith.constant 0 : index
    %c0_30 = arith.constant 0 : index
    %c49 = arith.constant 49 : index
    %c0_31 = arith.constant 0 : index
    %21 = vector.load %arg4[%c0_29, %c0_30, %c49, %c0_31] : memref<1x1x456x32xbf16, #tpu.memory_space<vmem>>, vector<1x1x384x32xbf16>
    %22 = vector.shape_cast %21 : vector<1x1x384x32xbf16> to vector<384x32xbf16>
    %c0_32 = arith.constant 0 : index
    %c224 = arith.constant 224 : index
    %23 = vector.load %arg7[%c0_32, %c224] : memref<384x288xbf16, #tpu.memory_space<vmem>>, vector<384x32xbf16>
    tpu.vector_store %arg7[%c0_32, %c224], %22 {strides = array<i32>} : memref<384x288xbf16, #tpu.memory_space<vmem>>, vector<384x32xbf16>,
    %c0_33 = arith.constant 0 : index
    %c0_34 = arith.constant 0 : index
    %c50 = arith.constant 50 : index
    %c0_35 = arith.constant 0 : index
    %24 = vector.load %arg4[%c0_33, %c0_34, %c50, %c0_35] : memref<1x1x456x32xbf16, #tpu.memory_space<vmem>>, vector<1x1x384x32xbf16>
    %25 = vector.shape_cast %24 : vector<1x1x384x32xbf16> to vector<384x32xbf16>
    %c0_36 = arith.constant 0 : index
    %c256 = arith.constant 256 : index
    %26 = vector.load %arg7[%c0_36, %c256] : memref<384x288xbf16, #tpu.memory_space<vmem>>, vector<384x32xbf16>
    tpu.vector_store %arg7[%c0_36, %c256], %25 {strides = array<i32>} : memref<384x288xbf16, #tpu.memory_space<vmem>>, vector<384x32xbf16>,
    %c0_37 = arith.constant 0 : index
    %c0_38 = arith.constant 0 : index
    %27 = vector.load %arg7[%c0_37, %c0_38] : memref<384x288xbf16, #tpu.memory_space<vmem>>, vector<384x288xbf16>
    %c0_39 = arith.constant 0 : index
    %c0_40 = arith.constant 0 : index
    %c0_41 = arith.constant 0 : index
    %28 = vector.load %arg5[%c0_39, %c0_40, %c0_41] : memref<1x288x128xbf16, #tpu.memory_space<vmem>>, vector<1x288x128xbf16>
    %29 = vector.shape_cast %28 : vector<1x288x128xbf16> to vector<288x128xbf16>
    %cst = arith.constant dense<0.000000e+00> : vector<384x128xf32>
    %30 = tpu.matmul %27, %29, %cst {dimension_numbers = #tpu.dot_dimension_numbers<[1], [0], [0], [1], [0, 0, 1, 1], [], []>} : vector<384x288xbf16>, vector<288x128xbf16>, vector<384x128xf32> -> vector<384x128xf32>
    %31 = arith.truncf %30 : vector<384x128xf32> to vector<384x128xbf16>
    %c0_42 = arith.constant 0 : index
    %c0_43 = arith.constant 0 : index
    %c0_44 = arith.constant 0 : index
    %c0_45 = arith.constant 0 : index
    %32 = vector.load %arg6[%c0_42, %c0_43, %c0_44, %c0_45] : memref<1x1x384x128xbf16, #tpu.memory_space<vmem>>, vector<1x1x384x128xbf16>
    %33 = vector.shape_cast %32 : vector<1x1x384x128xbf16> to vector<384x128xbf16>
    %34 = vector.shape_cast %31 : vector<384x128xbf16> to vector<1x1x384x128xbf16>
    tpu.vector_store %arg6[%c0_42, %c0_43, %c0_44, %c0_45], %34 {strides = array<i32>} : memref<1x1x384x128xbf16, #tpu.memory_space<vmem>>, vector<1x1x384x128xbf16>,
    return
  }
  func.func @transform_0(%arg0: i32, %arg1: i32, %arg2: i32, %arg3: i32) -> (i32, i32, i32, i32) {
    %c0_i32 = arith.constant 0 : i32
    %c0_i32_0 = arith.constant 0 : i32
    return %arg0, %arg1, %c0_i32, %arg3 : i32, i32, i32, i32
  }
  func.func @transform_1(%arg0: i32, %arg1: i32, %arg2: i32, %arg3: i32) -> (i32, i32, i32) {
    %c0_i32 = arith.constant 0 : i32
    %c0_i32_0 = arith.constant 0 : i32
    return %arg3, %c0_i32, %arg2 : i32, i32, i32
  }
  func.func @transform_2(%arg0: i32, %arg1: i32, %arg2: i32, %arg3: i32) -> (i32, i32, i32, i32) {
    %c0_i32 = arith.constant 0 : i32
    %c0_i32_0 = arith.constant 0 : i32
    return %arg0, %arg1, %c0_i32, %arg2 : i32, i32, i32, i32
  }
}

</mosaic_0001>

<bundles_post_ra>
// kernel: tpu_custom_call.1
= control target key start
LH: loop header
LB: loop body
LE: loop exit
PB: predicated region body
PF: predicated region fallthrough
CT: control target
= control target key end

     0   :  { %7 = vsyncpa [#allocation4], 0  ;;  %s9185_s0 = inlined_call_operand.vmem [shape: bf16[2,1,456,32], index: 0, kind: input, shape index: {}]   ;;  %s9186_s1 = inlined_call_operand.vmem [shape: bf16[1,288,128], index: 1, kind: input, shape index: {}]   ;;  %s9187_s2 = inlined_call_operand.hbm [shape: bf16[2,1,384,128], index: 2, kind: output, shape index: {}]  }
   0x1   :  { %9 = vsyncpa [#allocation4 + $0x1], 0  ;;  %s6298_s9 = smov 0   ;;  %s6300_s10 = smov 0  }
   0x2   :  { %s6302_s11 = smov 0   ;;  %s6304_s12 = smov 0  }
   0x3   :  { %s6306_s13 = smov 0   ;;  %s6308_s14 = smov 0  }
   0x4 LB: > { %s5487_s15 = sadd.s32 4294967295, %s6277_s14   ;;  %s5488_s16 = sadd.s32 4294967294, %s6277_s14   ;;  %s6277_s14 = sphi %s6308_s14, %s15_s14   ;;  %s6273_s13 = sphi %s6306_s13, %s9228_s13   ;;  %s6269_s12 = sphi %s6304_s12, %s9227_s12   ;;  %s6265_s11 = sphi %s6302_s11, %s9226_s11   ;;  %s6261_s10 = sphi %s6300_s10, %s9225_s10   ;;  %s6257_s9 = sphi %s6298_s9, %s9224_s9  }
   0x5   : > { %s41_s17 = sadd.s32 1, %s6273_s13  ;;  %s110_s18 = sadd.s32 1, %s6265_s11 }
   0x6   : > { %p43_p0 = scmp.ge.s32.totalorder %s41_s17, 2  ;;  %p120_p1 = scmp.ne.s32.totalorder %s6265_s11, %s6261_s10 }
   0x7   : > { %p121_p2 = scmp.eq.s32.totalorder %s5487_s15, 1  ;;  %p126_p3 = scmp.ne.s32.totalorder %s6261_s10, %s6257_s9 }
   0x8   : > { %s9230_s17 = smov (%p43_p0, %s41_s17), 0  ;;  %p127_p5 = scmp.eq.s32.totalorder %s5488_s16, 1 }
   0x9   : > { %p6338_p4 = por %p121_p2, %p120_p1  ;;  %s103_s20 = ssub.s32 %s6273_s13, %s9230_s17 }
   0xa   : > { %p5492_p6 = scmp.ge.s32.totalorder %s6277_s14, 1  ;;  %p108_p7 = scmp.eq.s32.totalorder %s103_s20, 0 }
   0xb   : > { %p6345_p8 = por %p127_p5, %p126_p3  ;;  %p171_p9 = scmp.lt.s32.totalorder %s6277_s14, 3 }
   0xc   : > { %s6351_s22 = scalar_select %p108_p7, %s6265_s11, %s110_s18  }
   0xd   : > { %p172_p10 = pnand %p5492_p6, %p171_p9 }
   0xf   : > { %175 = sbr.rel (%p172_p10) target bundleno = 1068 (0x42c), region = 28 }
  0x14   : > { %p208_p11 = scmp.lt.s32.totalorder %s6269_s12, 1  ;;  %vm375_vm0 = vsmask.f32 3328  ;;  %vm376_vm1 = vsmask.f32 7440  ;;  %s6279_s28 = smov 32  }
  0x15   : > { %vm6368_vm2 = vmor %vm375_vm0, %vm376_vm1  ;;  %vm277_vm3 = vcmask 257024   ;;  %vm1006_vm4 = vcmask 519424   ;;  %vm1153_vm5 = vcmask 1042432   ;;  %vm1154_vm6 = vcmask 1046532   ;;  %s6280_s29 = smov 64   ;;  %s6281_s30 = smov 96  }
  0x16   : > { %s209_s23 = scalar_select %p208_p11, %s6269_s12, 1  ;;  %vm6623_vm7 = vmor %vm1153_vm5, %vm1154_vm6  ;;  %vm1445_vm8 = vcmask 781824   ;;  %vm4799_vm9 = vcmask 261120   ;;  %vm1734_vm10 = vcmask 1044224  }
  0x17   : > { %s205_s25 = sand.u32 1, %s6261_s10   ;;  %s6219_s18 = scalar_lea.hbm %s9187_s2, 384 }
  0x18   : > { %s6136_s24 = smul.u32 228, %s209_s23 }
  0x19   : > { %s8325_s26 = smul.u32 192, %s205_s25 }
  0x1a   : > { %s6358_s27 = scalar_lea.vmem %s9185_s0, %s6136_s24 }
  0x1b   : > { %v328_v0 = vld [vmem:[%s6358_s27 + $0x8] sm:$0xf]  ;;  %v329_v1 = vld [vmem:[%s6358_s27 + $0xc] sm:$0xf]  ;;  %v326_v2 = vld [vmem:[%s6358_s27] sm:$0xf] }
  0x1c   : > { %v398_v3 = vshll.u32 %v328_v0, 16  ;;  %v402_v4 = vshrl.u32 %v328_v0, 16  ;;  %v408_v5 = vshll.u32 %v329_v1, 16  ;;  %v412_v6 = vshrl.u32 %v329_v1, 16  ;;  %v327_v7 = vld [vmem:[%s6358_s27 + $0x4] sm:$0xf] }
  0x1d   : > { %v379_v8 = vshrl.u32 %v326_v2, 16  ;;  %v382_v9 = vshll.u32 %v326_v2, 16  ;;  %v388_v10 = vshll.u32 %v327_v7, 16  ;;  %v392_v11 = vshrl.u32 %v327_v7, 16  ;;  %v330_v12 = vld [vmem:[%s6358_s27 + $0x10] sm:$0xf] }
  0x1e   : > { %v400_v13 = vrot.slane %v398_v3, 5  ;;  %v404_v14 = vrot.slane %v402_v4, 4  ;;  %v410_v15 = vrot.slane %v408_v5, 5  ;;  %v414_v16 = vrot.slane %v412_v6, 4  ;;  %v333_v17 = vld [vmem:[%s6358_s27 + $0x1c] sm:$0xf] }
  0x1f   : > { %v381_v18 = vrot.slane %v379_v8, 4  ;;  %v384_v19 = vrot.slane %v382_v9, 5  ;;  %v394_v20 = vrot.slane %v392_v11, 4  ;;  %v418_v23 = vshll.u32 %v330_v12, 16  ;;  %v332_v29 = vld [vmem:[%s6358_s27 + $0x18] sm:$0xf] }
  0x20   : > { %v405_v21 = vor.u32 %v404_v14, %v400_v13  ;;  %v415_v22 = vor.u32 %v414_v16, %v410_v15  ;;  %v390_v26 = vrot.slane %v388_v10, 5  ;;  %v448_v27 = vshll.u32 %v333_v17, 16  ;;  %v331_v33 = vld [vmem:[%s6358_s27 + $0x14] sm:$0xf]  ;;  %v334_v42 = vld [vmem:[%s6358_s27 + $0x20] sm:$0xf] }
  0x21   : > { %v385_v25 = vor.u32 %v384_v19, %v381_v18  ;;  %v452_v28 = vshrl.u32 %v333_v17, 16  ;;  %v420_v36 = vrot.slane %v418_v23, 5  ;;  %v438_v37 = vshll.u32 %v332_v29, 16  ;;  %v336_v49 = vld [vmem:[%s6358_s27 + $0x28] sm:$0xf]  ;;  %s8368_s3 = scalar_lea.vmem [#allocation3], %s8325_s26 }
  0x22   : > { %v406_v30 = vrot.slane %v405_v21, 4  ;;  %v395_v32 = vor.u32 %v394_v20, %v390_v26  ;;  %v416_v35 = vrot.slane %v415_v22, 4  ;;  %v450_v39 = vrot.slane %v448_v27, 5  ;;  %v335_v52 = vld [vmem:[%s6358_s27 + $0x24] sm:$0xf]  ;;  %s5371_s5 = sshll.u32 %s8368_s3, 4  ;;  %s5372_s5 = int_to_ptr.vmem [resolvable:$true] %s5371_s5 }
  0x23   : > { %v386_v31 = vrot.slane %v385_v25, 4  ;;  %v454_v40 = vrot.slane %v452_v28, 4  ;;  %v442_v41 = vshrl.u32 %v332_v29, 16  ;;  %v422_v43 = vshrl.u32 %v330_v12, 16  ;;  %v337_v6 = vld [vmem:[%s6358_s27 + $0x2c] sm:$0xf] }
  0x24   : > { %v411_v34 = vsel %vm6368_vm2, %v406_v30, %v410_v15  ;;  %v428_v44 = vshll.u32 %v331_v33, 16  ;;  %v432_v45 = vshrl.u32 %v331_v33, 16  ;;  %v396_v46 = vrot.slane %v395_v32, 4  ;;  %v339_v12 = vld [vmem:[%s6358_s27 + $0x34] sm:$0xf] }
  0x25   : > { %866 = vrot.lane.b32.xlu1 %v411_v34, %s6279_s28  ;;  %v391_v38 = vsel %vm6368_vm2, %v386_v31, %v390_v26  ;;  %v440_v47 = vrot.slane %v438_v37, 5  ;;  %v444_v48 = vrot.slane %v442_v41, 4  ;;  %v424_v50 = vrot.slane %v422_v43, 4  ;;  %v338_v14 = vld [vmem:[%s6358_s27 + $0x30] sm:$0xf] }
  0x26   : > { %862 = vrot.lane.b32.xlu0 %v391_v38, %s6279_s28  ;;  %v434_v51 = vrot.slane %v432_v45, 4  ;;  %v421_v53 = vsel %vm6368_vm2, %v416_v35, %v420_v36  ;;  %v455_v54 = vor.u32 %v454_v40, %v450_v39  ;;  %v458_v55 = vshll.u32 %v334_v42, 16  ;;  %v340_v31 = vld [vmem:[%s6358_s27 + $0x38] sm:$0xf]  ;;  %v342_v37 = vld [vmem:[%s6358_s27 + $0x40] sm:$0xf] }
  0x27   : > { %v425_v56 = vor.u32 %v424_v50, %v420_v36  ;;  %v430_v57 = vrot.slane %v428_v44, 5  ;;  %v478_v58 = vshll.u32 %v336_v49, 16  ;;  %v482_v59 = vshrl.u32 %v336_v49, 16 }
  0x28   : > { %v401_v60 = vsel %vm6368_vm2, %v396_v46, %v400_v13  ;;  %v445_v61 = vor.u32 %v444_v48, %v440_v47  ;;  %v468_v62 = vshll.u32 %v335_v52, 16  ;;  %v472_v63 = vshrl.u32 %v335_v52, 16 }
  0x29   : > { %v426_v0 = vrot.slane %v425_v56, 4  ;;  %v435_v1 = vor.u32 %v434_v51, %v430_v57  ;;  %v460_v2 = vrot.slane %v458_v55, 5  ;;  %v462_v3 = vshrl.u32 %v334_v42, 16  ;;  %v343_v55 = vld [vmem:[%s6358_s27 + $0x44] sm:$0xf] }
  0x2a   : > { %v456_v4 = vrot.slane %v455_v54, 4  ;;  %v480_v7 = vrot.slane %v478_v58, 5  ;;  %v484_v8 = vrot.slane %v482_v59, 4  ;;  %v446_v9 = vrot.slane %v445_v61, 4  ;;  %v345_v61 = vld [vmem:[%s6358_s27 + $0x4c] sm:$0xf] }
  0x2b   : > { %v431_v5 = vsel %vm6368_vm2, %v426_v0, %v430_v57  ;;  %v470_v10 = vrot.slane %v468_v62, 5  ;;  %v474_v11 = vrot.slane %v472_v63, 4  ;;  %v436_v13 = vrot.slane %v435_v1, 4  ;;  %v344_v63 = vld [vmem:[%s6358_s27 + $0x48] sm:$0xf] }
  0x2c   : > { %870 = vrot.lane.b32.xlu2 %v431_v5, %s6279_s28  ;;  %v488_v15 = vshll.u32 %v337_v6, 16  ;;  %v464_v16 = vrot.slane %v462_v3, 4  ;;  %v461_v17 = vsel %vm6368_vm2, %v456_v4, %v460_v2  ;;  %v485_v18 = vor.u32 %v484_v8, %v480_v7 }
  0x2d   : > { %868 = vrot.lane.b32.xlu1 %v421_v53, %s6279_s28  ;;  %v508_v19 = vshll.u32 %v339_v12, 16  ;;  %v512_v20 = vshrl.u32 %v339_v12, 16  ;;  %v451_v21 = vsel %vm6368_vm2, %v446_v9, %v450_v39  ;;  %v475_v22 = vor.u32 %v474_v11, %v470_v10  ;;  %v341_v39 = vld [vmem:[%s6358_s27 + $0x3c] sm:$0xf] }
  0x2e   : > { %864 = vrot.lane.b32.xlu0 %v401_v60, %s6279_s28  ;;  %v498_v23 = vshll.u32 %v338_v14, 16  ;;  %v502_v25 = vshrl.u32 %v338_v14, 16  ;;  %v492_v26 = vshrl.u32 %v337_v6, 16  ;;  %v441_v27 = vsel %vm6368_vm2, %v436_v13, %v440_v47 }
  0x2f   : > { %v465_v28 = vor.u32 %v464_v16, %v460_v2  ;;  %v486_v29 = vrot.slane %v485_v18, 4  ;;  %v490_v30 = vrot.slane %v488_v15, 5  ;;  %v510_v32 = vrot.slane %v508_v19, 5  ;;  %v346_v19 = vld [vmem:[%s6358_s27 + $0x50] sm:$0xf] }
  0x30   : > { %v514_v33 = vrot.slane %v512_v20, 4  ;;  %v476_v34 = vrot.slane %v475_v22, 4  ;;  %v500_v35 = vrot.slane %v498_v23, 5  ;;  %v504_v36 = vrot.slane %v502_v25, 4  ;;  %v347_v23 = vld [vmem:[%s6358_s27 + $0x54] sm:$0xf] }
  0x31   : > { %v466_v38 = vrot.slane %v465_v28, 4  ;;  %v494_v40 = vrot.slane %v492_v26, 4  ;;  %v518_v41 = vshll.u32 %v340_v31, 16  ;;  %v491_v42 = vsel %vm6368_vm2, %v486_v29, %v490_v30 }
  0x32   : > { %v515_v43 = vor.u32 %v514_v33, %v510_v32  ;;  %v538_v44 = vshll.u32 %v342_v37, 16  ;;  %v542_v45 = vshrl.u32 %v342_v37, 16  ;;  %v481_v46 = vsel %vm6368_vm2, %v476_v34, %v480_v7 }
  0x33   : > { %v505_v47 = vor.u32 %v504_v36, %v500_v35  ;;  %v528_v48 = vshll.u32 %v341_v39, 16  ;;  %v532_v49 = vshrl.u32 %v341_v39, 16  ;;  %v522_v50 = vshrl.u32 %v340_v31, 16 }
  0x34   : > { %872 = vrot.lane.b32.xlu2 %v441_v27, %s6279_s28  ;;  %v471_v51 = vsel %vm6368_vm2, %v466_v38, %v470_v10  ;;  %v495_v52 = vor.u32 %v494_v40, %v490_v30  ;;  %v516_v53 = vrot.slane %v515_v43, 4  ;;  %v520_v54 = vrot.slane %v518_v41, 5  ;;  %v351_v43 = vld [vmem:[%s6358_s27 + $0x64] sm:$0xf] }
  0x35   : > { %876 = vrot.lane.b32.xlu1 %v461_v17, %s6279_s28  ;;  %v540_v56 = vrot.slane %v538_v44, 5  ;;  %v544_v57 = vrot.slane %v542_v45, 4  ;;  %v506_v58 = vrot.slane %v505_v47, 4  ;;  %v530_v59 = vrot.slane %v528_v48, 5  ;;  %v348_v17 = vld [vmem:[%s6358_s27 + $0x58] sm:$0xf] }
  0x36   : > { %874 = vrot.lane.b32.xlu0 %v451_v21, %s6279_s28  ;;  %v534_v60 = vrot.slane %v532_v49, 4  ;;  %v496_v62 = vrot.slane %v495_v52, 4  ;;  %v524_v0 = vrot.slane %v522_v50, 4  ;;  %v548_v1 = vshll.u32 %v343_v55, 16  ;;  %v350_v48 = vld [vmem:[%s6358_s27 + $0x60] sm:$0xf] }
  0x37   : > { %v521_v2 = vsel %vm6368_vm2, %v516_v53, %v520_v54  ;;  %v545_v3 = vor.u32 %v544_v57, %v540_v56  ;;  %v568_v4 = vshll.u32 %v345_v61, 16  ;;  %v572_v5 = vshrl.u32 %v345_v61, 16 }
  0x38   : > { %v511_v6 = vsel %vm6368_vm2, %v506_v58, %v510_v32  ;;  %v535_v7 = vor.u32 %v534_v60, %v530_v59  ;;  %v558_v8 = vshll.u32 %v344_v63, 16  ;;  %v562_v9 = vshrl.u32 %v344_v63, 16 }
  0x39   : > { %v552_v10 = vshrl.u32 %v343_v55, 16  ;;  %v501_v11 = vsel %vm6368_vm2, %v496_v62, %v500_v35  ;;  %v525_v12 = vor.u32 %v524_v0, %v520_v54  ;;  %v546_v13 = vrot.slane %v545_v3, 4  ;;  %v354_v3 = vld [vmem:[%s6358_s27 + $0x70] sm:$0xf] }
  0x3a   : > { %v550_v14 = vrot.slane %v548_v1, 5  ;;  %v570_v15 = vrot.slane %v568_v4, 5  ;;  %v574_v16 = vrot.slane %v572_v5, 4  ;;  %v536_v18 = vrot.slane %v535_v7, 4  ;;  %v353_v7 = vld [vmem:[%s6358_s27 + $0x6c] sm:$0xf] }
  0x3b   : > { %v560_v20 = vrot.slane %v558_v8, 5  ;;  %v564_v21 = vrot.slane %v562_v9, 4  ;;  %v526_v22 = vrot.slane %v525_v12, 4  ;;  %v554_v25 = vrot.slane %v552_v10, 4 }
  0x3c   : > { %878 = vrot.lane.b32.xlu2 %v471_v51, %s6279_s28  ;;  %v598_v26 = vshll.u32 %v348_v17, 16  ;;  %v602_v27 = vshrl.u32 %v348_v17, 16  ;;  %v551_v28 = vsel %vm6368_vm2, %v546_v13, %v550_v14  ;;  %v575_v29 = vor.u32 %v574_v16, %v570_v15 }
  0x3d   : > { %882 = vrot.lane.b32.xlu1 %v491_v42, %s6279_s28  ;;  %v578_v30 = vshll.u32 %v346_v19, 16  ;;  %v541_v31 = vsel %vm6368_vm2, %v536_v18, %v540_v56  ;;  %v565_v32 = vor.u32 %v564_v21, %v560_v20  ;;  %v588_v33 = vshll.u32 %v347_v23, 16  ;;  %v349_v42 = vld [vmem:[%s6358_s27 + $0x5c] sm:$0xf] }
  0x3e   : > { %880 = vrot.lane.b32.xlu0 %v481_v46, %s6279_s28  ;;  %v592_v34 = vshrl.u32 %v347_v23, 16  ;;  %v582_v35 = vshrl.u32 %v346_v19, 16  ;;  %v531_v36 = vsel %vm6368_vm2, %v526_v22, %v530_v59  ;;  %v555_v37 = vor.u32 %v554_v25, %v550_v14  ;;  %v355_v25 = vld [vmem:[%s6358_s27 + $0x74] sm:$0xf] }
  0x3f   : > { %v600_v38 = vrot.slane %v598_v26, 5  ;;  %v604_v39 = vrot.slane %v602_v27, 4  ;;  %v576_v40 = vrot.slane %v575_v29, 4  ;;  %v580_v41 = vrot.slane %v578_v30, 5 }
  0x40   : > { %v566_v44 = vrot.slane %v565_v32, 4  ;;  %v590_v45 = vrot.slane %v588_v33, 5  ;;  %v594_v46 = vrot.slane %v592_v34, 4  ;;  %v556_v47 = vrot.slane %v555_v37, 4  ;;  %v356_v33 = vld [vmem:[%s6358_s27 + $0x78] sm:$0xf] }
  0x41   : > { %v584_v49 = vrot.slane %v582_v35, 4  ;;  %v605_v50 = vor.u32 %v604_v39, %v600_v38  ;;  %v608_v51 = vshll.u32 %v349_v42, 16  ;;  %v628_v52 = vshll.u32 %v351_v43, 16 }
  0x42   : > { %v632_v53 = vshrl.u32 %v351_v43, 16  ;;  %v581_v54 = vsel %vm6368_vm2, %v576_v40, %v580_v41  ;;  %v571_v55 = vsel %vm6368_vm2, %v566_v44, %v570_v15  ;;  %v595_v56 = vor.u32 %v594_v46, %v590_v45 }
  0x43   : > { %v618_v57 = vshll.u32 %v350_v48, 16  ;;  %v622_v58 = vshrl.u32 %v350_v48, 16  ;;  %v612_v59 = vshrl.u32 %v349_v42, 16  ;;  %v561_v60 = vsel %vm6368_vm2, %v556_v47, %v560_v20  ;;  %v360_v47 = vld [vmem:[%s6358_s27 + $0x88] sm:$0xf] }
  0x44   : > { %884 = vrot.lane.b32.xlu2 %v501_v11, %s6279_s28  ;;  %v585_v61 = vor.u32 %v584_v49, %v580_v41  ;;  %v606_v62 = vrot.slane %v605_v50, 4  ;;  %v610_v63 = vrot.slane %v608_v51, 5  ;;  %v630_v0 = vrot.slane %v628_v52, 5  ;;  %v359_v49 = vld [vmem:[%s6358_s27 + $0x84] sm:$0xf] }
  0x45   : > { %888 = vrot.lane.b32.xlu1 %v521_v2, %s6279_s28  ;;  %v634_v1 = vrot.slane %v632_v53, 4  ;;  %v352_v2 = vld [vmem:[%s6358_s27 + $0x68] sm:$0xf]  ;;  %v596_v4 = vrot.slane %v595_v56, 4  ;;  %v620_v5 = vrot.slane %v618_v57, 5  ;;  %v614_v9 = vrot.slane %v612_v59, 4 }
  0x46   : > { %886 = vrot.lane.b32.xlu0 %v511_v6, %s6279_s28  ;;  %v624_v6 = vrot.slane %v622_v58, 4  ;;  %v586_v8 = vrot.slane %v585_v61, 4  ;;  %v611_v10 = vsel %vm6368_vm2, %v606_v62, %v610_v63  ;;  %v638_v12 = vshll.u32 %v352_v2, 16 }
  0x47   : > { %v635_v11 = vor.u32 %v634_v1, %v630_v0  ;;  %v658_v13 = vshll.u32 %v354_v3, 16  ;;  %v662_v14 = vshrl.u32 %v354_v3, 16  ;;  %v648_v15 = vshll.u32 %v353_v7, 16 }
  0x48   : > { %v652_v16 = vshrl.u32 %v353_v7, 16  ;;  %v601_v17 = vsel %vm6368_vm2, %v596_v4, %v600_v38  ;;  %v625_v18 = vor.u32 %v624_v6, %v620_v5  ;;  %v642_v19 = vshrl.u32 %v352_v2, 16 }
  0x49   : > { %v591_v20 = vsel %vm6368_vm2, %v586_v8, %v590_v45  ;;  %v615_v21 = vor.u32 %v614_v9, %v610_v63  ;;  %v636_v22 = vrot.slane %v635_v11, 4  ;;  %v640_v23 = vrot.slane %v638_v12, 5  ;;  %v361_v8 = vld [vmem:[%s6358_s27 + $0x8c] sm:$0xf] }
  0x4a   : > { %v660_v26 = vrot.slane %v658_v13, 5  ;;  %v664_v27 = vrot.slane %v662_v14, 4  ;;  %v654_v29 = vrot.slane %v652_v16, 4  ;;  %v626_v30 = vrot.slane %v625_v18, 4  ;;  %v363_v14 = vld [vmem:[%s6358_s27 + $0x94] sm:$0xf] }
  0x4b   : > { %v616_v32 = vrot.slane %v615_v21, 4  ;;  %v644_v34 = vrot.slane %v642_v19, 4  ;;  %v641_v35 = vsel %vm6368_vm2, %v636_v22, %v640_v23  ;;  %v678_v42 = vshll.u32 %v356_v33, 16 }
  0x4c   : > { %890 = vrot.lane.b32.xlu2 %v531_v36, %s6279_s28  ;;  %v668_v36 = vshll.u32 %v355_v25, 16  ;;  %v665_v37 = vor.u32 %v664_v27, %v660_v26  ;;  %v631_v41 = vsel %vm6368_vm2, %v626_v30, %v630_v0  ;;  %v682_v43 = vshrl.u32 %v356_v33, 16 }
  0x4d   : > { %894 = vrot.lane.b32.xlu1 %v551_v28, %s6279_s28  ;;  %v650_v28 = vrot.slane %v648_v15, 5  ;;  %v672_v44 = vshrl.u32 %v355_v25, 16  ;;  %v621_v45 = vsel %vm6368_vm2, %v616_v32, %v620_v5  ;;  %v645_v46 = vor.u32 %v644_v34, %v640_v23  ;;  %v362_v15 = vld [vmem:[%s6358_s27 + $0x90] sm:$0xf] }
  0x4e   : > { %892 = vrot.lane.b32.xlu0 %v541_v31, %s6279_s28  ;;  %v357_v31 = vld [vmem:[%s6358_s27 + $0x7c] sm:$0xf]  ;;  %v670_v48 = vrot.slane %v668_v36, 5  ;;  %v666_v50 = vrot.slane %v665_v37, 4  ;;  %v684_v56 = vrot.slane %v682_v43, 4  ;;  %v718_v57 = vshll.u32 %v360_v47, 16 }
  0x4f   : > { %v655_v38 = vor.u32 %v654_v29, %v650_v28  ;;  %v688_v39 = vshll.u32 %v357_v31, 16  ;;  %v692_v40 = vshrl.u32 %v357_v31, 16  ;;  %v722_v58 = vshrl.u32 %v360_v47, 16  ;;  %v364_v31 = vld [vmem:[%s6358_s27 + $0x98] sm:$0xf] }
  0x50   : > { %v646_v59 = vrot.slane %v645_v46, 4  ;;  %v712_v61 = vshrl.u32 %v359_v49, 16  ;;  %v674_v62 = vrot.slane %v672_v44, 4  ;;  %v671_v63 = vsel %vm6368_vm2, %v666_v50, %v670_v48  ;;  %v233_v43 = vld [vmem:[%s6358_s27 + $0x10] sm:$0xf] }
  0x51   : > { %v656_v51 = vrot.slane %v655_v38, 4  ;;  %v690_v52 = vrot.slane %v688_v39, 5  ;;  %v694_v53 = vrot.slane %v692_v40, 4  ;;  %v6483_v5 = vrot.slane %v718_v57, 5  ;;  %v366_v40 = vld [vmem:[%s6358_s27 + $0xa0] sm:$0xf] }
  0x52   : > { %v724_v6 = vrot.slane %v722_v58, 4  ;;  %v651_v7 = vsel %vm6368_vm2, %v646_v59, %v650_v28  ;;  %v675_v11 = vor.u32 %v674_v62, %v670_v48  ;;  %v748_v22 = vshll.u32 %v363_v14, 16  ;;  %282 = vst.msk [vmem:[#allocation2 + $0x30] sm:$0xf] %vm277_vm3, %v233_v43  ;;  %v231_v44 = vld [vmem:[%s6358_s27 + $0x8] sm:$0xf] }
  0x53   : > { %v695_v0 = vor.u32 %v694_v53, %v690_v52  ;;  %v661_v3 = vsel %vm6368_vm2, %v656_v51, %v660_v26  ;;  %v752_v23 = vshrl.u32 %v363_v14, 16  ;;  %v738_v25 = vshll.u32 %v362_v15, 16  ;;  %280 = vst.msk [vmem:[#allocation2 + $0x18] sm:$0xf] %vm277_vm3, %v231_v44 }
  0x54   : > { %896 = vrot.lane.b32.xlu2 %v561_v60, %s6279_s28  ;;  %v708_v60 = vshll.u32 %v359_v49, 16  ;;  %v725_v18 = vor.u32 %v724_v6, %v6483_v5  ;;  %v742_v26 = vshrl.u32 %v362_v15, 16  ;;  %v732_v30 = vshrl.u32 %v361_v8, 16  ;;  %v232_v6 = vld [vmem:[%s6358_s27 + $0xc] sm:$0xf] }
  0x55   : > { %900 = vrot.lane.b32.xlu1 %v581_v54, %s6279_s28  ;;  %v358_v54 = vld [vmem:[%s6358_s27 + $0x80] sm:$0xf]  ;;  %v696_v12 = vrot.slane %v695_v0, 4  ;;  %v6505_v36 = vrot.slane %v748_v22, 5  ;;  %v754_v37 = vrot.slane %v752_v23, 4  ;;  %v6507_v38 = vrot.slane %v738_v25, 5 }
  0x56   : > { %898 = vrot.lane.b32.xlu0 %v571_v55, %s6279_s28  ;;  %v680_v55 = vrot.slane %v678_v42, 5  ;;  %v698_v1 = vshll.u32 %v358_v54, 16  ;;  %v702_v2 = vshrl.u32 %v358_v54, 16  ;;  %v6488_v9 = vrot.slane %v708_v60, 5  ;;  %v365_v42 = vld [vmem:[%s6358_s27 + $0x9c] sm:$0xf] }
  0x57   : > { %v726_v32 = vrot.slane %v725_v18, 4  ;;  %v744_v39 = vrot.slane %v742_v26, 4  ;;  %v778_v47 = vshll.u32 %v366_v40, 16  ;;  %v782_v48 = vshrl.u32 %v366_v40, 16  ;;  %v367_v0 = vld [vmem:[%s6358_s27 + $0xa4] sm:$0xf] }
  0x58   : > { %v685_v4 = vor.u32 %v684_v56, %v680_v55  ;;  %v700_v13 = vrot.slane %v698_v1, 5  ;;  %v704_v21 = vrot.slane %v702_v2, 4  ;;  %v734_v49 = vrot.slane %v732_v30, 4  ;;  %281 = vst.msk [vmem:[#allocation2 + $0x24] sm:$0xf] %vm277_vm3, %v232_v6 }
  0x59   : > { %v755_v50 = vor.u32 %v754_v37, %v6505_v36  ;;  %v745_v51 = vor.u32 %v744_v39, %v6507_v38  ;;  %v772_v53 = vshrl.u32 %v365_v42, 16  ;;  %v762_v57 = vshrl.u32 %v364_v31, 16  ;;  %v370_v23 = vld [vmem:[%s6358_s27 + $0xb0] sm:$0xf]  ;;  %v372_v30 = vld [vmem:[%s6358_s27 + $0xb8] sm:$0xf] }
  0x5a   : > { %v686_v16 = vrot.slane %v685_v4, 4  ;;  %v701_v27 = vsel %vm6368_vm2, %v696_v12, %v700_v13  ;;  %v6529_v59 = vrot.slane %v778_v47, 5  ;;  %v784_v60 = vrot.slane %v782_v48, 4  ;;  %v368_v4 = vld [vmem:[%s6358_s27 + $0xa8] sm:$0xf] }
  0x5b   : > { %v756_v62 = vrot.slane %v755_v50, 4  ;;  %v774_v2 = vrot.slane %v772_v53, 4  ;;  %v798_v14 = vshll.u32 %v368_v4, 16  ;;  %v802_v15 = vshrl.u32 %v368_v4, 16 }
  0x5c   : > { %902 = vrot.lane.b32.xlu2 %v591_v20, %s6279_s28  ;;  %v676_v20 = vrot.slane %v675_v11, 4  ;;  %v691_v28 = vsel %vm6368_vm2, %v686_v16, %v690_v52  ;;  %v768_v52 = vshll.u32 %v365_v42, 16  ;;  %v764_v11 = vrot.slane %v762_v57, 4 }
  0x5d   : > { %906 = vrot.lane.b32.xlu1 %v611_v10, %s6279_s28  ;;  %v714_v10 = vrot.slane %v712_v61, 4  ;;  %v818_v40 = vshll.u32 %v370_v23, 16  ;;  %v838_v43 = vshll.u32 %v372_v30, 16  ;;  %v842_v44 = vshrl.u32 %v372_v30, 16 }
  0x5e   : > { %904 = vrot.lane.b32.xlu0 %v601_v17, %s6279_s28  ;;  %v728_v17 = vshll.u32 %v361_v8, 16  ;;  %v681_v34 = vsel %vm6368_vm2, %v676_v20, %v680_v55  ;;  %v6533_v1 = vrot.slane %v768_v52, 5  ;;  %v785_v8 = vor.u32 %v784_v60, %v6529_v59  ;;  %v239_v60 = vld [vmem:[%s6358_s27 + $0x28] sm:$0xf] }
  0x5f   : > { %v715_v19 = vor.u32 %v714_v10, %v6488_v9  ;;  %v822_v48 = vshrl.u32 %v370_v23, 16  ;;  %v820_v52 = vrot.slane %v818_v40, 5  ;;  %288 = vst.msk [vmem:[#allocation2 + $0x78] sm:$0xf] %vm277_vm3, %v239_v60  ;;  %v1057_v23 = vld [vmem:[%s6358_s27 + $0x8] sm:$0xf] }
  0x60   : > { %v730_v29 = vrot.slane %v728_v17, 5  ;;  %v775_v17 = vor.u32 %v774_v2, %v6533_v1  ;;  %v786_v20 = vrot.slane %v785_v8, 4  ;;  %v248_v60 = vld [vmem:[%s6358_s27 + $0x4c] sm:$0xf] }
  0x61   : > { %v716_v33 = vrot.slane %v715_v19, 4  ;;  %v792_v19 = vshrl.u32 %v367_v0, 16  ;;  %297 = vst.msk [vmem:[#allocation2 + $0xe4] sm:$0xf] %vm277_vm3, %v248_v60 }
  0x62   : > { %v731_v54 = vsel %vm6368_vm2, %v726_v32, %v730_v29  ;;  %v735_v61 = vor.u32 %v734_v49, %v730_v29  ;;  %v804_v29 = vrot.slane %v802_v15, 4  ;;  %v371_v32 = vld [vmem:[%s6358_s27 + $0xb4] sm:$0xf] }
  0x63   : > { %v721_v55 = vsel %vm6368_vm2, %v716_v33, %v6483_v5  ;;  %v234_v5 = vld [vmem:[%s6358_s27 + $0x14] sm:$0xf]  ;;  %v237_v33 = vld [vmem:[%s6358_s27 + $0x20] sm:$0xf]  ;;  %v794_v37 = vrot.slane %v792_v19, 4 }
  0x64   : > { %908 = vrot.lane.b32.xlu2 %v621_v45, %s6279_s28  ;;  %v229_v45 = vld [vmem:[%s6358_s27] sm:$0xf]  ;;  %283 = vst.msk [vmem:[#allocation2 + $0x3c] sm:$0xf] %vm277_vm3, %v234_v5  ;;  %v736_v10 = vrot.slane %v735_v61, 4 }
  0x65   : > { %912 = vrot.lane.b32.xlu1 %v641_v35, %s6279_s28  ;;  %v705_v35 = vor.u32 %v704_v21, %v700_v13  ;;  %278 = vst.msk [vmem:[#allocation2] sm:$0xf] %vm277_vm3, %v229_v45  ;;  %v828_v45 = vshll.u32 %v371_v32, 16  ;;  %v238_v61 = vld [vmem:[%s6358_s27 + $0x24] sm:$0xf] }
  0x66   : > { %910 = vrot.lane.b32.xlu0 %v631_v41, %s6279_s28  ;;  %v758_v41 = vshll.u32 %v364_v31, 16  ;;  %v741_v22 = vsel %vm6368_vm2, %v736_v10, %v6507_v38  ;;  %v776_v31 = vrot.slane %v775_v17, 4  ;;  %286 = vst.msk [vmem:[#allocation2 + $0x60] sm:$0xf] %vm277_vm3, %v237_v33 }
  0x67   : > { %v706_v46 = vrot.slane %v705_v35, 4  ;;  %v235_v35 = vld [vmem:[%s6358_s27 + $0x18] sm:$0xf]  ;;  %v830_v57 = vrot.slane %v828_v45, 5  ;;  %287 = vst.msk [vmem:[#allocation2 + $0x6c] sm:$0xf] %vm277_vm3, %v238_v61 }
  0x68   : > { %v760_v56 = vrot.slane %v758_v41, 5  ;;  %284 = vst.msk [vmem:[#allocation2 + $0x48] sm:$0xf] %vm277_vm3, %v235_v35  ;;  %v781_v47 = vsel %vm6368_vm2, %v776_v31, %v6529_v59  ;;  %v240_v59 = vld [vmem:[%s6358_s27 + $0x2c] sm:$0xf] }
  0x69   : > { %v711_v58 = vsel %vm6368_vm2, %v706_v46, %v6488_v9  ;;  %v788_v9 = vshll.u32 %v367_v0, 16  ;;  %v832_v46 = vshrl.u32 %v371_v32, 16  ;;  %289 = vst.msk [vmem:[#allocation2 + $0x84] sm:$0xf] %vm277_vm3, %v240_v59  ;;  %v1161_v32 = vrot.slane %v1057_v23, 5 }
  0x6a   : > { %v761_v16 = vsel %vm6368_vm2, %v756_v62, %v760_v56  ;;  %v765_v25 = vor.u32 %v764_v11, %v760_v56  ;;  %v844_v56 = vrot.slane %v842_v44, 4  ;;  %v243_v11 = vld [vmem:[%s6358_s27 + $0x38] sm:$0xf]  ;;  %v244_v44 = vld [vmem:[%s6358_s27 + $0x3c] sm:$0xf] }
  0x6b   : > { %v790_v21 = vrot.slane %v788_v9, 5  ;;  %292 = vst.msk [vmem:[#allocation2 + $0xa8] sm:$0xf] %vm277_vm3, %v243_v11  ;;  %v1163_v59 = vrot.slane %v1161_v32, 4  ;;  %v1064_v11 = vld [vmem:[%s6358_s27 + $0x24] sm:$0xf] }
  0x6c   : > { %914 = vrot.lane.b32.xlu2 %v651_v7, %s6279_s28  ;;  %v230_v7 = vld [vmem:[%s6358_s27 + $0x4] sm:$0xf]  ;;  %293 = vst.msk [vmem:[#allocation2 + $0xb4] sm:$0xf] %vm277_vm3, %v244_v44 }
  0x6d   : > { %918 = vrot.lane.b32.xlu1 %v671_v63, %s6279_s28  ;;  %v746_v63 = vrot.slane %v745_v51, 4  ;;  %279 = vst.msk [vmem:[#allocation2 + $0xc] sm:$0xf] %vm277_vm3, %v230_v7  ;;  %v791_v38 = vsel %vm6368_vm2, %v786_v20, %v790_v21  ;;  %v795_v50 = vor.u32 %v794_v37, %v790_v21  ;;  %v374_v20 = vld [vmem:[%s6358_s27 + $0xc0] sm:$0x1] }
  0x6e   : > { %916 = vrot.lane.b32.xlu0 %v661_v3, %s6279_s28  ;;  %v369_v3 = vld [vmem:[%s6358_s27 + $0xac] sm:$0xf]  ;;  %v241_v21 = vld [vmem:[%s6358_s27 + $0x30] sm:$0xf]  ;;  %v858_v30 = vshll.u32 %v374_v20, 16 }
  0x6f   : > { %v808_v12 = vshll.u32 %v369_v3, 16  ;;  %v812_v13 = vshrl.u32 %v369_v3, 16  ;;  %v751_v18 = vsel %vm6368_vm2, %v746_v63, %v6505_v36  ;;  %v766_v36 = vrot.slane %v765_v25, 4  ;;  %290 = vst.msk [vmem:[#allocation2 + $0x90] sm:$0xf] %vm277_vm3, %v241_v21 }
  0x70   : > { %v796_v62 = vrot.slane %v795_v50, 4  ;;  %v824_v63 = vrot.slane %v822_v48, 4  ;;  %v1059_v37 = vld [vmem:[%s6358_s27 + $0x10] sm:$0xf]  ;;  %v1066_v21 = vld [vmem:[%s6358_s27 + $0x2c] sm:$0xf] }
  0x71   : > { %v810_v26 = vrot.slane %v808_v12, 5  ;;  %v771_v49 = vsel %vm6368_vm2, %v766_v36, %v6533_v1 }
  0x72   : > { %v825_v8 = vor.u32 %v824_v63, %v820_v52 }
  0x74   : > { %920 = vrot.lane.b32.xlu2 %v681_v34, %s6279_s28  ;;  %v236_v34 = vld [vmem:[%s6358_s27 + $0x1c] sm:$0xf] }
  0x75   : > { %924 = vrot.lane.b32.xlu1 %v701_v27, %s6279_s28  ;;  %v814_v27 = vrot.slane %v812_v13, 4  ;;  %285 = vst.msk [vmem:[#allocation2 + $0x54] sm:$0xf] %vm277_vm3, %v236_v34  ;;  %v246_v34 = vld [vmem:[%s6358_s27 + $0x44] sm:$0xf] }
  0x76   : > { %922 = vrot.lane.b32.xlu0 %v691_v28, %s6279_s28  ;;  %v6557_v28 = vrot.slane %v798_v14, 5  ;;  %v1056_v14 = vld [vmem:[%s6358_s27 + $0x4] sm:$0xf]  ;;  %295 = vst.msk [vmem:[#allocation2 + $0xcc] sm:$0xf] %vm277_vm3, %v246_v34 }
  0x77   : > { %v815_v39 = vor.u32 %v814_v27, %v810_v26  ;;  %v1158_v25 = vrot.slane %v1056_v14, 5  ;;  %v1055_v27 = vld [vmem:[%s6358_s27] sm:$0xe]  ;;  %v251_v14 = vld [vmem:[%s6358_s27 + $0x58] sm:$0xf] }
  0x78   : > { %v805_v41 = vor.u32 %v804_v29, %v6557_v28  ;;  %v801_v7 = vsel %vm6368_vm2, %v796_v62, %v6557_v28  ;;  %v5494_v33 = vrot.slane %v1055_v27, 9  ;;  %v247_v62 = vld [vmem:[%s6358_s27 + $0x48] sm:$0xf]  ;;  %300 = vst.msk [vmem:[#allocation2 + $0x108] sm:$0xf] %vm277_vm3, %v251_v14 }
  0x79   : > { %v816_v51 = vrot.slane %v815_v39, 4  ;;  %v1160_v31 = vrot.slane %v1158_v25, 4  ;;  %296 = vst.msk [vmem:[#allocation2 + $0xd8] sm:$0xf] %vm277_vm3, %v247_v62  ;;  %v255_v27 = vld [vmem:[%s6358_s27 + $0x68] sm:$0xf] }
  0x7a   : > { %v806_v53 = vrot.slane %v805_v41, 4  ;;  %v860_v41 = vrot.slane %v858_v30, 5  ;;  %v1159_v48 = vsel %vm6623_vm7, %v5494_v33, %v1158_v25  ;;  %v1188_v25 = vrot.slane %v1066_v21, 5  ;;  %v1067_v30 = vld [vmem:[%s6358_s27 + $0x30] sm:$0xf] }
  0x7b   : > { %v821_v1 = vsel %vm6368_vm2, %v816_v51, %v820_v52  ;;  %v1162_v45 = vsel %vm6623_vm7, %v1160_v31, %v1161_v32  ;;  %304 = vst.msk [vmem:[#allocation2 + $0x138] sm:$0xf] %vm277_vm3, %v255_v27  ;;  %v254_v33 = vld [vmem:[%s6358_s27 + $0x64] sm:$0xf]  ;;  %v1076_v21 = vld [vmem:[%s6358_s27 + $0x54] sm:$0xf] }
  0x7c   : > { %926 = vrot.lane.b32.xlu2 %v711_v58, %s6279_s28  ;;  %v834_v58 = vrot.slane %v832_v46, 4  ;;  %v811_v4 = vsel %vm6368_vm2, %v806_v53, %v810_v26  ;;  %v1167_v46 = vrot.slane %v1059_v37, 5  ;;  %303 = vst.msk [vmem:[#allocation2 + $0x12c] sm:$0xf] %vm277_vm3, %v254_v33  ;;  %v262_v27 = vld [vmem:[%s6358_s27 + $0x84] sm:$0xf] }
  0x7d   : > { %930 = vrot.lane.b32.xlu1 %v731_v54, %s6279_s28  ;;  %v373_v54 = vld [vmem:[%s6358_s27 + $0xbc] sm:$0xf]  ;;  %311 = vst.msk [vmem:[#allocation2 + $0x18c] sm:$0xf] %vm277_vm3, %v262_v27 }
  0x7e   : > { %928 = vrot.lane.b32.xlu0 %v721_v55, %s6279_s28  ;;  %v840_v55 = vrot.slane %v838_v43, 5  ;;  %v848_v3 = vshll.u32 %v373_v54, 16  ;;  %v835_v5 = vor.u32 %v834_v58, %v830_v57  ;;  %v852_v6 = vshrl.u32 %v373_v54, 16  ;;  %v249_v54 = vld [vmem:[%s6358_s27 + $0x50] sm:$0xf] }
  0x7f   : > { %v1169_v51 = vrot.slane %v1167_v46, 4  ;;  %298 = vst.msk [vmem:[#allocation2 + $0xf0] sm:$0xf] %vm277_vm3, %v249_v54  ;;  %v256_v54 = vld [vmem:[%s6358_s27 + $0x6c] sm:$0xf] }
  0x80   : > { %v845_v2 = vor.u32 %v844_v56, %v840_v55  ;;  %v850_v10 = vrot.slane %v848_v3, 5  ;;  %v836_v13 = vrot.slane %v835_v5, 4  ;;  %v854_v17 = vrot.slane %v852_v6, 4  ;;  %v1062_v56 = vld [vmem:[%s6358_s27 + $0x1c] sm:$0xf] }
  0x81   : > { %v1063_v3 = vld [vmem:[%s6358_s27 + $0x20] sm:$0xf]  ;;  %305 = vst.msk [vmem:[#allocation2 + $0x144] sm:$0xf] %vm277_vm3, %v256_v54 }
  0x82   : > { %v846_v9 = vrot.slane %v845_v2, 4  ;;  %v841_v26 = vsel %vm6368_vm2, %v836_v13, %v840_v55  ;;  %v855_v29 = vor.u32 %v854_v17, %v850_v10  ;;  %v1179_v6 = vrot.slane %v1063_v3, 5  ;;  %v1073_v3 = vld [vmem:[%s6358_s27 + $0x48] sm:$0xf] }
  0x84   : > { %932 = vrot.lane.b32.xlu2 %v741_v22, %s6279_s28  ;;  %v851_v22 = vsel %vm6368_vm2, %v846_v9, %v850_v10  ;;  %v856_v40 = vrot.slane %v855_v29, 4  ;;  %v1065_v10 = vld [vmem:[%s6358_s27 + $0x28] sm:$0xf]  ;;  %v1068_v29 = vld [vmem:[%s6358_s27 + $0x34] sm:$0xf]  ;;  %v1181_v32 = vrot.slane %v1179_v6, 4 }
  0x85   : > { %936 = vrot.lane.b32.xlu1 %v761_v16, %s6279_s28  ;;  %v826_v16 = vrot.slane %v825_v8, 4  ;;  %v252_v8 = vld [vmem:[%s6358_s27 + $0x5c] sm:$0xf] }
  0x86   : > { %934 = vrot.lane.b32.xlu0 %v751_v18, %s6279_s28  ;;  %v871_v42 = vpop.permute.xlu2 %870  ;;  %v242_v18 = vld [vmem:[%s6358_s27 + $0x34] sm:$0xf]  ;;  %v861_v50 = vsel %vm6368_vm2, %v856_v40, %v860_v41  ;;  %301 = vst.msk [vmem:[#allocation2 + $0x114] sm:$0xf] %vm277_vm3, %v252_v8  ;;  %v1069_v41 = vld [vmem:[%s6358_s27 + $0x38] sm:$0xf] }
  0x87   : > { %1011 = vst.msk [vmem:[#allocation2 + $0x30] sm:$0xf] %vm1006_vm4, %v871_v42  ;;  %v831_v28 = vsel %vm6368_vm2, %v826_v16, %v830_v57  ;;  %v245_v42 = vld [vmem:[%s6358_s27 + $0x40] sm:$0xf]  ;;  %v1061_v57 = vld [vmem:[%s6358_s27 + $0x18] sm:$0xf] }
  0x88   : > { %291 = vst.msk [vmem:[#allocation2 + $0x9c] sm:$0xf] %vm277_vm3, %v242_v18  ;;  %v250_v16 = vld [vmem:[%s6358_s27 + $0x54] sm:$0xf]  ;;  %v1185_v18 = vrot.slane %v1065_v10, 5  ;;  %v1197_v44 = vrot.slane %v1069_v41, 5 }
  0x89   : > { %294 = vst.msk [vmem:[#allocation2 + $0xc0] sm:$0xf] %vm277_vm3, %v245_v42  ;;  %v259_v8 = vld [vmem:[%s6358_s27 + $0x78] sm:$0xf]  ;;  %v1079_v41 = vld [vmem:[%s6358_s27 + $0x60] sm:$0xf] }
  0x8a   : > { %299 = vst.msk [vmem:[#allocation2 + $0xfc] sm:$0xf] %vm277_vm3, %v250_v16  ;;  %v1187_v23 = vrot.slane %v1185_v18, 4 }
  0x8b   : > { %308 = vst.msk [vmem:[#allocation2 + $0x168] sm:$0xf] %vm277_vm3, %v259_v8 }
  0x8c   : > { %938 = vrot.lane.b32.xlu2 %v771_v49, %s6279_s28  ;;  %v1060_v49 = vld [vmem:[%s6358_s27 + $0x14] sm:$0xf]  ;;  %v1189_v37 = vsel %vm6623_vm7, %v1187_v23, %v1188_v25 }
  0x8d   : > { %942 = vrot.lane.b32.xlu1 %v791_v38, %s6279_s28  ;;  %v1058_v38 = vld [vmem:[%s6358_s27 + $0xc] sm:$0xf]  ;;  %v1170_v52 = vrot.slane %v1060_v49, 5  ;;  %v1070_v49 = vld [vmem:[%s6358_s27 + $0x3c] sm:$0xf] }
  0x8e   : > { %940 = vrot.lane.b32.xlu0 %v781_v47, %s6279_s28  ;;  %v873_v0 = vpop.permute.xlu2 %872  ;;  %v1164_v47 = vrot.slane %v1058_v38, 5  ;;  %v1194_v38 = vrot.slane %v1068_v29, 5 }
  0x8f   : > { %1012 = vst.msk [vmem:[#allocation2 + $0x3c] sm:$0xf] %vm1006_vm4, %v873_v0  ;;  %v1171_v63 = vsel %vm6623_vm7, %v1169_v51, %v1170_v52  ;;  %v1176_v0 = vrot.slane %v1062_v56, 5  ;;  %v1172_v13 = vrot.slane %v1170_v52, 4  ;;  %v1190_v51 = vrot.slane %v1188_v25, 4 }
  0x90   : > { %v1166_v53 = vrot.slane %v1164_v47, 4  ;;  %v257_v52 = vld [vmem:[%s6358_s27 + $0x70] sm:$0xf]  ;;  %v263_v25 = vld [vmem:[%s6358_s27 + $0x88] sm:$0xf] }
  0x91   : > { %v1178_v5 = vrot.slane %v1176_v0, 4  ;;  %306 = vst.msk [vmem:[#allocation2 + $0x150] sm:$0xf] %vm277_vm3, %v257_v52 }
  0x92   : > { %v1168_v2 = vsel %vm6623_vm7, %v1166_v53, %v1167_v46  ;;  %v258_v46 = vld [vmem:[%s6358_s27 + $0x74] sm:$0xf]  ;;  %312 = vst.msk [vmem:[#allocation2 + $0x198] sm:$0xf] %vm277_vm3, %v263_v25 }
  0x93   : > { %v1180_v17 = vsel %vm6623_vm7, %v1178_v5, %v1179_v6  ;;  %307 = vst.msk [vmem:[#allocation2 + $0x15c] sm:$0xf] %vm277_vm3, %v258_v46  ;;  %v1199_v5 = vrot.slane %v1197_v44, 4  ;;  %v260_v6 = vld [vmem:[%s6358_s27 + $0x7c] sm:$0xf] }
  0x94   : > { %944 = vrot.lane.b32.xlu2 %v801_v7, %s6279_s28  ;;  %309 = vst.msk [vmem:[#allocation2 + $0x174] sm:$0xf] %vm277_vm3, %v260_v6  ;;  %v265_v46 = vld [vmem:[%s6358_s27 + $0x90] sm:$0xf] }
  0x95   : > { %948 = vrot.lane.b32.xlu1 %v821_v1, %s6279_s28  ;;  %v1173_v1 = vrot.slane %v1061_v57, 5  ;;  %v1200_v57 = vrot.slane %v1070_v49, 5  ;;  %v1227_v49 = vrot.slane %v1079_v41, 5  ;;  %314 = vst.msk [vmem:[#allocation2 + $0x1b0] sm:$0xf] %vm277_vm3, %v265_v46 }
  0x96   : > { %946 = vrot.lane.b32.xlu0 %v811_v4, %s6279_s28  ;;  %v879_v19 = vpop.permute.xlu2 %878  ;;  %v1165_v4 = vsel %vm6623_vm7, %v1163_v59, %v1164_v47  ;;  %v1072_v59 = vld [vmem:[%s6358_s27 + $0x44] sm:$0xf] }
  0x97   : > { %v867_v12 = vpop.permute.xlu1 %866  ;;  %1015 = vst.msk [vmem:[#allocation2 + $0x60] sm:$0xf] %vm1006_vm4, %v879_v19  ;;  %v1175_v7 = vrot.slane %v1173_v1, 4  ;;  %v1182_v19 = vrot.slane %v1064_v11, 5  ;;  %v1206_v62 = vrot.slane %v1072_v59, 5  ;;  %v1209_v11 = vrot.slane %v1073_v3, 5 }
  0x98   : > { %1009 = vst.msk [vmem:[#allocation2 + $0x18] sm:$0xf] %vm1006_vm4, %v867_v12  ;;  %v863_v15 = vpop.permute.xlu0 %862  ;;  %v1201_v14 = vsel %vm6623_vm7, %v1199_v5, %v1200_v57  ;;  %v1082_v59 = vld [vmem:[%s6358_s27 + $0x6c] sm:$0xf]  ;;  %v1084_v5 = vld [vmem:[%s6358_s27 + $0x74] sm:$0xf] }
  0x99   : > { %1007 = vst.msk [vmem:[#allocation2] sm:$0xf] %vm1006_vm4, %v863_v15  ;;  %v1177_v20 = vsel %vm6623_vm7, %v1175_v7, %v1176_v0  ;;  %v1183_v42 = vsel %vm6623_vm7, %v1181_v32, %v1182_v19  ;;  %v261_v0 = vld [vmem:[%s6358_s27 + $0x80] sm:$0xf]  ;;  %v1208_v23 = vrot.slane %v1206_v62, 4  ;;  %v1236_v3 = vrot.slane %v1082_v59, 5 }
  0x9a   : > { %310 = vst.msk [vmem:[#allocation2 + $0x180] sm:$0xf] %vm277_vm3, %v261_v0  ;;  %v1078_v32 = vld [vmem:[%s6358_s27 + $0x5c] sm:$0xf]  ;;  %v1242_v8 = vrot.slane %v1084_v5, 5 }
  0x9b   : > { %v1210_v33 = vsel %vm6623_vm7, %v1208_v23, %v1209_v11  ;;  %v268_v0 = vld [vmem:[%s6358_s27 + $0x9c] sm:$0xf]  ;;  %v1087_v23 = vld [vmem:[%s6358_s27 + $0x80] sm:$0xf] }
  0x9c   : > { %950 = vrot.lane.b32.xlu2 %v831_v28, %s6279_s28  ;;  %317 = vst.msk [vmem:[#allocation2 + $0x1d4] sm:$0xf] %vm277_vm3, %v268_v0  ;;  %v1251_v27 = vrot.slane %v1087_v23, 5  ;;  %v1095_v0 = vld [vmem:[%s6358_s27 + $0xa0] sm:$0xf] }
  0x9d   : > { %954 = vrot.lane.b32.xlu1 %v851_v22, %s6279_s28  ;;  %v1174_v22 = vsel %vm6623_vm7, %v1172_v13, %v1173_v1  ;;  %v1075_v13 = vld [vmem:[%s6358_s27 + $0x50] sm:$0xf] }
  0x9e   : > { %952 = vrot.lane.b32.xlu0 %v841_v26, %s6279_s28  ;;  %v885_v43 = vpop.permute.xlu2 %884  ;;  %v1184_v26 = vrot.slane %v1182_v19, 4  ;;  %v1215_v16 = vrot.slane %v1075_v13, 5  ;;  %v1085_v13 = vld [vmem:[%s6358_s27 + $0x78] sm:$0xf]  ;;  %v1099_v23 = vld [vmem:[%s6358_s27 + $0xb0] sm:$0xf] }
  0x9f   : > { %v869_v35 = vpop.permute.xlu1 %868  ;;  %1018 = vst.msk [vmem:[#allocation2 + $0x84] sm:$0xf] %vm1006_vm4, %v885_v43  ;;  %v1196_v43 = vrot.slane %v1194_v38, 4 }
  0xa0   : > { %1010 = vst.msk [vmem:[#allocation2 + $0x24] sm:$0xf] %vm1006_vm4, %v869_v35  ;;  %v865_v39 = vpop.permute.xlu0 %864  ;;  %v253_v35 = vld [vmem:[%s6358_s27 + $0x60] sm:$0xf]  ;;  %v1186_v40 = vsel %vm6623_vm7, %v1184_v26, %v1185_v18  ;;  %v264_v18 = vld [vmem:[%s6358_s27 + $0x8c] sm:$0xf] }
  0xa1   : > { %1008 = vst.msk [vmem:[#allocation2 + $0xc] sm:$0xf] %vm1006_vm4, %v865_v39  ;;  %v1191_v39 = vrot.slane %v1067_v30, 5  ;;  %v1218_v30 = vrot.slane %v1076_v21, 5  ;;  %v1245_v21 = vrot.slane %v1085_v13, 5 }
  0xa2   : > { %302 = vst.msk [vmem:[#allocation2 + $0x120] sm:$0xf] %vm277_vm3, %v253_v35  ;;  %v1224_v35 = vrot.slane %v1078_v32, 5  ;;  %v1088_v32 = vld [vmem:[%s6358_s27 + $0x84] sm:$0xf] }
  0xa3   : > { %v1192_v60 = vsel %vm6623_vm7, %v1190_v51, %v1191_v39  ;;  %313 = vst.msk [vmem:[#allocation2 + $0x1a4] sm:$0xf] %vm277_vm3, %v264_v18  ;;  %v1081_v51 = vld [vmem:[%s6358_s27 + $0x68] sm:$0xf] }
  0xa4   : > { %956 = vrot.lane.b32.xlu2 %v861_v50, %s6279_s28  ;;  %v1233_v54 = vrot.slane %v1081_v51, 5  ;;  %v271_v18 = vld [vmem:[%s6358_s27 + $0xa8] sm:$0xf]  ;;  %v1091_v51 = vld [vmem:[%s6358_s27 + $0x90] sm:$0xf] }
  0xa5   : > { %1303 = vrot.lane.b32.xlu1 %v1162_v45, %s6280_s29  ;;  %v1193_v45 = vrot.slane %v1191_v39, 4  ;;  %320 = vst.msk [vmem:[#allocation2 + $0x1f8] sm:$0xf] %vm277_vm3, %v271_v18 }
  0xa6   : > { %1301 = vrot.lane.b32.xlu0 %v1159_v48, %s6280_s29  ;;  %v891_v61 = vpop.permute.xlu2 %890  ;;  %v1071_v48 = vld [vmem:[%s6358_s27 + $0x40] sm:$0xf] }
  0xa7   : > { %v877_v55 = vpop.permute.xlu1 %876  ;;  %1021 = vst.msk [vmem:[#allocation2 + $0xa8] sm:$0xf] %vm1006_vm4, %v891_v61  ;;  %v1203_v56 = vrot.slane %v1071_v48, 5 }
  0xa8   : > { %1014 = vst.msk [vmem:[#allocation2 + $0x54] sm:$0xf] %vm1006_vm4, %v877_v55  ;;  %v875_v58 = vpop.permute.xlu0 %874  ;;  %v1198_v55 = vsel %vm6623_vm7, %v1196_v43, %v1197_v44  ;;  %v1217_v43 = vrot.slane %v1215_v16, 4  ;;  %v266_v44 = vld [vmem:[%s6358_s27 + $0x94] sm:$0xf] }
  0xa9   : > { %1013 = vst.msk [vmem:[#allocation2 + $0x48] sm:$0xf] %vm1006_vm4, %v875_v58  ;;  %v1195_v58 = vsel %vm6623_vm7, %v1193_v45, %v1194_v38  ;;  %v1205_v61 = vrot.slane %v1203_v56, 4  ;;  %v267_v38 = vld [vmem:[%s6358_s27 + $0x98] sm:$0xf] }
  0xaa   : > { %316 = vst.msk [vmem:[#allocation2 + $0x1c8] sm:$0xf] %vm277_vm3, %v267_v38  ;;  %v1219_v52 = vsel %vm6623_vm7, %v1217_v43, %v1218_v30  ;;  %v274_v38 = vld [vmem:[%s6358_s27 + $0xb4] sm:$0xf]  ;;  %v1254_v43 = vrot.slane %v1088_v32, 5 }
  0xab   : > { %315 = vst.msk [vmem:[#allocation2 + $0x1bc] sm:$0xf] %vm277_vm3, %v266_v44 }
  0xac   : > { %1305 = vrot.lane.b32.xlu2 %v1165_v4, %s6280_s29  ;;  %323 = vst.msk [vmem:[#allocation2 + $0x21c] sm:$0xf] %vm277_vm3, %v274_v38 }
  0xad   : > { %1309 = vrot.lane.b32.xlu1 %v1171_v63, %s6280_s29  ;;  %v1202_v63 = vrot.slane %v1200_v57, 4 }
  0xae   : > { %1307 = vrot.lane.b32.xlu0 %v1168_v2, %s6280_s29  ;;  %v897_v15 = vpop.permute.xlu2 %896  ;;  %v1074_v2 = vld [vmem:[%s6358_s27 + $0x4c] sm:$0xf] }
  0xaf   : > { %v883_v9 = vpop.permute.xlu1 %882  ;;  %1024 = vst.msk [vmem:[#allocation2 + $0xcc] sm:$0xf] %vm1006_vm4, %v897_v15  ;;  %v1212_v10 = vrot.slane %v1074_v2, 5 }
  0xb0   : > { %1017 = vst.msk [vmem:[#allocation2 + $0x78] sm:$0xf] %vm1006_vm4, %v883_v9  ;;  %v881_v12 = vpop.permute.xlu0 %880  ;;  %v1207_v9 = vsel %vm6623_vm7, %v1205_v61, %v1206_v62  ;;  %v1226_v61 = vrot.slane %v1224_v35, 4  ;;  %v269_v62 = vld [vmem:[%s6358_s27 + $0xa0] sm:$0xf] }
  0xb1   : > { %1016 = vst.msk [vmem:[#allocation2 + $0x6c] sm:$0xf] %vm1006_vm4, %v881_v12  ;;  %v1204_v12 = vsel %vm6623_vm7, %v1202_v63, %v1203_v56  ;;  %v1214_v15 = vrot.slane %v1212_v10, 4  ;;  %v270_v56 = vld [vmem:[%s6358_s27 + $0xa4] sm:$0xf] }
  0xb2   : > { %319 = vst.msk [vmem:[#allocation2 + $0x1ec] sm:$0xf] %vm277_vm3, %v270_v56  ;;  %v1228_v6 = vsel %vm6623_vm7, %v1226_v61, %v1227_v49 }
  0xb3   : > { %318 = vst.msk [vmem:[#allocation2 + $0x1e0] sm:$0xf] %vm277_vm3, %v269_v62 }
  0xb4   : > { %1311 = vrot.lane.b32.xlu2 %v1174_v22, %s6280_s29 }
  0xb5   : > { %1315 = vrot.lane.b32.xlu1 %v1180_v17, %s6280_s29  ;;  %v1211_v17 = vrot.slane %v1209_v11, 4 }
  0xb6   : > { %1313 = vrot.lane.b32.xlu0 %v1177_v20, %s6280_s29  ;;  %v903_v34 = vpop.permute.xlu2 %902  ;;  %v1077_v20 = vld [vmem:[%s6358_s27 + $0x58] sm:$0xf] }
  0xb7   : > { %v889_v28 = vpop.permute.xlu1 %888  ;;  %1027 = vst.msk [vmem:[#allocation2 + $0xf0] sm:$0xf] %vm1006_vm4, %v903_v34  ;;  %v1221_v29 = vrot.slane %v1077_v20, 5 }
  0xb8   : > { %1020 = vst.msk [vmem:[#allocation2 + $0x9c] sm:$0xf] %vm1006_vm4, %v889_v28  ;;  %v887_v31 = vpop.permute.xlu0 %886  ;;  %v1216_v28 = vsel %vm6623_vm7, %v1214_v15, %v1215_v16  ;;  %v1235_v15 = vrot.slane %v1233_v54, 4  ;;  %v272_v16 = vld [vmem:[%s6358_s27 + $0xac] sm:$0xf] }
  0xb9   : > { %1019 = vst.msk [vmem:[#allocation2 + $0x90] sm:$0xf] %vm1006_vm4, %v887_v31  ;;  %v1213_v31 = vsel %vm6623_vm7, %v1211_v17, %v1212_v10  ;;  %v1223_v34 = vrot.slane %v1221_v29, 4  ;;  %v273_v10 = vld [vmem:[%s6358_s27 + $0xb0] sm:$0xf] }
  0xba   : > { %322 = vst.msk [vmem:[#allocation2 + $0x210] sm:$0xf] %vm277_vm3, %v273_v10  ;;  %v1237_v25 = vsel %vm6623_vm7, %v1235_v15, %v1236_v3  ;;  %v1098_v15 = vld [vmem:[%s6358_s27 + $0xac] sm:$0xf] }
  0xbb   : > { %321 = vst.msk [vmem:[#allocation2 + $0x204] sm:$0xf] %vm277_vm3, %v272_v16 }
  0xbc   : > { %1317 = vrot.lane.b32.xlu2 %v1183_v42, %s6280_s29 }
  0xbd   : > { %1321 = vrot.lane.b32.xlu1 %v1189_v37, %s6280_s29  ;;  %v1220_v37 = vrot.slane %v1218_v30, 4 }
  0xbe   : > { %1319 = vrot.lane.b32.xlu0 %v1186_v40, %s6280_s29  ;;  %v909_v53 = vpop.permute.xlu2 %908  ;;  %v1080_v40 = vld [vmem:[%s6358_s27 + $0x64] sm:$0xf] }
  0xbf   : > { %v895_v47 = vpop.permute.xlu1 %894  ;;  %1030 = vst.msk [vmem:[#allocation2 + $0x114] sm:$0xf] %vm1006_vm4, %v909_v53  ;;  %v1230_v48 = vrot.slane %v1080_v40, 5 }
  0xc0   : > { %1023 = vst.msk [vmem:[#allocation2 + $0xc0] sm:$0xf] %vm1006_vm4, %v895_v47  ;;  %v893_v50 = vpop.permute.xlu0 %892  ;;  %v1225_v47 = vsel %vm6623_vm7, %v1223_v34, %v1224_v35  ;;  %v1244_v34 = vrot.slane %v1242_v8, 4  ;;  %v275_v35 = vld [vmem:[%s6358_s27 + $0xb8] sm:$0xf] }
  0xc1   : > { %1022 = vst.msk [vmem:[#allocation2 + $0xb4] sm:$0xf] %vm1006_vm4, %v893_v50  ;;  %v1222_v50 = vsel %vm6623_vm7, %v1220_v37, %v1221_v29  ;;  %v1232_v53 = vrot.slane %v1230_v48, 4  ;;  %v276_v29 = vld [vmem:[%s6358_s27 + $0xbc] sm:$0xf] }
  0xc2   : > { %325 = vst.msk [vmem:[#allocation2 + $0x234] sm:$0xf] %vm277_vm3, %v276_v29  ;;  %v1246_v44 = vsel %vm6623_vm7, %v1244_v34, %v1245_v21 }
  0xc3   : > { %324 = vst.msk [vmem:[#allocation2 + $0x228] sm:$0xf] %vm277_vm3, %v275_v35 }
  0xc4   : > { %1323 = vrot.lane.b32.xlu2 %v1192_v60, %s6280_s29 }
  0xc5   : > { %1327 = vrot.lane.b32.xlu1 %v1198_v55, %s6280_s29  ;;  %v1229_v55 = vrot.slane %v1227_v49, 4  ;;  %v1092_v49 = vld [vmem:[%s6358_s27 + $0x94] sm:$0xf] }
  0xc6   : > { %1325 = vrot.lane.b32.xlu0 %v1195_v58, %s6280_s29  ;;  %v915_v7 = vpop.permute.xlu2 %914  ;;  %v1083_v58 = vld [vmem:[%s6358_s27 + $0x70] sm:$0xf] }
  0xc7   : > { %v901_v1 = vpop.permute.xlu1 %900  ;;  %1033 = vst.msk [vmem:[#allocation2 + $0x138] sm:$0xf] %vm1006_vm4, %v915_v7  ;;  %v1239_v2 = vrot.slane %v1083_v58, 5  ;;  %v1263_v58 = vrot.slane %v1091_v51, 5 }
  0xc8   : > { %1026 = vst.msk [vmem:[#allocation2 + $0xe4] sm:$0xf] %vm1006_vm4, %v901_v1  ;;  %v899_v4 = vpop.permute.xlu0 %898  ;;  %v1234_v1 = vsel %vm6623_vm7, %v1232_v53, %v1233_v54 }
  0xc9   : > { %1025 = vst.msk [vmem:[#allocation2 + $0xd8] sm:$0xf] %vm1006_vm4, %v899_v4  ;;  %v1231_v4 = vsel %vm6623_vm7, %v1229_v55, %v1230_v48  ;;  %v1241_v7 = vrot.slane %v1239_v2, 4  ;;  %v1256_v48 = vrot.slane %v1254_v43, 4  ;;  %v1266_v55 = vrot.slane %v1092_v49, 5 }
  0xcc   : > { %1329 = vrot.lane.b32.xlu2 %v1201_v14, %s6280_s29 }
  0xcd   : > { %1333 = vrot.lane.b32.xlu1 %v1207_v9, %s6280_s29  ;;  %v1238_v9 = vrot.slane %v1236_v3, 4 }
  0xce   : > { %1331 = vrot.lane.b32.xlu0 %v1204_v12, %s6280_s29  ;;  %v921_v26 = vpop.permute.xlu2 %920  ;;  %v1086_v12 = vld [vmem:[%s6358_s27 + $0x7c] sm:$0xf] }
  0xcf   : > { %v907_v19 = vpop.permute.xlu1 %906  ;;  %1036 = vst.msk [vmem:[#allocation2 + $0x15c] sm:$0xf] %vm1006_vm4, %v921_v26  ;;  %v1248_v20 = vrot.slane %v1086_v12, 5 }
  0xd0   : > { %1029 = vst.msk [vmem:[#allocation2 + $0x108] sm:$0xf] %vm1006_vm4, %v907_v19  ;;  %v905_v22 = vpop.permute.xlu0 %904  ;;  %v1243_v19 = vsel %vm6623_vm7, %v1241_v7, %v1242_v8  ;;  %v1096_v8 = vld [vmem:[%s6358_s27 + $0xa4] sm:$0xf] }
  0xd1   : > { %1028 = vst.msk [vmem:[#allocation2 + $0xfc] sm:$0xf] %vm1006_vm4, %v905_v22  ;;  %v1240_v22 = vsel %vm6623_vm7, %v1238_v9, %v1239_v2  ;;  %v1250_v26 = vrot.slane %v1248_v20, 4  ;;  %v1094_v2 = vld [vmem:[%s6358_s27 + $0x9c] sm:$0xf]  ;;  %v1278_v12 = vrot.slane %v1096_v8, 5 }
  0xd2   : > { %v1272_v9 = vrot.slane %v1094_v2, 5  ;;  %v1497_v2 = vld [vmem:[%s6358_s27 + $0x18] sm:$0xf]  ;;  %v1500_v8 = vld [vmem:[%s6358_s27 + $0x24] sm:$0xf] }
  0xd3   : > { %v1280_v34 = vrot.slane %v1278_v12, 4 }
  0xd4   : > { %1335 = vrot.lane.b32.xlu2 %v1210_v33, %s6280_s29 }
  0xd5   : > { %1339 = vrot.lane.b32.xlu1 %v1216_v28, %s6280_s29  ;;  %v1247_v28 = vrot.slane %v1245_v21, 4  ;;  %v1284_v21 = vrot.slane %v1098_v15, 5  ;;  %v1502_v15 = vld [vmem:[%s6358_s27 + $0x2c] sm:$0xf] }
  0xd6   : > { %1337 = vrot.lane.b32.xlu0 %v1213_v31, %s6280_s29  ;;  %v927_v45 = vpop.permute.xlu2 %926  ;;  %v1089_v31 = vld [vmem:[%s6358_s27 + $0x88] sm:$0xf] }
  0xd7   : > { %v913_v39 = vpop.permute.xlu1 %912  ;;  %1039 = vst.msk [vmem:[#allocation2 + $0x180] sm:$0xf] %vm1006_vm4, %v927_v45  ;;  %v1257_v40 = vrot.slane %v1089_v31, 5  ;;  %v1249_v41 = vsel %vm6623_vm7, %v1247_v28, %v1248_v20  ;;  %v1287_v28 = vrot.slane %v1099_v23, 5  ;;  %v1101_v31 = vld [vmem:[%s6358_s27 + $0xb8] sm:$0xf] }
  0xd8   : > { %1032 = vst.msk [vmem:[#allocation2 + $0x12c] sm:$0xf] %vm1006_vm4, %v913_v39  ;;  %v911_v42 = vpop.permute.xlu0 %910  ;;  %v1252_v39 = vsel %vm6623_vm7, %v1250_v26, %v1251_v27  ;;  %v1293_v38 = vrot.slane %v1101_v31, 5 }
  0xd9   : > { %1031 = vst.msk [vmem:[#allocation2 + $0x120] sm:$0xf] %vm1006_vm4, %v911_v42  ;;  %v1090_v42 = vld [vmem:[%s6358_s27 + $0x8c] sm:$0xf]  ;;  %v1259_v45 = vrot.slane %v1257_v40, 4  ;;  %v1258_v56 = vsel %vm6623_vm7, %v1256_v48, %v1257_v40  ;;  %v1289_v48 = vrot.slane %v1287_v28, 4 }
  0xda   : > { %v1260_v46 = vrot.slane %v1090_v42, 5  ;;  %v1102_v40 = vld [vmem:[%s6358_s27 + $0xbc] sm:$0xf] }
  0xdc   : > { %1341 = vrot.lane.b32.xlu2 %v1219_v52, %s6280_s29  ;;  %v1253_v52 = vrot.slane %v1251_v27, 4  ;;  %v1261_v54 = vsel %vm6623_vm7, %v1259_v45, %v1260_v46  ;;  %v1262_v3 = vrot.slane %v1260_v46, 4  ;;  %v1286_v27 = vrot.slane %v1284_v21, 4 }
  0xdd   : > { %1345 = vrot.lane.b32.xlu1 %v1225_v47, %s6280_s29 }
  0xde   : > { %1343 = vrot.lane.b32.xlu0 %v1222_v50, %s6280_s29  ;;  %v933_v63 = vpop.permute.xlu2 %932  ;;  %v1255_v59 = vsel %vm6623_vm7, %v1253_v52, %v1254_v43  ;;  %v1264_v10 = vsel %vm6623_vm7, %v1262_v3, %v1263_v58  ;;  %v1295_v43 = vrot.slane %v1293_v38, 4  ;;  %v1496_v3 = vld [vmem:[%s6358_s27 + $0x14] sm:$0xf] }
  0xdf   : > { %v919_v57 = vpop.permute.xlu1 %918  ;;  %1042 = vst.msk [vmem:[#allocation2 + $0x1a4] sm:$0xf] %vm1006_vm4, %v933_v63  ;;  %v1265_v63 = vrot.slane %v1263_v58, 4 }
  0xe0   : > { %1035 = vst.msk [vmem:[#allocation2 + $0x150] sm:$0xf] %vm1006_vm4, %v919_v57  ;;  %v917_v60 = vpop.permute.xlu0 %916  ;;  %v1093_v57 = vld [vmem:[%s6358_s27 + $0x98] sm:$0xf] }
  0xe1   : > { %1034 = vst.msk [vmem:[#allocation2 + $0x144] sm:$0xf] %vm1006_vm4, %v917_v60  ;;  %v1268_v60 = vrot.slane %v1266_v55, 4  ;;  %v1269_v61 = vrot.slane %v1093_v57, 5  ;;  %v1267_v7 = vsel %vm6623_vm7, %v1265_v63, %v1266_v55 }
  0xe3   : > { %v1270_v5 = vsel %vm6623_vm7, %v1268_v60, %v1269_v61  ;;  %v1271_v18 = vrot.slane %v1269_v61, 4  ;;  %v1494_v60 = vld [vmem:[%s6358_s27 + $0xc] sm:$0xf] }
  0xe4   : > { %1347 = vrot.lane.b32.xlu2 %v1228_v6, %s6280_s29  ;;  %v1275_v6 = vrot.slane %v1095_v0, 5 }
  0xe5   : > { %1351 = vrot.lane.b32.xlu1 %v1234_v1, %s6280_s29  ;;  %v1273_v26 = vsel %vm6623_vm7, %v1271_v18, %v1272_v9 }
  0xe6   : > { %1349 = vrot.lane.b32.xlu0 %v1231_v4, %s6280_s29  ;;  %v939_v17 = vpop.permute.xlu2 %938 }
  0xe7   : > { %v925_v11 = vpop.permute.xlu1 %924  ;;  %1045 = vst.msk [vmem:[#allocation2 + $0x1c8] sm:$0xf] %vm1006_vm4, %v939_v17  ;;  %v1097_v17 = vld [vmem:[%s6358_s27 + $0xa8] sm:$0xf] }
  0xe8   : > { %1038 = vst.msk [vmem:[#allocation2 + $0x174] sm:$0xf] %vm1006_vm4, %v925_v11  ;;  %v923_v14 = vpop.permute.xlu0 %922  ;;  %v1277_v11 = vrot.slane %v1275_v6, 4 }
  0xe9   : > { %1037 = vst.msk [vmem:[#allocation2 + $0x168] sm:$0xf] %vm1006_vm4, %v923_v14  ;;  %v1274_v14 = vrot.slane %v1272_v9, 4  ;;  %v1499_v9 = vld [vmem:[%s6358_s27 + $0x20] sm:$0xf] }
  0xea   : > { %v1279_v20 = vsel %vm6623_vm7, %v1277_v11, %v1278_v12 }
  0xec   : > { %1353 = vrot.lane.b32.xlu2 %v1237_v25, %s6280_s29  ;;  %v1281_v25 = vrot.slane %v1097_v17, 5 }
  0xed   : > { %1357 = vrot.lane.b32.xlu1 %v1243_v19, %s6280_s29 }
  0xee   : > { %1355 = vrot.lane.b32.xlu0 %v1240_v22, %s6280_s29  ;;  %v945_v37 = vpop.permute.xlu2 %944  ;;  %v1276_v22 = vsel %vm6623_vm7, %v1274_v14, %v1275_v6  ;;  %v1282_v42 = vsel %vm6623_vm7, %v1280_v34, %v1281_v25  ;;  %v1503_v14 = vld [vmem:[%s6358_s27 + $0x30] sm:$0xf] }
  0xef   : > { %v931_v30 = vpop.permute.xlu1 %930  ;;  %1048 = vst.msk [vmem:[#allocation2 + $0x1ec] sm:$0xf] %vm1006_vm4, %v945_v37  ;;  %v1288_v37 = vsel %vm6623_vm7, %v1286_v27, %v1287_v28  ;;  %v1509_v27 = vld [vmem:[%s6358_s27 + $0x48] sm:$0xf]  ;;  %v1508_v28 = vld [vmem:[%s6358_s27 + $0x44] sm:$0xf] }
  0xf0   : > { %1041 = vst.msk [vmem:[#allocation2 + $0x198] sm:$0xf] %vm1006_vm4, %v931_v30  ;;  %v929_v33 = vpop.permute.xlu0 %928  ;;  %v1283_v30 = vrot.slane %v1281_v25, 4  ;;  %v1511_v34 = vld [vmem:[%s6358_s27 + $0x50] sm:$0xf] }
  0xf1   : > { %1040 = vst.msk [vmem:[#allocation2 + $0x18c] sm:$0xf] %vm1006_vm4, %v929_v33  ;;  %v1100_v33 = vld [vmem:[%s6358_s27 + $0xb4] sm:$0xf] }
  0xf4   : > { %1359 = vrot.lane.b32.xlu2 %v1246_v44, %s6280_s29  ;;  %v1296_v44 = vrot.slane %v1102_v40, 5  ;;  %v1515_v40 = vld [vmem:[%s6358_s27 + $0x60] sm:$0xf] }
  0xf5   : > { %1363 = vrot.lane.b32.xlu1 %v1252_v39, %s6280_s29  ;;  %v1285_v39 = vsel %vm6623_vm7, %v1283_v30, %v1284_v21  ;;  %v1505_v21 = vld [vmem:[%s6358_s27 + $0x38] sm:$0xf] }
  0xf6   : > { %1361 = vrot.lane.b32.xlu0 %v1249_v41, %s6280_s29  ;;  %v951_v53 = vpop.permute.xlu2 %950  ;;  %v1290_v41 = vrot.slane %v1100_v33, 5  ;;  %v1512_v33 = vld [vmem:[%s6358_s27 + $0x54] sm:$0xf] }
  0xf7   : > { %v937_v47 = vpop.permute.xlu1 %936  ;;  %1051 = vst.msk [vmem:[#allocation2 + $0x210] sm:$0xf] %vm1006_vm4, %v951_v53  ;;  %v1103_v53 = vld [vmem:[%s6358_s27 + $0xc0] sm:$0x1] }
  0xf8   : > { %1044 = vst.msk [vmem:[#allocation2 + $0x1bc] sm:$0xf] %vm1006_vm4, %v937_v47  ;;  %v935_v50 = vpop.permute.xlu0 %934  ;;  %v1292_v46 = vrot.slane %v1290_v41, 4  ;;  %v1291_v52 = vsel %vm6623_vm7, %v1289_v48, %v1290_v41  ;;  %v1299_v57 = vrot.slane %v1103_v53, 5  ;;  %v1514_v41 = vld [vmem:[%s6358_s27 + $0x5c] sm:$0xf] }
  0xf9   : > { %1043 = vst.msk [vmem:[#allocation2 + $0x1b0] sm:$0xf] %vm1006_vm4, %v935_v50  ;;  %v1297_v50 = vsel %vm6623_vm7, %v1295_v43, %v1296_v44 }
  0xfa   : > { %v1294_v51 = vsel %vm6623_vm7, %v1292_v46, %v1293_v38  ;;  %v3860_v46 = vld [vmem:[%s6358_s27 + $0x18] sm:$0xe] }
  0xfc   : > { %1365 = vrot.lane.b32.xlu2 %v1255_v59, %s6280_s29  ;;  %v1495_v59 = vld [vmem:[%s6358_s27 + $0x10] sm:$0xf] }
  0xfd   : > { %1369 = vrot.lane.b32.xlu1 %v1261_v54, %s6280_s29 }
  0xfe   : > { %1367 = vrot.lane.b32.xlu0 %v1258_v56, %s6280_s29  ;;  %v957_v4 = vpop.permute.xlu2 %956  ;;  %v1298_v56 = vrot.slane %v1296_v44, 4 }
  0xff   : > { %v943_v62 = vpop.permute.xlu1 %942  ;;  %1054 = vst.msk [vmem:[#allocation2 + $0x234] sm:$0xf] %vm1006_vm4, %v957_v4 }
 0x100   : > { %1047 = vst.msk [vmem:[#allocation2 + $0x1e0] sm:$0xf] %vm1006_vm4, %v943_v62  ;;  %v941_v1 = vpop.permute.xlu0 %940  ;;  %v1300_v61 = vsel %vm6623_vm7, %v1298_v56, %v1299_v57  ;;  %v1517_v56 = vld [vmem:[%s6358_s27 + $0x68] sm:$0xf] }
 0x101   : > { %1046 = vst.msk [vmem:[#allocation2 + $0x1d4] sm:$0xf] %vm1006_vm4, %v941_v1  ;;  %v1498_v1 = vld [vmem:[%s6358_s27 + $0x1c] sm:$0xf] }
 0x104   : > { %1371 = vrot.lane.b32.xlu2 %v1264_v10, %s6280_s29 }
 0x105   : > { %1375 = vrot.lane.b32.xlu1 %v1270_v5, %s6280_s29 }
 0x106   : > { %1373 = vrot.lane.b32.xlu0 %v1267_v7, %s6280_s29  ;;  %v1306_v19 = vpop.permute.xlu2 %1305  ;;  %v1501_v7 = vld [vmem:[%s6358_s27 + $0x28] sm:$0xf] }
 0x107   : > { %v949_v13 = vpop.permute.xlu1 %948  ;;  %1448 = vst.msk [vmem:[#allocation2 + $0x18] sm:$0xf] %vm1445_vm8, %v1306_v19  ;;  %v1507_v19 = vld [vmem:[%s6358_s27 + $0x40] sm:$0xf] }
 0x108   : > { %1050 = vst.msk [vmem:[#allocation2 + $0x204] sm:$0xf] %vm1006_vm4, %v949_v13  ;;  %v947_v16 = vpop.permute.xlu0 %946  ;;  %v1504_v13 = vld [vmem:[%s6358_s27 + $0x34] sm:$0xf] }
 0x109   : > { %1049 = vst.msk [vmem:[#allocation2 + $0x1f8] sm:$0xf] %vm1006_vm4, %v947_v16 }
 0x10c   : > { %1377 = vrot.lane.b32.xlu2 %v1273_v26, %s6280_s29  ;;  %v1510_v26 = vld [vmem:[%s6358_s27 + $0x4c] sm:$0xf] }
 0x10d   : > { %1381 = vrot.lane.b32.xlu1 %v1279_v20, %s6280_s29  ;;  %v1506_v20 = vld [vmem:[%s6358_s27 + $0x3c] sm:$0xf] }
 0x10e   : > { %1379 = vrot.lane.b32.xlu0 %v1276_v22, %s6280_s29  ;;  %v1312_v35 = vpop.permute.xlu2 %1311 }
 0x10f   : > { %v955_v29 = vpop.permute.xlu1 %954  ;;  %1451 = vst.msk [vmem:[#allocation2 + $0x3c] sm:$0xf] %vm1445_vm8, %v1312_v35 }
 0x110   : > { %1053 = vst.msk [vmem:[#allocation2 + $0x228] sm:$0xf] %vm1006_vm4, %v955_v29  ;;  %v953_v32 = vpop.permute.xlu0 %952 }
 0x111   : > { %1052 = vst.msk [vmem:[#allocation2 + $0x21c] sm:$0xf] %vm1006_vm4, %v953_v32  ;;  %v1513_v32 = vld [vmem:[%s6358_s27 + $0x58] sm:$0xf] }
 0x114   : > { %1383 = vrot.lane.b32.xlu2 %v1282_v42, %s6280_s29  ;;  %v3861_v42 = vld [vmem:[%s6358_s27 + $0x1c] sm:$0xf] }
 0x115   : > { %1387 = vrot.lane.b32.xlu1 %v1288_v37, %s6280_s29  ;;  %v3960_v44 = vrot.slane %v3861_v42, 5 }
 0x116   : > { %1385 = vrot.lane.b32.xlu0 %v1285_v39, %s6280_s29  ;;  %v1318_v49 = vpop.permute.xlu2 %1317  ;;  %v1516_v39 = vld [vmem:[%s6358_s27 + $0x64] sm:$0xf] }
 0x117   : > { %v1304_v45 = vpop.permute.xlu1 %1303  ;;  %1454 = vst.msk [vmem:[#allocation2 + $0x60] sm:$0xf] %vm1445_vm8, %v1318_v49  ;;  %v5963_v49 = vld [vmem:[%s9186_s1 + $0x38] sm:$0xff] }
 0x118   : > { %1447 = vst.msk [vmem:[#allocation2 + $0xc] sm:$0xf] %vm1445_vm8, %v1304_v45  ;;  %v1302_v47 = vpop.permute.xlu0 %1301  ;;  %4872 = vmatpush.bf16.msra.mxu0 %v5963_v49  ;;  %6117 = vmatpush.bf16.msra.mxu3 %v5963_v49 }
 0x119   : > { %1446 = vst.msk [vmem:[#allocation2] sm:$0xf] %vm1445_vm8, %v1302_v47  ;;  %v3862_v47 = vld [vmem:[%s6358_s27 + $0x20] sm:$0xf] }
 0x11a   : > { %v3963_v53 = vrot.slane %v3862_v47, 5 }
 0x11c   : > { %1389 = vrot.lane.b32.xlu2 %v1291_v52, %s6280_s29  ;;  %v3962_v52 = vrot.slane %v3960_v44, 4 }
 0x11d   : > { %1393 = vrot.lane.b32.xlu1 %v1297_v50, %s6280_s29  ;;  %v5496_v50 = vrot.slane %v3860_v46, 9 }
 0x11e   : > { %1391 = vrot.lane.b32.xlu0 %v1294_v51, %s6280_s29  ;;  %v1324_v58 = vpop.permute.xlu2 %1323  ;;  %v1519_v51 = vld [vmem:[%s6358_s27 + $0x70] sm:$0xf]  ;;  %v3964_v57 = vsel %vm6623_vm7, %v3962_v52, %v3963_v53 }
 0x11f   : > { %v1310_v54 = vpop.permute.xlu1 %1309  ;;  %1457 = vst.msk [vmem:[#allocation2 + $0x84] sm:$0xf] %vm1445_vm8, %v1324_v58  ;;  %v5973_v58 = vld [vmem:[%s9186_s1 + $0x88] sm:$0xff] }
 0x120   : > { %1450 = vst.msk [vmem:[#allocation2 + $0x30] sm:$0xf] %vm1445_vm8, %v1310_v54  ;;  %v1308_v55 = vpop.permute.xlu0 %1307  ;;  %v1518_v54 = vld [vmem:[%s6358_s27 + $0x6c] sm:$0xf]  ;;  %5136 = vmatpush.bf16.msra.mxu2 %v5973_v58 }
 0x121   : > { %1449 = vst.msk [vmem:[#allocation2 + $0x24] sm:$0xf] %vm1445_vm8, %v1308_v55  ;;  %v3961_v55 = vsel %vm6623_vm7, %v5496_v50, %v3960_v44  ;;  %v3135_v44 = vld [vmem:[%s6358_s27 + $0x18] sm:$0xf] }
 0x122   : > { %4151 = vst.msk [vmem:[#allocation2 + $0x8] sm:$0xf] %vm277_vm3, %v3961_v55  ;;  %v3188_v55 = vshll.u32 %v3135_v44, 16 }
 0x123   : > { %4152 = vst.msk [vmem:[#allocation2 + $0x14] sm:$0xf] %vm277_vm3, %v3964_v57  ;;  %v1529_v57 = vld [vmem:[%s6358_s27 + $0x98] sm:$0xf] }
 0x124   : > { %1395 = vrot.lane.b32.xlu2 %v1300_v61, %s6280_s29 }
 0x125   : > { %1592 = vrot.lane.b32.xlu1 %v1495_v59, %s6281_s30  ;;  %v5962_v59 = vld [vmem:[%s9186_s1 + $0x30] sm:$0xff] }
 0x126   : > { %1590 = vrot.lane.b32.xlu0 %v1494_v60, %s6281_s30  ;;  %v1330_v0 = vpop.permute.xlu2 %1329  ;;  %4873 = vmatpush.bf16.msra.mxu0 %v5962_v59 }
 0x127   : > { %v1316_v62 = vpop.permute.xlu1 %1315  ;;  %1460 = vst.msk [vmem:[#allocation2 + $0xa8] sm:$0xf] %vm1445_vm8, %v1330_v0  ;;  %6118 = vmatpush.bf16.msra.mxu3 %v5962_v59  ;;  %v5961_v0 = vld [vmem:[%s9186_s1 + $0x28] sm:$0xff] }
 0x128   : > { %1453 = vst.msk [vmem:[#allocation2 + $0x54] sm:$0xf] %vm1445_vm8, %v1316_v62  ;;  %v1314_v63 = vpop.permute.xlu0 %1313 }
 0x129   : > { %1452 = vst.msk [vmem:[#allocation2 + $0x48] sm:$0xf] %vm1445_vm8, %v1314_v63  ;;  %v5972_v63 = vld [vmem:[%s9186_s1 + $0x80] sm:$0xff] }
 0x12a   : > { %5137 = vmatpush.bf16.msra.mxu2 %v5972_v63  ;;  %4874 = vmatpush.bf16.msra.mxu0 %v5961_v0 }
 0x12b   : > { %6119 = vmatpush.bf16.msra.mxu3 %v5961_v0  ;;  %v7115_v0 = vld [vmem:[%s6358_s27 + $0x20] sm:$0xf] }
 0x12c   : > { %1594 = vrot.lane.b32.xlu2 %v1496_v3, %s6281_s30  ;;  %v5507_v3 = vld [vmem:[#allocation2 + $0x8] sm:$0xf] }
 0x12d   : > { %1598 = vrot.lane.b32.xlu1 %v1498_v1, %s6281_s30  ;;  %v1522_v1 = vld [vmem:[%s6358_s27 + $0x7c] sm:$0xf] }
 0x12e   : > { %1596 = vrot.lane.b32.xlu0 %v1497_v2, %s6281_s30  ;;  %v1336_v6 = vpop.permute.xlu2 %1335  ;;  %v1521_v2 = vld [vmem:[%s6358_s27 + $0x78] sm:$0xf] }
 0x12f   : > { %v1322_v4 = vpop.permute.xlu1 %1321  ;;  %1463 = vst.msk [vmem:[#allocation2 + $0xcc] sm:$0xf] %vm1445_vm8, %v1336_v6 }
 0x130   : > { %1456 = vst.msk [vmem:[#allocation2 + $0x78] sm:$0xf] %vm1445_vm8, %v1322_v4  ;;  %v1320_v5 = vpop.permute.xlu0 %1319  ;;  %v1520_v4 = vld [vmem:[%s6358_s27 + $0x74] sm:$0xf] }
 0x131   : > { %1455 = vst.msk [vmem:[#allocation2 + $0x6c] sm:$0xf] %vm1445_vm8, %v1320_v5  ;;  %v5886_v5 = vld [vmem:[#allocation2 + $0x10] sm:$0xf0] }
 0x132   : > { %v5508_v6 = vor.u32 %v5886_v5, %v5507_v3 }
 0x134   : > { %1600 = vrot.lane.b32.xlu2 %v1499_v9, %s6281_s30  ;;  %5857 = vmatmul.msk.bf16.vlgmr.msra.gmra.mxu2 %vm4799_vm9, %v5508_v6 }
 0x135   : > { %1604 = vrot.lane.b32.xlu1 %v1501_v7, %s6281_s30  ;;  %v5960_v7 = vld [vmem:[%s9186_s1 + $0x20] sm:$0xff] }
 0x136   : > { %1602 = vrot.lane.b32.xlu0 %v1500_v8, %s6281_s30  ;;  %v1342_v12 = vpop.permute.xlu2 %1341  ;;  %v3863_v8 = vld [vmem:[%s6358_s27 + $0x24] sm:$0xf]  ;;  %4875 = vmatpush.bf16.msra.mxu0 %v5960_v7 }
 0x137   : > { %v1328_v10 = vpop.permute.xlu1 %1327  ;;  %1466 = vst.msk [vmem:[#allocation2 + $0xf0] sm:$0xf] %vm1445_vm8, %v1342_v12  ;;  %6120 = vmatpush.bf16.msra.mxu3 %v5960_v7  ;;  %v1525_v12 = vld [vmem:[%s6358_s27 + $0x88] sm:$0xf] }
 0x138   : > { %1459 = vst.msk [vmem:[#allocation2 + $0x9c] sm:$0xf] %vm1445_vm8, %v1328_v10  ;;  %v1326_v11 = vpop.permute.xlu0 %1325  ;;  %v3966_v10 = vrot.slane %v3863_v8, 5  ;;  %v3204_v8 = vshll.u32 %v7115_v0, 16 }
 0x139   : > { %1458 = vst.msk [vmem:[#allocation2 + $0x90] sm:$0xf] %vm1445_vm8, %v1326_v11 }
 0x13c   : > { %1606 = vrot.lane.b32.xlu2 %v1502_v15, %s6281_s30  ;;  %v3864_v15 = vld [vmem:[%s6358_s27 + $0x28] sm:$0xf] }
 0x13d   : > { %1610 = vrot.lane.b32.xlu1 %v1504_v13, %s6281_s30 }
 0x13e   : > { %1608 = vrot.lane.b32.xlu0 %v1503_v14, %s6281_s30  ;;  %v1348_v18 = vpop.permute.xlu2 %1347  ;;  %v5959_v14 = vld [vmem:[%s9186_s1 + $0x18] sm:$0xff] }
 0x13f   : > { %v1334_v16 = vpop.permute.xlu1 %1333  ;;  %1469 = vst.msk [vmem:[#allocation2 + $0x114] sm:$0xf] %vm1445_vm8, %v1348_v18  ;;  %v3968_v18 = vrot.slane %v3966_v10, 4  ;;  %4876 = vmatpush.bf16.msra.mxu0 %v5959_v14  ;;  %6121 = vmatpush.bf16.msra.mxu3 %v5959_v14 }
 0x140   : > { %1462 = vst.msk [vmem:[#allocation2 + $0xc0] sm:$0xf] %vm1445_vm8, %v1334_v16  ;;  %v1332_v17 = vpop.permute.xlu0 %1331  ;;  %v3965_v16 = vrot.slane %v3963_v53, 4  ;;  %v1530_v53 = vld [vmem:[%s6358_s27 + $0x9c] sm:$0xf] }
 0x141   : > { %1461 = vst.msk [vmem:[#allocation2 + $0xb4] sm:$0xf] %vm1445_vm8, %v1332_v17  ;;  %v1524_v17 = vld [vmem:[%s6358_s27 + $0x84] sm:$0xf] }
 0x144   : > { %1612 = vrot.lane.b32.xlu2 %v1505_v21, %s6281_s30  ;;  %v3967_v21 = vsel %vm6623_vm7, %v3965_v16, %v3966_v10  ;;  %v2847_v10 = vld [vmem:[%s6358_s27 + $0x18] sm:$0xf]  ;;  %v7132_v16 = vrot.slane %v3204_v8, 5 }
 0x145   : > { %1616 = vrot.lane.b32.xlu1 %v1507_v19, %s6281_s30  ;;  %v3969_v19 = vrot.slane %v3864_v15, 5  ;;  %4153 = vst.msk [vmem:[#allocation2 + $0x20] sm:$0xf] %vm277_vm3, %v3967_v21 }
 0x146   : > { %1614 = vrot.lane.b32.xlu0 %v1506_v20, %s6281_s30  ;;  %v1354_v25 = vpop.permute.xlu2 %1353  ;;  %v1523_v20 = vld [vmem:[%s6358_s27 + $0x80] sm:$0xf] }
 0x147   : > { %v1340_v22 = vpop.permute.xlu1 %1339  ;;  %1472 = vst.msk [vmem:[#allocation2 + $0x138] sm:$0xf] %vm1445_vm8, %v1354_v25  ;;  %v3971_v49 = vrot.slane %v3969_v19, 4 }
 0x148   : > { %1465 = vst.msk [vmem:[#allocation2 + $0xe4] sm:$0xf] %vm1445_vm8, %v1340_v22  ;;  %v1338_v23 = vpop.permute.xlu0 %1337  ;;  %v3970_v22 = vsel %vm6623_vm7, %v3968_v18, %v3969_v19  ;;  %v3867_v19 = vld [vmem:[%s6358_s27 + $0x34] sm:$0xf] }
 0x149   : > { %1464 = vst.msk [vmem:[#allocation2 + $0xd8] sm:$0xf] %vm1445_vm8, %v1338_v23  ;;  %v5958_v23 = vld [vmem:[%s9186_s1 + $0x10] sm:$0xff] }
 0x14a   : > { %4154 = vst.msk [vmem:[#allocation2 + $0x2c] sm:$0xf] %vm277_vm3, %v3970_v22  ;;  %4877 = vmatpush.bf16.msra.mxu0 %v5958_v23  ;;  %6122 = vmatpush.bf16.msra.mxu3 %v5958_v23  ;;  %v3138_v22 = vld [vmem:[%s6358_s27 + $0x24] sm:$0xf]  ;;  %v3978_v23 = vrot.slane %v3867_v19, 5 }
 0x14c   : > { %1618 = vrot.lane.b32.xlu2 %v1508_v28, %s6281_s30  ;;  %v5957_v28 = vld [vmem:[%s9186_s1 + $0x8] sm:$0xff] }
 0x14d   : > { %1622 = vrot.lane.b32.xlu1 %v1510_v26, %s6281_s30 }
 0x14e   : > { %1620 = vrot.lane.b32.xlu0 %v1509_v27, %s6281_s30  ;;  %v1360_v31 = vpop.permute.xlu2 %1359  ;;  %4878 = vmatpush.bf16.msra.mxu0 %v5957_v28 }
 0x14f   : > { %v1346_v29 = vpop.permute.xlu1 %1345  ;;  %1475 = vst.msk [vmem:[#allocation2 + $0x15c] sm:$0xf] %vm1445_vm8, %v1360_v31  ;;  %v1526_v31 = vld [vmem:[%s6358_s27 + $0x8c] sm:$0xf]  ;;  %6123 = vmatpush.bf16.msra.mxu3 %v5957_v28 }
 0x150   : > { %1468 = vst.msk [vmem:[#allocation2 + $0x108] sm:$0xf] %vm1445_vm8, %v1346_v29  ;;  %v1344_v30 = vpop.permute.xlu0 %1343  ;;  %v1528_v29 = vld [vmem:[%s6358_s27 + $0x94] sm:$0xf] }
 0x151   : > { %1467 = vst.msk [vmem:[#allocation2 + $0xfc] sm:$0xf] %vm1445_vm8, %v1344_v30  ;;  %v1527_v30 = vld [vmem:[%s6358_s27 + $0x90] sm:$0xf] }
 0x154   : > { %1624 = vrot.lane.b32.xlu2 %v1511_v34, %s6281_s30  ;;  %v3136_v34 = vld [vmem:[%s6358_s27 + $0x1c] sm:$0xf] }
 0x155   : > { %1628 = vrot.lane.b32.xlu1 %v1513_v32, %s6281_s30  ;;  %v5519_v32 = vld [vmem:[#allocation2 + $0x20] sm:$0xf]  ;;  %v3194_v47 = vshll.u32 %v3136_v34, 16 }
 0x156   : > { %1626 = vrot.lane.b32.xlu0 %v1512_v33, %s6281_s30  ;;  %v1366_v38 = vpop.permute.xlu2 %1365  ;;  %v5889_v33 = vld [vmem:[#allocation2 + $0x28] sm:$0xf0] }
 0x157   : > { %v1352_v35 = vpop.permute.xlu1 %1351  ;;  %1478 = vst.msk [vmem:[#allocation2 + $0x180] sm:$0xf] %vm1445_vm8, %v1366_v38  ;;  %v3865_v38 = vld [vmem:[%s6358_s27 + $0x2c] sm:$0xf] }
 0x158   : > { %1471 = vst.msk [vmem:[#allocation2 + $0x12c] sm:$0xf] %vm1445_vm8, %v1352_v35  ;;  %v1350_v37 = vpop.permute.xlu0 %1349  ;;  %v5520_v35 = vor.u32 %v5889_v33, %v5519_v32  ;;  %v3218_v32 = vshrl.u32 %v3138_v22, 16  ;;  %v3980_v33 = vrot.slane %v3978_v23, 4 }
 0x159   : > { %1470 = vst.msk [vmem:[#allocation2 + $0x120] sm:$0xf] %vm1445_vm8, %v1350_v37  ;;  %v5956_v37 = vld [vmem:[%s9186_s1] sm:$0xff] }
 0x15a   : > { %5858 = vmatmul.msk.bf16.gmra.mxu2 %vm4799_vm9, %v5520_v35  ;;  %4879 = vmatpush.bf16.msra.mxu0 %v5956_v37  ;;  %v3208_v35 = vshrl.u32 %v7115_v0, 16 }
 0x15b   : > { %6124 = vmatpush.bf16.msra.mxu3 %v5956_v37 }
 0x15c   : > { %1630 = vrot.lane.b32.xlu2 %v1514_v41, %s6281_s30  ;;  %v3972_v41 = vrot.slane %v3865_v38, 5 }
 0x15d   : > { %1634 = vrot.lane.b32.xlu1 %v1516_v39, %s6281_s30 }
 0x15e   : > { %1632 = vrot.lane.b32.xlu0 %v1515_v40, %s6281_s30  ;;  %v1372_v48 = vpop.permute.xlu2 %1371  ;;  %v2413_v40 = vld [vmem:[%s6358_s27 + $0x10] sm:$0xf]  ;;  %v3973_v58 = vsel %vm6623_vm7, %v3971_v49, %v3972_v41  ;;  %v3210_v49 = vrot.slane %v3208_v35, 4 }
 0x15f   : > { %v1358_v43 = vpop.permute.xlu1 %1357  ;;  %1481 = vst.msk [vmem:[#allocation2 + $0x1a4] sm:$0xf] %vm1445_vm8, %v1372_v48  ;;  %v3198_v48 = vshrl.u32 %v3136_v34, 16  ;;  %v2512_v50 = vrot.slane %v2413_v40, 5  ;;  %v2848_v40 = vld [vmem:[%s6358_s27 + $0x1c] sm:$0xf] }
 0x160   : > { %1474 = vst.msk [vmem:[#allocation2 + $0x150] sm:$0xf] %vm1445_vm8, %v1358_v43  ;;  %v1356_v45 = vpop.permute.xlu0 %1355  ;;  %v1531_v43 = vld [vmem:[%s6358_s27 + $0xa0] sm:$0xf] }
 0x161   : > { %1473 = vst.msk [vmem:[#allocation2 + $0x144] sm:$0xf] %vm1445_vm8, %v1356_v45  ;;  %v7096_v45 = vld [vmem:[%s6358_s27 + $0x30] sm:$0xf]  ;;  %v2514_v63 = vrot.slane %v2512_v50, 4 }
 0x162   : > { %v3975_v52 = vrot.slane %v7096_v45, 5  ;;  %4155 = vst.msk [vmem:[#allocation2 + $0x38] sm:$0xf] %vm277_vm3, %v3973_v58  ;;  %v3211_v58 = vor.u32 %v3210_v49, %v7132_v16  ;;  %v3871_v49 = vld [vmem:[%s6358_s27 + $0x44] sm:$0xf] }
 0x164   : > { %1636 = vrot.lane.b32.xlu2 %v1517_v56, %s6281_s30  ;;  %v7103_v56 = vld [vmem:[%s6358_s27 + $0x14] sm:$0xf] }
 0x165   : > { %1640 = vrot.lane.b32.xlu1 %v1519_v51, %s6281_s30  ;;  %v3974_v51 = vrot.slane %v3972_v41, 4 }
 0x166   : > { %1638 = vrot.lane.b32.xlu0 %v1518_v54, %s6281_s30  ;;  %v1378_v62 = vpop.permute.xlu2 %1377  ;;  %v3185_v54 = vshrl.u32 %v3135_v44, 16  ;;  %v3220_v44 = vrot.slane %v3218_v32, 4  ;;  %v7214_v32 = vld [vmem:[%s6358_s27 + $0x30] sm:$0xf] }
 0x167   : > { %v1364_v60 = vpop.permute.xlu1 %1363  ;;  %1484 = vst.msk [vmem:[#allocation2 + $0x1c8] sm:$0xf] %vm1445_vm8, %v1378_v62  ;;  %v3976_v59 = vsel %vm6623_vm7, %v3974_v51, %v3975_v52  ;;  %v2412_v62 = vld [vmem:[%s6358_s27 + $0xc] sm:$0xe] }
 0x168   : > { %1477 = vst.msk [vmem:[#allocation2 + $0x174] sm:$0xf] %vm1445_vm8, %v1364_v60  ;;  %v1362_v61 = vpop.permute.xlu0 %1361  ;;  %v3196_v60 = vrot.slane %v3194_v47, 5  ;;  %v3187_v3 = vrot.slane %v3185_v54, 4  ;;  %v5495_v6 = vrot.slane %v2412_v62, 9 }
 0x169   : > { %1476 = vst.msk [vmem:[#allocation2 + $0x168] sm:$0xf] %vm1445_vm8, %v1362_v61  ;;  %v3200_v61 = vrot.slane %v3198_v48, 4  ;;  %v5531_v14 = vld [vmem:[#allocation2 + $0x38] sm:$0xf] }
 0x16a   : > { %4156 = vst.msk [vmem:[#allocation2 + $0x44] sm:$0xf] %vm277_vm3, %v3976_v59  ;;  %v3139_v48 = vld [vmem:[%s6358_s27 + $0x28] sm:$0xf] }
 0x16b   : > { %v3201_v7 = vor.u32 %v3200_v61, %v3196_v60 }
 0x16c   : > { %1642 = vrot.lane.b32.xlu2 %v1520_v4, %s6281_s30  ;;  %v3190_v4 = vrot.slane %v3188_v55, 5  ;;  %v3224_v55 = vshll.u32 %v3139_v48, 16 }
 0x16d   : > { %1646 = vrot.lane.b32.xlu1 %v1522_v1, %s6281_s30  ;;  %v3202_v15 = vrot.slane %v3201_v7, 4 }
 0x16e   : > { %1644 = vrot.lane.b32.xlu0 %v1521_v2, %s6281_s30  ;;  %v1384_v13 = vpop.permute.xlu2 %1383  ;;  %v2515_v2 = vrot.slane %v7103_v56, 5  ;;  %v7183_v62 = vrot.slane %v3224_v55, 5 }
 0x16f   : > { %v1370_v9 = vpop.permute.xlu1 %1369  ;;  %1487 = vst.msk [vmem:[#allocation2 + $0x1ec] sm:$0xf] %vm1445_vm8, %v1384_v13  ;;  %v2513_v13 = vsel %vm6623_vm7, %v5495_v6, %v2512_v50  ;;  %v3207_v28 = vsel %vm6368_vm2, %v3202_v15, %v7132_v16  ;;  %v3228_v16 = vshrl.u32 %v3139_v48, 16 }
 0x170   : > { %1480 = vst.msk [vmem:[#allocation2 + $0x198] sm:$0xf] %vm1445_vm8, %v1370_v9  ;;  %v1368_v11 = vpop.permute.xlu0 %1367  ;;  %v2517_v51 = vrot.slane %v2515_v2, 4 }
 0x171   : > { %1479 = vst.msk [vmem:[#allocation2 + $0x18c] sm:$0xf] %vm1445_vm8, %v1368_v11  ;;  %v2516_v11 = vsel %vm6623_vm7, %v2514_v63, %v2515_v2  ;;  %v2417_v63 = vld [vmem:[%s6358_s27 + $0x20] sm:$0xf] }
 0x174   : > { %1648 = vrot.lane.b32.xlu2 %v1523_v20, %s6281_s30 }
 0x175   : > { %1652 = vrot.lane.b32.xlu1 %v1525_v12, %s6281_s30  ;;  %v3191_v12 = vor.u32 %v3190_v4, %v3187_v3  ;;  %v3212_v4 = vrot.slane %v3211_v58, 4 }
 0x176   : > { %1650 = vrot.lane.b32.xlu0 %v1524_v17, %s6281_s30  ;;  %v1390_v27 = vpop.permute.xlu2 %1389  ;;  %v5892_v17 = vld [vmem:[#allocation2 + $0x40] sm:$0xf0] }
 0x177   : > { %v1376_v25 = vpop.permute.xlu1 %1375  ;;  %1490 = vst.msk [vmem:[#allocation2 + $0x210] sm:$0xf] %vm1445_vm8, %v1390_v27  ;;  %v5532_v18 = vor.u32 %v5892_v17, %v5531_v14  ;;  %v3192_v21 = vrot.slane %v3191_v12, 4  ;;  %v7142_v27 = vld [vmem:[%s6358_s27 + $0x38] sm:$0xf] }
 0x178   : > { %1483 = vst.msk [vmem:[#allocation2 + $0x1bc] sm:$0xf] %vm1445_vm8, %v1376_v25  ;;  %v1374_v26 = vpop.permute.xlu0 %1373  ;;  %v3981_v34 = vrot.slane %v7142_v27, 5 }
 0x179   : > { %1482 = vst.msk [vmem:[#allocation2 + $0x1b0] sm:$0xf] %vm1445_vm8, %v1374_v26  ;;  %v2415_v26 = vld [vmem:[%s6358_s27 + $0x18] sm:$0xf]  ;;  %5859 = vmatmul.msk.bf16.gmra.mxu2 %vm4799_vm9, %v5532_v18  ;;  %v3197_v37 = vsel %vm6368_vm2, %v3192_v21, %v3196_v60 }
 0x17a   : > { %v2518_v38 = vrot.slane %v2415_v26, 5  ;;  %v3983_v12 = vrot.slane %v3981_v34, 4 }
 0x17c   : > { %1654 = vrot.lane.b32.xlu2 %v1526_v31, %s6281_s30  ;;  %v3214_v31 = vshll.u32 %v3138_v22, 16  ;;  %v2519_v56 = vsel %vm6623_vm7, %v2517_v51, %v2518_v38 }
 0x17d   : > { %1658 = vrot.lane.b32.xlu1 %v1528_v29, %s6281_s30 }
 0x17e   : > { %1656 = vrot.lane.b32.xlu0 %v1527_v30, %s6281_s30  ;;  %v1396_v46 = vpop.permute.xlu2 %1395  ;;  %v3977_v30 = vrot.slane %v3975_v52, 4 }
 0x17f   : > { %v1382_v39 = vpop.permute.xlu1 %1381  ;;  %1493 = vst.msk [vmem:[#allocation2 + $0x234] sm:$0xf] %vm1445_vm8, %v1396_v46  ;;  %v2520_v46 = vrot.slane %v2518_v38, 4 }
 0x180   : > { %1486 = vst.msk [vmem:[#allocation2 + $0x1e0] sm:$0xf] %vm1445_vm8, %v1382_v39  ;;  %v1380_v42 = vpop.permute.xlu0 %1379  ;;  %v7154_v39 = vld [vmem:[%s6358_s27 + $0x1c] sm:$0xf]  ;;  %v3979_v41 = vsel %vm6623_vm7, %v3977_v30, %v3978_v23  ;;  %v2418_v23 = vld [vmem:[%s6358_s27 + $0x24] sm:$0xf] }
 0x181   : > { %1485 = vst.msk [vmem:[#allocation2 + $0x1d4] sm:$0xf] %vm1445_vm8, %v1380_v42  ;;  %v3982_v42 = vsel %vm6623_vm7, %v3980_v33, %v3981_v34  ;;  %v2521_v47 = vrot.slane %v7154_v39, 5 }
 0x182   : > { %4157 = vst.msk [vmem:[#allocation2 + $0x50] sm:$0xf] %vm277_vm3, %v3979_v41 }
 0x183   : > { %4158 = vst.msk [vmem:[#allocation2 + $0x5c] sm:$0xf] %vm277_vm3, %v3982_v42  ;;  %v2523_v34 = vrot.slane %v2521_v47, 4 }
 0x184   : > { %1660 = vrot.lane.b32.xlu2 %v1529_v57, %s6281_s30  ;;  %v2522_v57 = vsel %vm6623_vm7, %v2520_v46, %v2521_v47 }
 0x185   : > { %1664 = vrot.lane.b32.xlu1 %v1531_v43, %s6281_s30  ;;  %v3216_v43 = vrot.slane %v3214_v31, 5  ;;  %v2527_v31 = vrot.slane %v2418_v23, 5  ;;  %v2420_v23 = vld [vmem:[%s6358_s27 + $0x2c] sm:$0xf] }
 0x186   : > { %1662 = vrot.lane.b32.xlu0 %v1530_v53, %s6281_s30  ;;  %v1595_v9 = vpop.permute.xlu2 %1594  ;;  %v2849_v53 = vld [vmem:[%s6358_s27 + $0x20] sm:$0xf] }
 0x187   : > { %v1388_v1 = vpop.permute.xlu1 %1387  ;;  %1737 = vst.msk [vmem:[#allocation2 + $0x18] sm:$0xf] %vm1734_vm10, %v1595_v9  ;;  %v3221_v54 = vor.u32 %v3220_v44, %v3216_v43  ;;  %v7192_v9 = vld [vmem:[%s6358_s27 + $0x40] sm:$0xf]  ;;  %v3217_v19 = vsel %vm6368_vm2, %v3212_v4, %v3216_v43 }
 0x188   : > { %1489 = vst.msk [vmem:[#allocation2 + $0x204] sm:$0xf] %vm1445_vm8, %v1388_v1  ;;  %v1386_v5 = vpop.permute.xlu0 %1385  ;;  %v3869_v1 = vld [vmem:[%s6358_s27 + $0x3c] sm:$0xf]  ;;  %v3987_v14 = vrot.slane %v7192_v9, 5 }
 0x189   : > { %1488 = vst.msk [vmem:[#allocation2 + $0x1f8] sm:$0xf] %vm1445_vm8, %v1386_v5  ;;  %v5543_v59 = vld [vmem:[#allocation2 + $0x50] sm:$0xf]  ;;  %v3222_v61 = vrot.slane %v3221_v54, 4  ;;  %v3984_v6 = vrot.slane %v3869_v1, 5 }
 0x18a   : > { %v5895_v60 = vld [vmem:[#allocation2 + $0x58] sm:$0xf0]  ;;  %v3140_v5 = vld [vmem:[%s6358_s27 + $0x2c] sm:$0xf]  ;;  %v3989_v58 = vrot.slane %v3987_v14, 4 }
 0x18b   : > { %v5544_v0 = vor.u32 %v5895_v60, %v5543_v59  ;;  %v3227_v15 = vsel %vm6368_vm2, %v3222_v61, %v7183_v62  ;;  %v3234_v17 = vshll.u32 %v3140_v5, 16  ;;  %v3238_v18 = vshrl.u32 %v3140_v5, 16  ;;  %v2419_v61 = vld [vmem:[%s6358_s27 + $0x28] sm:$0xf] }
 0x18c   : > { %2655 = vrot.lane.b32.xlu2 %v2513_v13, %s6279_s28  ;;  %v3986_v13 = vrot.slane %v3984_v6, 4  ;;  %v3985_v21 = vsel %vm6623_vm7, %v3983_v12, %v3984_v6  ;;  %v3142_v6 = vld [vmem:[%s6358_s27 + $0x34] sm:$0xf]  ;;  %v1533_v12 = vld [vmem:[%s6358_s27 + $0xa8] sm:$0xf] }
 0x18d   : > { %2943 = vrot.lane.b32.xlu1 %v2847_v10, %s6280_s29  ;;  %5860 = vmatmul.msk.bf16.gmra.mxu2 %vm4799_vm9, %v5544_v0  ;;  %4159 = vst.msk [vmem:[#allocation2 + $0x68] sm:$0xf] %vm277_vm3, %v3985_v21  ;;  %v3236_v26 = vrot.slane %v3234_v17, 5  ;;  %v3240_v27 = vrot.slane %v3238_v18, 4  ;;  %v2852_v0 = vld [vmem:[%s6358_s27 + $0x2c] sm:$0xf] }
 0x18e   : > { %2657 = vrot.lane.b32.xlu0 %v2516_v11, %s6279_s28  ;;  %v1601_v29 = vpop.permute.xlu2 %1600  ;;  %v3988_v22 = vsel %vm6623_vm7, %v3986_v13, %v3987_v14  ;;  %v5511_v54 = vld [vmem:[#allocation2 + $0x18] sm:$0xf]  ;;  %v3248_v13 = vshrl.u32 %v7214_v32, 16  ;;  %v1532_v14 = vld [vmem:[%s6358_s27 + $0xa4] sm:$0xf] }
 0x18f   : > { %v1394_v20 = vpop.permute.xlu1 %1393  ;;  %1740 = vst.msk [vmem:[#allocation2 + $0x3c] sm:$0xf] %vm1734_vm10, %v1601_v29  ;;  %v3241_v38 = vor.u32 %v3240_v27, %v3236_v26 }
 0x190   : > { %1492 = vst.msk [vmem:[#allocation2 + $0x228] sm:$0xf] %vm1445_vm8, %v1394_v20  ;;  %v1392_v25 = vpop.permute.xlu0 %1391  ;;  %v2524_v20 = vrot.slane %v2417_v63, 5 }
 0x191   : > { %1491 = vst.msk [vmem:[#allocation2 + $0x21c] sm:$0xf] %vm1445_vm8, %v1392_v25  ;;  %v2850_v25 = vld [vmem:[%s6358_s27 + $0x24] sm:$0xf]  ;;  %v3242_v47 = vrot.slane %v3241_v38, 4 }
 0x192   : > { %4160 = vst.msk [vmem:[#allocation2 + $0x74] sm:$0xf] %vm277_vm3, %v3988_v22  ;;  %v2526_v30 = vrot.slane %v2524_v20, 4  ;;  %v2525_v39 = vsel %vm6623_vm7, %v2523_v34, %v2524_v20  ;;  %v3143_v22 = vld [vmem:[%s6358_s27 + $0x38] sm:$0xf] }
 0x193   : > { %v3874_v34 = vld [vmem:[%s6358_s27 + $0x50] sm:$0xf] }
 0x194   : > { %2945 = vrot.lane.b32.xlu2 %v2848_v40, %s6280_s29  ;;  %v3244_v40 = vshll.u32 %v7214_v32, 16  ;;  %v2528_v42 = vsel %vm6623_vm7, %v2526_v30, %v2527_v31  ;;  %v5555_v43 = vld [vmem:[#allocation2 + $0x68] sm:$0xf]  ;;  %v2854_v32 = vld [vmem:[%s6358_s27 + $0x34] sm:$0xf] }
 0x195   : > { %3670 = vrot.lane.b32.xlu1 %v3207_v28, %s6281_s30  ;;  %v3230_v28 = vrot.slane %v3228_v16, 4 }
 0x196   : > { %3668 = vrot.lane.b32.xlu0 %v3197_v37, %s6281_s30  ;;  %v1607_v52 = vpop.permute.xlu2 %1606  ;;  %v2851_v37 = vld [vmem:[%s6358_s27 + $0x28] sm:$0xf]  ;;  %v7230_v48 = vrot.slane %v3244_v40, 5  ;;  %v5891_v16 = vld [vmem:[#allocation2 + $0x38] sm:$0xf0]  ;;  %v3999_v40 = vrot.slane %v3874_v34, 5 }
 0x197   : > { %v1593_v45 = vpop.permute.xlu1 %1592  ;;  %1743 = vst.msk [vmem:[#allocation2 + $0x60] sm:$0xf] %vm1734_vm10, %v1607_v52  ;;  %v3231_v41 = vor.u32 %v3230_v28, %v7183_v62  ;;  %v3990_v52 = vrot.slane %v3871_v49, 5  ;;  %v3872_v62 = vld [vmem:[%s6358_s27 + $0x48] sm:$0xf] }
 0x198   : > { %1736 = vst.msk [vmem:[#allocation2 + $0xc] sm:$0xf] %vm1734_vm10, %v1593_v45  ;;  %v1591_v50 = vpop.permute.xlu0 %1590  ;;  %v3993_v1 = vrot.slane %v3872_v62, 5 }
 0x199   : > { %1735 = vst.msk [vmem:[#allocation2] sm:$0xf] %vm1734_vm10, %v1591_v50  ;;  %v5898_v44 = vld [vmem:[#allocation2 + $0x70] sm:$0xf0]  ;;  %v3232_v51 = vrot.slane %v3231_v41, 4  ;;  %v3992_v59 = vrot.slane %v3990_v52, 4  ;;  %v3991_v63 = vsel %vm6623_vm7, %v3989_v58, %v3990_v52 }
 0x19a   : > { %v5556_v45 = vor.u32 %v5898_v44, %v5555_v43  ;;  %4161 = vst.msk [vmem:[#allocation2 + $0x80] sm:$0xf] %vm277_vm3, %v3991_v63  ;;  %v2853_v41 = vld [vmem:[%s6358_s27 + $0x30] sm:$0xf]  ;;  %v3264_v43 = vshll.u32 %v3143_v22, 16 }
 0x19b   : > { %v3237_v60 = vsel %vm6368_vm2, %v3232_v51, %v3236_v26  ;;  %v3994_v4 = vsel %vm6623_vm7, %v3992_v59, %v3993_v1  ;;  %v3873_v26 = vld [vmem:[%s6358_s27 + $0x4c] sm:$0xf] }
 0x19c   : > { %2659 = vrot.lane.b32.xlu2 %v2519_v56, %s6279_s28  ;;  %v3247_v56 = vsel %vm6368_vm2, %v3242_v47, %v7230_v48  ;;  %4162 = vst.msk [vmem:[#allocation2 + $0x8c] sm:$0xf] %vm277_vm3, %v3994_v4  ;;  %v3996_v30 = vrot.slane %v3873_v26, 5 }
 0x19d   : > { %2947 = vrot.lane.b32.xlu1 %v2849_v53, %s6280_s29  ;;  %5861 = vmatmul.msk.bf16.gmra.mxu2 %vm4799_vm9, %v5556_v45 }
 0x19e   : > { %2661 = vrot.lane.b32.xlu0 %v2522_v57, %s6279_s28  ;;  %v1613_v11 = vpop.permute.xlu2 %1612  ;;  %v3998_v38 = vrot.slane %v3996_v30, 4 }
 0x19f   : > { %v1599_v2 = vpop.permute.xlu1 %1598  ;;  %v5885_v3 = vld [vmem:[#allocation2 + $0x8] sm:$0xf0]  ;;  %1746 = vst.msk [vmem:[#allocation2 + $0x84] sm:$0xf] %vm1734_vm10, %v1613_v11  ;;  %v3258_v11 = vshrl.u32 %v3142_v6, 16 }
 0x1a0   : > { %1739 = vst.msk [vmem:[#allocation2 + $0x30] sm:$0xf] %vm1734_vm10, %v1599_v2  ;;  %v1597_v7 = vpop.permute.xlu0 %1596  ;;  %v5499_v8 = vld [vmem:[#allocation2] sm:$0xf]  ;;  %v2529_v2 = vrot.slane %v2527_v31, 4 }
 0x1a1   : > { %1738 = vst.msk [vmem:[#allocation2 + $0x24] sm:$0xf] %vm1734_vm10, %v1597_v7  ;;  %v5500_v10 = vor.u32 %v5885_v3, %v5499_v8  ;;  %v2530_v3 = vrot.slane %v2419_v61, 5 }
 0x1a3   : > { %4880 = vmatmul.bf16.vlgmr.msra.gmra.mxu0 %v5500_v10  ;;  %v2531_v9 = vsel %vm6623_vm7, %v2529_v2, %v2530_v3  ;;  %v3254_v10 = vshll.u32 %v3142_v6, 16  ;;  %v5901_v20 = vld [vmem:[#allocation2 + $0x88] sm:$0xf0]  ;;  %v2532_v28 = vrot.slane %v2530_v3, 4  ;;  %v3144_v2 = vld [vmem:[%s6358_s27 + $0x3c] sm:$0xf] }
 0x1a4   : > { %2949 = vrot.lane.b32.xlu2 %v2850_v25, %s6280_s29 }
 0x1a5   : > { %3674 = vrot.lane.b32.xlu1 %v3227_v15, %s6281_s30  ;;  %v5567_v15 = vld [vmem:[#allocation2 + $0x80] sm:$0xf]  ;;  %v7266_v18 = vrot.slane %v3254_v10, 5  ;;  %v3274_v10 = vshll.u32 %v3144_v2, 16 }
 0x1a6   : > { %3672 = vrot.lane.b32.xlu0 %v3217_v19, %s6281_s30  ;;  %v1619_v35 = vpop.permute.xlu2 %1618  ;;  %v3260_v19 = vrot.slane %v3258_v11, 4  ;;  %v5568_v25 = vor.u32 %v5901_v20, %v5567_v15  ;;  %v4001_v15 = vrot.slane %v3999_v40, 4 }
 0x1a7   : > { %v1605_v29 = vpop.permute.xlu1 %1604  ;;  %1749 = vst.msk [vmem:[#allocation2 + $0xa8] sm:$0xf] %vm1734_vm10, %v1619_v35  ;;  %v5523_v17 = vld [vmem:[#allocation2 + $0x30] sm:$0xf]  ;;  %v2533_v35 = vrot.slane %v2420_v23, 5 }
 0x1a8   : > { %1742 = vst.msk [vmem:[#allocation2 + $0x54] sm:$0xf] %vm1734_vm10, %v1605_v29  ;;  %v1603_v33 = vpop.permute.xlu0 %1602  ;;  %v5888_v46 = vld [vmem:[#allocation2 + $0x20] sm:$0xf0]  ;;  %v3250_v29 = vrot.slane %v3248_v13, 4  ;;  %v5524_v31 = vor.u32 %v5891_v16, %v5523_v17 }
 0x1a9   : > { %1741 = vst.msk [vmem:[#allocation2 + $0x48] sm:$0xf] %vm1734_vm10, %v1603_v33  ;;  %v5512_v55 = vor.u32 %v5888_v46, %v5511_v54  ;;  %v4000_v46 = vsel %vm6623_vm7, %v3998_v38, %v3999_v40  ;;  %v1534_v54 = vld [vmem:[%s6358_s27 + $0xac] sm:$0xf]  ;;  %v2535_v6 = vrot.slane %v2533_v35, 4 }
 0x1aa   : > { %v3251_v44 = vor.u32 %v3250_v29, %v7230_v48  ;;  %4164 = vst.msk [vmem:[#allocation2 + $0xa4] sm:$0xf] %vm277_vm3, %v4000_v46  ;;  %v2421_v48 = vld [vmem:[%s6358_s27 + $0x30] sm:$0xf] }
 0x1ab   : > { %v1784_v23 = vld [vmem:[%s6358_s27 + $0x10] sm:$0xf] }
 0x1ac   : > { %2663 = vrot.lane.b32.xlu2 %v2525_v39, %s6279_s28  ;;  %v2534_v39 = vsel %vm6623_vm7, %v2532_v28, %v2533_v35  ;;  %v3252_v52 = vrot.slane %v3251_v44, 4  ;;  %v1842_v29 = vshll.u32 %v1784_v23, 16 }
 0x1ad   : > { %2951 = vrot.lane.b32.xlu1 %v2851_v37, %s6280_s29  ;;  %5862 = vmatmul.msk.bf16.gmra.mxu2 %vm4799_vm9, %v5568_v25  ;;  %v3995_v37 = vrot.slane %v3993_v1, 4  ;;  %v7328_v25 = vld [vmem:[%s6358_s27 + $0x58] sm:$0xf] }
 0x1ae   : > { %2665 = vrot.lane.b32.xlu0 %v2528_v42, %s6279_s28  ;;  %v1625_v57 = vpop.permute.xlu2 %1624  ;;  %v3261_v42 = vor.u32 %v3260_v19, %v7266_v18  ;;  %v3257_v59 = vsel %vm6368_vm2, %v3252_v52, %v7266_v18  ;;  %v3278_v18 = vshrl.u32 %v3144_v2, 16  ;;  %v5971_v19 = vld [vmem:[%s9186_s1 + $0x78] sm:$0xff]  ;;  %v1844_v40 = vrot.slane %v1842_v29, 5 }
 0x1af   : > { %v1611_v50 = vpop.permute.xlu1 %1610  ;;  %1752 = vst.msk [vmem:[#allocation2 + $0xcc] sm:$0xf] %vm1734_vm10, %v1625_v57  ;;  %v3997_v45 = vsel %vm6623_vm7, %v3995_v37, %v3996_v30  ;;  %v2536_v57 = vrot.slane %v2421_v48, 5  ;;  %v5894_v62 = vld [vmem:[#allocation2 + $0x50] sm:$0xf0]  ;;  %5001 = vmatpush.bf16.msra.mxu1 %v5971_v19  ;;  %6125 = vmatpush.bf16.msrb.mxu3 %v5971_v19 }
 0x1b0   : > { %1745 = vst.msk [vmem:[#allocation2 + $0x78] sm:$0xf] %vm1734_vm10, %v1611_v50  ;;  %v1609_v53 = vpop.permute.xlu0 %1608  ;;  %v3262_v49 = vrot.slane %v3261_v42, 4  ;;  %v3266_v50 = vrot.slane %v3264_v43, 5  ;;  %v5535_v61 = vld [vmem:[#allocation2 + $0x48] sm:$0xf] }
 0x1b1   : > { %1744 = vst.msk [vmem:[#allocation2 + $0x6c] sm:$0xf] %vm1734_vm10, %v1609_v53  ;;  %v5904_v63 = vld [vmem:[#allocation2 + $0xa0] sm:$0xf0]  ;;  %v2537_v17 = vsel %vm6623_vm7, %v2535_v6, %v2536_v57  ;;  %v3280_v37 = vrot.slane %v3278_v18, 4 }
 0x1b2   : > { %4163 = vst.msk [vmem:[#allocation2 + $0x98] sm:$0xf] %vm277_vm3, %v3997_v45  ;;  %v3267_v58 = vsel %vm6368_vm2, %v3262_v49, %v3266_v50  ;;  %v2856_v43 = vld [vmem:[%s6358_s27 + $0x3c] sm:$0xf]  ;;  %v5969_v45 = vld [vmem:[%s9186_s1 + $0x68] sm:$0xff] }
 0x1b3   : > { %4885 = vmatmul.bf16.gmra.mxu0 %v5512_v55  ;;  %v3268_v55 = vshrl.u32 %v3143_v22, 16  ;;  %v1535_v22 = vld [vmem:[%s6358_s27 + $0xb0] sm:$0xf]  ;;  %v7352_v49 = vld [vmem:[%s6358_s27 + $0x40] sm:$0xf] }
 0x1b4   : > { %2953 = vrot.lane.b32.xlu2 %v2852_v0, %s6280_s29  ;;  %v2538_v0 = vrot.slane %v2536_v57, 4  ;;  %v2855_v48 = vld [vmem:[%s6358_s27 + $0x38] sm:$0xf]  ;;  %v7384_v18 = vld [vmem:[%s6358_s27 + $0x60] sm:$0xf] }
 0x1b5   : > { %3678 = vrot.lane.b32.xlu1 %v3247_v56, %s6281_s30  ;;  %v7300_v56 = vld [vmem:[%s6358_s27 + $0x34] sm:$0xf]  ;;  %v3270_v3 = vrot.slane %v3268_v55, 4  ;;  %v7369_v2 = vld [vmem:[%s6358_s27 + $0x38] sm:$0xf] }
 0x1b6   : > { %3676 = vrot.lane.b32.xlu0 %v3237_v60, %s6281_s30  ;;  %v1631_v8 = vpop.permute.xlu2 %1630  ;;  %v2539_v1 = vrot.slane %v7300_v56, 5  ;;  %v1786_v29 = vld [vmem:[%s6358_s27 + $0x18] sm:$0xf]  ;;  %v5965_v56 = vld [vmem:[%s9186_s1 + $0x48] sm:$0xff] }
 0x1b7   : > { %v1617_v5 = vpop.permute.xlu1 %1616  ;;  %1755 = vst.msk [vmem:[#allocation2 + $0xf0] sm:$0xf] %vm1734_vm10, %v1631_v8  ;;  %v3271_v13 = vor.u32 %v3270_v3, %v3266_v50 }
 0x1b8   : > { %1748 = vst.msk [vmem:[#allocation2 + $0x9c] sm:$0xf] %vm1734_vm10, %v1617_v5  ;;  %v1615_v7 = vpop.permute.xlu0 %1614 }
 0x1b9   : > { %1747 = vst.msk [vmem:[#allocation2 + $0x90] sm:$0xf] %vm1734_vm10, %v1615_v7  ;;  %v5579_v60 = vld [vmem:[#allocation2 + $0x98] sm:$0xf]  ;;  %v3875_v7 = vld [vmem:[%s6358_s27 + $0x54] sm:$0xf] }
 0x1ba   : > { %v5580_v4 = vor.u32 %v5904_v63, %v5579_v60  ;;  %v4002_v16 = vrot.slane %v3875_v7, 5  ;;  %v3272_v30 = vrot.slane %v3271_v13, 4  ;;  %v5897_v60 = vld [vmem:[#allocation2 + $0x68] sm:$0xf0]  ;;  %v1537_v7 = vld [vmem:[%s6358_s27 + $0xb8] sm:$0xf] }
 0x1bb   : > { %v1536_v13 = vld [vmem:[%s6358_s27 + $0xb4] sm:$0xf] }
 0x1bc   : > { %1666 = vrot.lane.b32.xlu2 %v1532_v14, %s6281_s30  ;;  %v1783_v14 = vld [vmem:[%s6358_s27 + $0xc] sm:$0xf]  ;;  %v4003_v26 = vsel %vm6623_vm7, %v4001_v15, %v4002_v16  ;;  %v4004_v34 = vrot.slane %v4002_v16, 4 }
 0x1bd   : > { %2667 = vrot.lane.b32.xlu1 %v2531_v9, %s6279_s28  ;;  %v5536_v9 = vor.u32 %v5894_v62, %v5535_v61  ;;  %5863 = vmatmul.msk.bf16.gmra.mxu2 %vm4799_vm9, %v5580_v4  ;;  %v1833_v20 = vshrl.u32 %v1783_v14, 16  ;;  %4165 = vst.msk [vmem:[#allocation2 + $0xb0] sm:$0xf] %vm277_vm3, %v4003_v26  ;;  %v5968_v61 = vld [vmem:[%s9186_s1 + $0x60] sm:$0xff]  ;;  %v5967_v26 = vld [vmem:[%s9186_s1 + $0x58] sm:$0xff] }
 0x1be   : > { %1668 = vrot.lane.b32.xlu0 %v1533_v12, %s6281_s30  ;;  %v1637_v33 = vpop.permute.xlu2 %1636  ;;  %v2540_v12 = vsel %vm6623_vm7, %v2538_v0, %v2539_v1 }
 0x1bf   : > { %v1623_v21 = vpop.permute.xlu1 %1622  ;;  %1758 = vst.msk [vmem:[#allocation2 + $0x114] sm:$0xf] %vm1734_vm10, %v1637_v33  ;;  %v1846_v33 = vshrl.u32 %v1784_v23, 16  ;;  %v3288_v23 = vshrl.u32 %v7352_v49, 16 }
 0x1c0   : > { %1751 = vst.msk [vmem:[#allocation2 + $0xc0] sm:$0xf] %vm1734_vm10, %v1623_v21  ;;  %v1621_v27 = vpop.permute.xlu0 %1620  ;;  %v1836_v21 = vshll.u32 %v1783_v14, 16  ;;  %v7379_v14 = vld [vmem:[%s6358_s27 + $0x3c] sm:$0xf] }
 0x1c1   : > { %1750 = vst.msk [vmem:[#allocation2 + $0xb4] sm:$0xf] %vm1734_vm10, %v1621_v27  ;;  %v1835_v27 = vrot.slane %v1833_v20, 4  ;;  %v1848_v50 = vrot.slane %v1846_v33, 4 }
 0x1c2   : > { %v1838_v28 = vrot.slane %v1836_v21, 5 }
 0x1c3   : > { %4890 = vmatmul.bf16.gmra.mxu0 %v5524_v31  ;;  %v3276_v31 = vrot.slane %v3274_v10, 5  ;;  %v1849_v55 = vor.u32 %v1848_v50, %v1844_v40 }
 0x1c4   : > { %2669 = vrot.lane.b32.xlu2 %v2534_v39, %s6279_s28  ;;  %v1839_v38 = vor.u32 %v1838_v28, %v1835_v27 }
 0x1c5   : > { %2957 = vrot.lane.b32.xlu1 %v2854_v32, %s6280_s29  ;;  %v5970_v32 = vld [vmem:[%s9186_s1 + $0x70] sm:$0xff]  ;;  %v1850_v62 = vrot.slane %v1849_v55, 4  ;;  %v1787_v55 = vld [vmem:[%s6358_s27 + $0x1c] sm:$0xf] }
 0x1c6   : > { %2955 = vrot.lane.b32.xlu0 %v2853_v41, %s6280_s29  ;;  %v1643_v53 = vpop.permute.xlu2 %1642  ;;  %v4005_v41 = vrot.slane %v7328_v25, 5  ;;  %5002 = vmatpush.bf16.msra.mxu1 %v5970_v32  ;;  %v1840_v44 = vrot.slane %v1839_v38, 4  ;;  %v7408_v38 = vld [vmem:[%s6358_s27 + $0x48] sm:$0xf] }
 0x1c7   : > { %v1629_v47 = vpop.permute.xlu1 %1628  ;;  %1761 = vst.msk [vmem:[#allocation2 + $0x138] sm:$0xf] %vm1734_vm10, %v1643_v53  ;;  %6126 = vmatpush.bf16.msrb.mxu3 %v5970_v32  ;;  %v1785_v53 = vld [vmem:[%s6358_s27 + $0x14] sm:$0xf] }
 0x1c8   : > { %1754 = vst.msk [vmem:[#allocation2 + $0xe4] sm:$0xf] %vm1734_vm10, %v1629_v47  ;;  %v1627_v51 = vpop.permute.xlu0 %1626  ;;  %v4006_v46 = vsel %vm6623_vm7, %v4004_v34, %v4005_v41  ;;  %v3277_v47 = vsel %vm6368_vm2, %v3272_v30, %v3276_v31  ;;  %v1845_v52 = vsel %vm6368_vm2, %v1840_v44, %v1844_v40  ;;  %v1852_v57 = vshll.u32 %v1785_v53, 16  ;;  %v5966_v40 = vld [vmem:[%s9186_s1 + $0x50] sm:$0xff] }
 0x1c9   : > { %1753 = vst.msk [vmem:[#allocation2 + $0xd8] sm:$0xf] %vm1734_vm10, %v1627_v51  ;;  %v3281_v51 = vor.u32 %v3280_v37, %v3276_v31  ;;  %v1856_v10 = vshrl.u32 %v1785_v53, 16  ;;  %v4007_v20 = vrot.slane %v4005_v41, 4  ;;  %v4011_v31 = vrot.slane %v7384_v18, 5 }
 0x1ca   : > { %4166 = vst.msk [vmem:[#allocation2 + $0xbc] sm:$0xf] %vm277_vm3, %v4006_v46  ;;  %5003 = vmatpush.bf16.msra.mxu1 %v5969_v45  ;;  %v1854_v63 = vrot.slane %v1852_v57, 5  ;;  %v2545_v37 = vrot.slane %v7379_v14, 5  ;;  %v2857_v53 = vld [vmem:[%s6358_s27 + $0x40] sm:$0xf] }
 0x1cb   : > { %2364 = vst.msk [vmem:[#allocation2 + $0x4] sm:$0xf] %vm277_vm3, %v1845_v52  ;;  %6127 = vmatpush.bf16.msrb.mxu3 %v5969_v45  ;;  %v3282_v3 = vrot.slane %v3281_v51, 4  ;;  %v1858_v27 = vrot.slane %v1856_v10, 4 }
 0x1cc   : > { %3680 = vrot.lane.b32.xlu2 %v3257_v59, %s6281_s30  ;;  %v5547_v59 = vld [vmem:[#allocation2 + $0x60] sm:$0xf] }
 0x1cd   : > { %1670 = vrot.lane.b32.xlu1 %v1534_v54, %s6281_s30  ;;  %v3146_v54 = vld [vmem:[%s6358_s27 + $0x44] sm:$0xf]  ;;  %v1859_v34 = vor.u32 %v1858_v27, %v1854_v63 }
 0x1ce   : > { %3682 = vrot.lane.b32.xlu0 %v3267_v58, %s6281_s30  ;;  %v1649_v11 = vpop.permute.xlu2 %1648  ;;  %v3284_v58 = vshll.u32 %v7352_v49, 16  ;;  %v3294_v4 = vshll.u32 %v3146_v54, 16  ;;  %5004 = vmatpush.bf16.msra.mxu1 %v5968_v61  ;;  %v1866_v49 = vshrl.u32 %v1786_v29, 16 }
 0x1cf   : > { %v1635_v5 = vpop.permute.xlu1 %1634  ;;  %1764 = vst.msk [vmem:[#allocation2 + $0x15c] sm:$0xf] %vm1734_vm10, %v1649_v11  ;;  %6128 = vmatpush.bf16.msrb.mxu3 %v5968_v61  ;;  %v1860_v44 = vrot.slane %v1859_v34, 4  ;;  %v5900_v61 = vld [vmem:[#allocation2 + $0x80] sm:$0xf0] }
 0x1d0   : > { %1757 = vst.msk [vmem:[#allocation2 + $0x108] sm:$0xf] %vm1734_vm10, %v1635_v5  ;;  %v1633_v8 = vpop.permute.xlu0 %1632  ;;  %v3877_v5 = vld [vmem:[%s6358_s27 + $0x5c] sm:$0xf]  ;;  %v7381_v16 = vrot.slane %v3284_v58, 5  ;;  %v7401_v32 = vrot.slane %v3294_v4, 5 }
 0x1d1   : > { %1756 = vst.msk [vmem:[#allocation2 + $0xfc] sm:$0xf] %vm1734_vm10, %v1633_v8  ;;  %v5591_v8 = vld [vmem:[#allocation2 + $0xb0] sm:$0xf]  ;;  %v4008_v11 = vrot.slane %v3877_v5, 5  ;;  %v1868_v58 = vrot.slane %v1866_v49, 4 }
 0x1d2   : > { %v5907_v19 = vld [vmem:[#allocation2 + $0xb8] sm:$0xf0]  ;;  %v3287_v28 = vsel %vm6368_vm2, %v3282_v3, %v7381_v16  ;;  %5005 = vmatpush.bf16.msra.mxu1 %v5967_v26  ;;  %v5964_v3 = vld [vmem:[%s9186_s1 + $0x40] sm:$0xff]  ;;  %v3148_v34 = vld [vmem:[%s6358_s27 + $0x4c] sm:$0xf] }
 0x1d3   : > { %4895 = vmatmul.bf16.gmra.mxu0 %v5536_v9  ;;  %v1855_v9 = vsel %vm6368_vm2, %v1850_v62, %v1854_v63  ;;  %v4010_v21 = vrot.slane %v4008_v11, 4  ;;  %v5592_v25 = vor.u32 %v5907_v19, %v5591_v8  ;;  %v4009_v30 = vsel %vm6623_vm7, %v4007_v20, %v4008_v11  ;;  %6129 = vmatpush.bf16.msrb.mxu3 %v5967_v26  ;;  %v3879_v8 = vld [vmem:[%s6358_s27 + $0x64] sm:$0xf]  ;;  %v2425_v26 = vld [vmem:[%s6358_s27 + $0x40] sm:$0xf] }
 0x1d4   : > { %1672 = vrot.lane.b32.xlu2 %v1535_v22, %s6281_s30  ;;  %v2542_v22 = vrot.slane %v7369_v2, 5  ;;  %2365 = vst.msk [vmem:[#allocation2 + $0x10] sm:$0xf] %vm277_vm3, %v1855_v9  ;;  %v1876_v11 = vshrl.u32 %v1787_v55, 16 }
 0x1d5   : > { %2673 = vrot.lane.b32.xlu1 %v2540_v12, %s6279_s28  ;;  %v5548_v12 = vor.u32 %v5897_v60, %v5547_v59  ;;  %5864 = vmatmul.msk.bf16.gmra.mxu2 %vm4799_vm9, %v5592_v25  ;;  %4167 = vst.msk [vmem:[#allocation2 + $0xc8] sm:$0xf] %vm277_vm3, %v4009_v30  ;;  %v4012_v41 = vsel %vm6623_vm7, %v4010_v21, %v4011_v31  ;;  %v1872_v59 = vshll.u32 %v1787_v55, 16  ;;  %v5559_v60 = vld [vmem:[#allocation2 + $0x78] sm:$0xf]  ;;  %v7462_v21 = vpop.f32.mrf.mxu2 }
 0x1d6   : > { %2671 = vrot.lane.b32.xlu0 %v2537_v17, %s6279_s28  ;;  %v1655_v39 = vpop.permute.xlu2 %1654  ;;  %v3298_v17 = vshrl.u32 %v3146_v54, 16  ;;  %4168 = vst.msk [vmem:[#allocation2 + $0xd4] sm:$0xf] %vm277_vm3, %v4012_v41  ;;  %5006 = vmatpush.bf16.msra.mxu1 %v5966_v40  ;;  %v1878_v27 = vrot.slane %v1876_v11, 4  ;;  %v1788_v30 = vld [vmem:[%s6358_s27 + $0x20] sm:$0xf] }
 0x1d7   : > { %v1641_v35 = vpop.permute.xlu1 %1640  ;;  %1767 = vst.msk [vmem:[#allocation2 + $0x180] sm:$0xf] %vm1734_vm10, %v1655_v39  ;;  %v3290_v39 = vrot.slane %v3288_v23, 4  ;;  %6130 = vmatpush.bf16.msrb.mxu3 %v5966_v40  ;;  %v1874_v5 = vrot.slane %v1872_v59, 5  ;;  %v1886_v40 = vshrl.u32 %v1788_v30, 16 }
 0x1d8   : > { %1760 = vst.msk [vmem:[#allocation2 + $0x12c] sm:$0xf] %vm1734_vm10, %v1641_v35  ;;  %v1639_v42 = vpop.permute.xlu0 %1638  ;;  %v3300_v33 = vrot.slane %v3298_v17, 4  ;;  %v1862_v35 = vshll.u32 %v1786_v29, 16  ;;  %v7455_v17 = vld [vmem:[%s6358_s27 + $0x68] sm:$0xf] }
 0x1d9   : > { %1759 = vst.msk [vmem:[#allocation2 + $0x120] sm:$0xf] %vm1734_vm10, %v1639_v42  ;;  %v3291_v54 = vor.u32 %v3290_v39, %v7381_v16  ;;  %v2858_v29 = vld [vmem:[%s6358_s27 + $0x44] sm:$0xf]  ;;  %v5571_v55 = vld [vmem:[#allocation2 + $0x90] sm:$0xf] }
 0x1da   : > { %v1864_v45 = vrot.slane %v1862_v35, 5  ;;  %v3301_v50 = vor.u32 %v3300_v33, %v7401_v32  ;;  %5007 = vmatpush.bf16.msra.mxu1 %v5965_v56  ;;  %v2548_v33 = vrot.slane %v2425_v26, 5  ;;  %v1882_v35 = vshll.u32 %v1788_v30, 16  ;;  %v7514_v59 = vld [vmem:[%s6358_s27 + $0x50] sm:$0xf] }
 0x1db   : > { %6131 = vmatpush.bf16.msrb.mxu3 %v5965_v56  ;;  %v1538_v56 = vld [vmem:[%s6358_s27 + $0xbc] sm:$0xf] }
 0x1dc   : > { %2959 = vrot.lane.b32.xlu2 %v2855_v48, %s6280_s29  ;;  %v3304_v48 = vshll.u32 %v7408_v38, 16  ;;  %v1865_v52 = vsel %vm6368_vm2, %v1860_v44, %v1864_v45  ;;  %v3302_v62 = vrot.slane %v3301_v50, 4  ;;  %v1869_v4 = vor.u32 %v1868_v58, %v1864_v45  ;;  %v7510_v58 = vld [vmem:[%s6358_s27 + $0x44] sm:$0xf] }
 0x1dd   : > { %3684 = vrot.lane.b32.xlu1 %v3277_v47, %s6281_s30  ;;  %v2541_v47 = vrot.slane %v2539_v1, 4  ;;  %2366 = vst.msk [vmem:[#allocation2 + $0x1c] sm:$0xf] %vm277_vm3, %v1865_v52  ;;  %v5910_v2 = vld [vmem:[#allocation2 + $0xd0] sm:$0xf0]  ;;  %v3314_v44 = vshll.u32 %v3148_v34, 16  ;;  %v7497_v49 = vpop.f32.mrf.mxu2 }
 0x1de   : > { %2961 = vrot.lane.b32.xlu0 %v2856_v43, %s6280_s29  ;;  %v1661_v15 = vpop.permute.xlu2 %1660  ;;  %v2544_v43 = vrot.slane %v2542_v22, 4  ;;  %v7442_v63 = vrot.slane %v3304_v48, 5  ;;  %v1870_v10 = vrot.slane %v1869_v4, 4  ;;  %5008 = vmatpush.bf16.msra.mxu1 %v5964_v3  ;;  %v1888_v50 = vrot.slane %v1886_v40, 4 }
 0x1df   : > { %v1647_v0 = vpop.permute.xlu1 %1646  ;;  %1770 = vst.msk [vmem:[#allocation2 + $0x1a4] sm:$0xf] %vm1734_vm10, %v1661_v15  ;;  %v2543_v57 = vsel %vm6623_vm7, %v2541_v47, %v2542_v22  ;;  %v4013_v22 = vrot.slane %v4011_v31, 4  ;;  %6132 = vmatpush.bf16.msrb.mxu3 %v5964_v3  ;;  %v2547_v31 = vrot.slane %v2545_v37, 4  ;;  %v3318_v48 = vshrl.u32 %v3148_v34, 16 }
 0x1e0   : > { %1763 = vst.msk [vmem:[#allocation2 + $0x150] sm:$0xf] %vm1734_vm10, %v1647_v0  ;;  %v1645_v6 = vpop.permute.xlu0 %1644  ;;  %v2546_v1 = vsel %vm6623_vm7, %v2544_v43, %v2545_v37  ;;  %v5603_v0 = vld [vmem:[#allocation2 + $0xc8] sm:$0xf]  ;;  %v3307_v19 = vsel %vm6368_vm2, %v3302_v62, %v7442_v63  ;;  %v1875_v20 = vsel %vm6368_vm2, %v1870_v10, %v1874_v5  ;;  %v1884_v43 = vrot.slane %v1882_v35, 5 }
 0x1e1   : > { %1762 = vst.msk [vmem:[#allocation2 + $0x144] sm:$0xf] %vm1734_vm10, %v1645_v6  ;;  %v5604_v16 = vor.u32 %v5910_v2, %v5603_v0  ;;  %v2549_v45 = vsel %vm6623_vm7, %v2547_v31, %v2548_v33  ;;  %v3308_v52 = vshrl.u32 %v7408_v38, 16  ;;  %v3320_v3 = vrot.slane %v3318_v48, 4  ;;  %v6197_v31 = vld [vmem:[%s9186_s1 + $0x88] sm:$0xff] }
 0x1e2   : > { %2367 = vst.msk [vmem:[#allocation2 + $0x28] sm:$0xf] %vm277_vm3, %v1875_v20  ;;  %v2550_v4 = vrot.slane %v2548_v33, 4  ;;  %v2860_v20 = vld [vmem:[%s6358_s27 + $0x4c] sm:$0xf] }
 0x1e3   : > { %4900 = vmatmul.bf16.gmra.mxu0 %v5548_v12  ;;  %v4014_v12 = vrot.slane %v3879_v8, 5  ;;  %v3310_v8 = vrot.slane %v3308_v52, 4  ;;  %v7581_v48 = vld [vmem:[%s6358_s27 + $0x4c] sm:$0xf] }
 0x1e4   : > { %3686 = vrot.lane.b32.xlu2 %v3287_v28, %s6281_s30  ;;  %v4017_v28 = vrot.slane %v7455_v17, 5 }
 0x1e5   : > { %1676 = vrot.lane.b32.xlu1 %v1537_v7, %s6281_s30  ;;  %v3292_v7 = vrot.slane %v3291_v54, 4  ;;  %v4016_v23 = vrot.slane %v4014_v12, 4  ;;  %v4015_v18 = vsel %vm6623_vm7, %v4013_v22, %v4014_v12  ;;  %5865 = vmatmul.msk.bf16.gmra.mxu2 %vm4799_vm9, %v5604_v16  ;;  %v2551_v22 = vrot.slane %v7510_v58, 5 }
 0x1e6   : > { %1674 = vrot.lane.b32.xlu0 %v1536_v13, %s6281_s30  ;;  %v2656_v51 = vpop.permute.xlu2 %2655  ;;  %v5560_v13 = vor.u32 %v5900_v61, %v5559_v60  ;;  %4169 = vst.msk [vmem:[#allocation2 + $0xe0] sm:$0xf] %vm277_vm3, %v4015_v18  ;;  %v3311_v18 = vor.u32 %v3310_v8, %v7442_v63  ;;  %v7556_v63 = vld [vmem:[%s6358_s27 + $0x48] sm:$0xf] }
 0x1e7   : > { %v1653_v42 = vpop.permute.xlu1 %1652  ;;  %2799 = vst.msk [vmem:[#allocation2 + $0x4] sm:$0xf] %vm1006_vm4, %v2656_v51  ;;  %v3297_v25 = vsel %vm6368_vm2, %v3292_v7, %v7401_v32  ;;  %v1879_v32 = vor.u32 %v1878_v27, %v1874_v5  ;;  %v4018_v41 = vsel %vm6623_vm7, %v4016_v23, %v4017_v28  ;;  %v7501_v51 = vld [vmem:[%s6358_s27 + $0x24] sm:$0xf]  ;;  %v3881_v5 = vld [vmem:[%s6358_s27 + $0x6c] sm:$0xf] }
 0x1e8   : > { %1766 = vst.msk [vmem:[#allocation2 + $0x174] sm:$0xf] %vm1734_vm10, %v1653_v42  ;;  %v1651_v46 = vpop.permute.xlu0 %1650  ;;  %v1892_v54 = vshll.u32 %v7501_v51, 16  ;;  %v4020_v10 = vrot.slane %v3881_v5, 5  ;;  %v4019_v23 = vrot.slane %v4017_v28, 4  ;;  %v3324_v27 = vshll.u32 %v7514_v59, 16 }
 0x1e9   : > { %1765 = vst.msk [vmem:[#allocation2 + $0x168] sm:$0xf] %vm1734_vm10, %v1651_v46  ;;  %v1880_v14 = vrot.slane %v1879_v32, 4  ;;  %v1539_v46 = vld [vmem:[%s6358_s27 + $0xc0] sm:$0xf]  ;;  %v1896_v40 = vshrl.u32 %v7501_v51, 16 }
 0x1ea   : > { %4170 = vst.msk [vmem:[#allocation2 + $0xec] sm:$0xf] %vm277_vm3, %v4018_v41  ;;  %v7516_v62 = vrot.slane %v1892_v54, 5  ;;  %v4022_v30 = vrot.slane %v4020_v10, 4  ;;  %v4021_v17 = vsel %vm6623_vm7, %v4019_v23, %v4020_v10  ;;  %v7562_v35 = vrot.slane %v3324_v27, 5 }
 0x1eb   : > { %v1885_v47 = vsel %vm6368_vm2, %v1880_v14, %v1884_v43  ;;  %4171 = vst.msk [vmem:[#allocation2 + $0xf8] sm:$0xf] %vm277_vm3, %v4021_v17  ;;  %v1790_v14 = vld [vmem:[%s6358_s27 + $0x28] sm:$0xf]  ;;  %v1898_v52 = vrot.slane %v1896_v40, 4  ;;  %v2553_v58 = vrot.slane %v2551_v22, 4 }
 0x1ec   : > { %2675 = vrot.lane.b32.xlu2 %v2543_v57, %s6279_s28  ;;  %2368 = vst.msk [vmem:[#allocation2 + $0x34] sm:$0xf] %vm277_vm3, %v1885_v47  ;;  %v7507_v57 = vrot.slane %v3314_v44, 5  ;;  %v1906_v47 = vshrl.u32 %v1790_v14, 16  ;;  %v1541_v17 = vld [vmem:[%s6358_s27 + $0xc8] sm:$0xf] }
 0x1ed   : > { %2963 = vrot.lane.b32.xlu1 %v2857_v53, %s6280_s29  ;;  %v5903_v53 = vld [vmem:[#allocation2 + $0x98] sm:$0xf0]  ;;  %v5615_v60 = vld [vmem:[#allocation2 + $0xe0] sm:$0xf] }
 0x1ee   : > { %2677 = vrot.lane.b32.xlu0 %v2546_v1, %s6279_s28  ;;  %v7452_v15 = vpop.permute.xlu2 %2945  ;;  %v1889_v1 = vor.u32 %v1888_v50, %v1884_v43  ;;  %v5572_v11 = vor.u32 %v5903_v53, %v5571_v55  ;;  %v3321_v26 = vor.u32 %v3320_v3, %v7507_v57  ;;  %v1540_v43 = vld [vmem:[%s6358_s27 + $0xc4] sm:$0xf]  ;;  %v1908_v54 = vrot.slane %v1906_v47, 4  ;;  %v5906_v55 = vld [vmem:[#allocation2 + $0xb0] sm:$0xf0] }
 0x1ef   : > { %v1659_v6 = vpop.permute.xlu1 %1658  ;;  %v2449_v40 = vld [vmem:[%s6358_s27 + $0xa0] sm:$0xf]  ;;  %v7642_v47 = vld [vmem:[%s6358_s27 + $0x58] sm:$0xf] }
 0x1f0   : > { %1769 = vst.msk [vmem:[#allocation2 + $0x198] sm:$0xf] %vm1734_vm10, %v1659_v6  ;;  %v1657_v9 = vpop.permute.xlu0 %1656  ;;  %v1890_v38 = vrot.slane %v1889_v1, 4  ;;  %v3322_v34 = vrot.slane %v3321_v26, 4 }
 0x1f1   : > { %1768 = vst.msk [vmem:[#allocation2 + $0x18c] sm:$0xf] %vm1734_vm10, %v1657_v9  ;;  %v5913_v61 = vld [vmem:[#allocation2 + $0xe8] sm:$0xf0] }
 0x1f2   : > { %v1895_v9 = vsel %vm6368_vm2, %v1890_v38, %v7516_v62  ;;  %v5616_v16 = vor.u32 %v5913_v61, %v5615_v60  ;;  %v3327_v50 = vsel %vm6368_vm2, %v3322_v34, %v7562_v35  ;;  %v1899_v61 = vor.u32 %v1898_v52, %v7516_v62  ;;  %v5583_v38 = vld [vmem:[#allocation2 + $0xa8] sm:$0xf]  ;;  %v7629_v34 = vld [vmem:[%s6358_s27 + $0x9c] sm:$0xf]  ;;  %v2862_v52 = vld [vmem:[%s6358_s27 + $0x54] sm:$0xf] }
 0x1f3   : > { %4905 = vmatmul.bf16.gmra.mxu0 %v5560_v13  ;;  %2369 = vst.msk [vmem:[#allocation2 + $0x40] sm:$0xf] %vm277_vm3, %v1895_v9 }
 0x1f4   : > { %2965 = vrot.lane.b32.xlu2 %v2858_v29, %s6280_s29  ;;  %v7540_v29 = vpop.f32.mrf.mxu2  ;;  %v1900_v9 = vrot.slane %v1899_v61, 4  ;;  %v3344_v61 = vshll.u32 %v7642_v47, 16 }
 0x1f5   : > { %3690 = vrot.lane.b32.xlu1 %v3307_v19, %s6281_s30  ;;  %v7528_v19 = vld [vmem:[%s6358_s27 + $0x70] sm:$0xf]  ;;  %5866 = vmatmul.msk.bf16.gmra.mxu2 %vm4799_vm9, %v5616_v16 }
 0x1f6   : > { %3688 = vrot.lane.b32.xlu0 %v3297_v25, %s6281_s30  ;;  %v2660_v39 = vpop.permute.xlu2 %2659  ;;  %v2859_v25 = vld [vmem:[%s6358_s27 + $0x48] sm:$0xf]  ;;  %v4023_v28 = vrot.slane %v7528_v19, 5 }
 0x1f7   : > { %v1665_v42 = vpop.permute.xlu1 %1664  ;;  %2801 = vst.msk [vmem:[#allocation2 + $0x1c] sm:$0xf] %vm1006_vm4, %v2660_v39  ;;  %v2554_v39 = vrot.slane %v7556_v63, 5  ;;  %v3883_v63 = vld [vmem:[%s6358_s27 + $0x74] sm:$0xf] }
 0x1f8   : > { %1772 = vst.msk [vmem:[#allocation2 + $0x1bc] sm:$0xf] %vm1734_vm10, %v1665_v42  ;;  %v1663_v37 = vpop.permute.xlu0 %1662  ;;  %v4024_v32 = vsel %vm6623_vm7, %v4022_v30, %v4023_v28  ;;  %v3312_v42 = vrot.slane %v3311_v18, 4 }
 0x1f9   : > { %1771 = vst.msk [vmem:[#allocation2 + $0x1b0] sm:$0xf] %vm1734_vm10, %v1663_v37  ;;  %v6198_v37 = vld [vmem:[%s9186_s1 + $0x80] sm:$0xff] }
 0x1fa   : > { %4172 = vst.msk [vmem:[#allocation2 + $0x104] sm:$0xf] %vm277_vm3, %v4024_v32  ;;  %v3317_v53 = vsel %vm6368_vm2, %v3312_v42, %v7507_v57  ;;  %v4026_v42 = vrot.slane %v3883_v63, 5 }
 0x1fc   : > { %1678 = vrot.lane.b32.xlu2 %v1538_v56, %s6281_s30  ;;  %v7583_v51 = vpop.f32.mrf.mxu2  ;;  %v7589_v56 = vld [vmem:[%s6358_s27 + $0x2c] sm:$0xf] }
 0x1fd   : > { %2679 = vrot.lane.b32.xlu1 %v2549_v45, %s6279_s28  ;;  %v3328_v45 = vshrl.u32 %v7514_v59, 16  ;;  %v2556_v59 = vrot.slane %v2554_v39, 4  ;;  %v1912_v60 = vshll.u32 %v7589_v56, 16 }
 0x1fe   : > { %1680 = vrot.lane.b32.xlu0 %v1539_v46, %s6281_s30  ;;  %v7525_v13 = vpop.permute.xlu2 %2949  ;;  %v1902_v46 = vshll.u32 %v1790_v14, 16 }
 0x1ff   : > { %v2944_v0 = vpop.permute.xlu1 %2943  ;;  %v5939_v2 = vld [vmem:[#allocation2 + $0x1b8] sm:$0xf0]  ;;  %v3330_v57 = vrot.slane %v3328_v45, 4  ;;  %v7598_v8 = vrot.slane %v1912_v60, 5 }
 0x200   : > { %3087 = vst.msk [vmem:[#allocation2 + $0x4] sm:$0xf] %vm1445_vm8, %v2944_v0  ;;  %v2658_v6 = vpop.permute.xlu0 %2657  ;;  %v5715_v7 = vld [vmem:[#allocation2 + $0x1b0] sm:$0xf]  ;;  %v1904_v1 = vrot.slane %v1902_v46, 5  ;;  %v2557_v0 = vrot.slane %v7581_v48, 5 }
 0x201   : > { %2800 = vst.msk [vmem:[#allocation2 + $0x10] sm:$0xf] %vm1006_vm4, %v2658_v6  ;;  %v5716_v12 = vor.u32 %v5939_v2, %v5715_v7  ;;  %v5627_v2 = vld [vmem:[#allocation2 + $0xf8] sm:$0xf]  ;;  %v5916_v3 = vld [vmem:[#allocation2 + $0x100] sm:$0xf0]  ;;  %v3331_v26 = vor.u32 %v3330_v57, %v7562_v35 }
 0x202   : > { %3088 = vst.msk [vmem:[#allocation2 + $0x10] sm:$0xf] %vm1445_vm8, %v7452_v15  ;;  %v2552_v15 = vsel %vm6623_vm7, %v2550_v4, %v2551_v22  ;;  %v1909_v4 = vor.u32 %v1908_v54, %v1904_v1  ;;  %v3150_v7 = vld [vmem:[%s6358_s27 + $0x54] sm:$0xf]  ;;  %v5628_v22 = vor.u32 %v5916_v3, %v5627_v2  ;;  %v1905_v23 = vsel %vm6368_vm2, %v1900_v9, %v1904_v1  ;;  %v7652_v54 = vld [vmem:[%s6358_s27 + $0xa4] sm:$0xf] }
 0x203   : > { %4910 = vmatmul.bf16.gmra.mxu0 %v5572_v11  ;;  %4970 = vmatmul.bf16.vlgmr.msra.gmra.mxu3 %v5716_v12  ;;  %v5584_v12 = vor.u32 %v5906_v55, %v5583_v38  ;;  %v3334_v27 = vshll.u32 %v3150_v7, 16  ;;  %v3338_v18 = vshrl.u32 %v3150_v7, 16  ;;  %2370 = vst.msk [vmem:[#allocation2 + $0x4c] sm:$0xf] %vm277_vm3, %v1905_v23  ;;  %v3332_v32 = vrot.slane %v3331_v26, 4 }
 0x204   : > { %6133 = vmatpush.bf16.msra.mxu3 %v6197_v31  ;;  %2681 = vrot.lane.b32.xlu2 %v2552_v15, %s6279_s28  ;;  %v1910_v11 = vrot.slane %v1909_v4, 4  ;;  %v2555_v15 = vsel %vm6623_vm7, %v2553_v58, %v2554_v39  ;;  %v3171_v31 = vld [vmem:[%s6358_s27 + $0xa8] sm:$0xf]  ;;  %v4025_v39 = vrot.slane %v4023_v28, 4  ;;  %v2620_v1 = vrot.slane %v2449_v40, 5 }
 0x205   : > { %2969 = vrot.lane.b32.xlu1 %v2860_v20, %s6280_s29  ;;  %5867 = vmatmul.msk.bf16.gmra.mxu2 %vm4799_vm9, %v5628_v22  ;;  %v3548_v46 = vshrl.u32 %v3171_v31, 16  ;;  %v9188_v28 = vrot.slane %v7629_v34, 5  ;;  %v5909_v38 = vld [vmem:[#allocation2 + $0xc8] sm:$0xf0]  ;;  %v5595_v3 = vld [vmem:[#allocation2 + $0xc0] sm:$0xf] }
 0x206   : > { %2967 = vrot.lane.b32.xlu0 %v2859_v25, %s6280_s29  ;;  %v2664_v44 = vpop.permute.xlu2 %2663  ;;  %v2558_v25 = vsel %vm6623_vm7, %v2556_v59, %v2557_v0  ;;  %v1915_v30 = vsel %vm6368_vm2, %v1910_v11, %v7598_v8  ;;  %v4027_v19 = vsel %vm6623_vm7, %v4025_v39, %v4026_v42  ;;  %v2861_v59 = vld [vmem:[%s6358_s27 + $0x50] sm:$0xf]  ;;  %v2622_v4 = vrot.slane %v2620_v1, 4  ;;  %v3885_v40 = vld [vmem:[%s6358_s27 + $0x7c] sm:$0xf] }
 0x207   : > { %v3671_v33 = vpop.permute.xlu1 %3670  ;;  %2803 = vst.msk [vmem:[#allocation2 + $0x34] sm:$0xf] %vm1006_vm4, %v2664_v44  ;;  %v3550_v2 = vrot.slane %v3548_v46, 4  ;;  %v5596_v22 = vor.u32 %v5909_v38, %v5595_v3  ;;  %v4032_v46 = vrot.slane %v3885_v40, 5  ;;  %v7717_v3 = vld [vmem:[%s6358_s27 + $0x80] sm:$0xf] }
 0x208   : > { %3813 = vst.msk [vmem:[#allocation2 + $0x10] sm:$0xf] %vm1734_vm10, %v3671_v33  ;;  %v3669_v41 = vpop.permute.xlu0 %3668  ;;  %6134 = vmatpush.bf16.msra.mxu3 %v6198_v37  ;;  %v3336_v33 = vrot.slane %v3334_v27, 5  ;;  %v3544_v37 = vshll.u32 %v3171_v31, 16 }
 0x209   : > { %3812 = vst.msk [vmem:[#allocation2 + $0x4] sm:$0xf] %vm1734_vm10, %v3669_v41  ;;  %v7634_v41 = vld [vmem:[%s6358_s27 + $0x78] sm:$0xf] }
 0x20a   : > { %2371 = vst.msk [vmem:[#allocation2 + $0x58] sm:$0xf] %vm277_vm3, %v1915_v30  ;;  %v4029_v44 = vrot.slane %v7634_v41, 5  ;;  %v7663_v57 = vrot.slane %v3544_v37, 5  ;;  %v1916_v41 = vshrl.u32 %v7589_v56, 16 }
 0x20b   : > { %4173 = vst.msk [vmem:[#allocation2 + $0x110] sm:$0xf] %vm277_vm3, %v4027_v19  ;;  %v7705_v56 = vld [vmem:[%s6358_s27 + $0x34] sm:$0xf] }
 0x20c   : > { %3692 = vrot.lane.b32.xlu2 %v3317_v53, %s6281_s30  ;;  %v3337_v53 = vsel %vm6368_vm2, %v3332_v32, %v3336_v33  ;;  %9203 = vst [vmem:[#allocation6_spill] sm:$0xff] %v7663_v57 }
 0x20d   : > { %1682 = vrot.lane.b32.xlu1 %v1540_v43, %s6281_s30  ;;  %v3340_v43 = vrot.slane %v3338_v18, 4 }
 0x20e   : > { %3694 = vrot.lane.b32.xlu0 %v3327_v50, %s6281_s30  ;;  %v7602_v20 = vpop.permute.xlu2 %2953  ;;  %v4028_v50 = vrot.slane %v4026_v42, 4  ;;  %v7695_v42 = vld [vmem:[%s6358_s27 + $0x50] sm:$0xf] }
 0x20f   : > { %v2948_v5 = vpop.permute.xlu1 %2947  ;;  %v5501_v6 = vld [vmem:[#allocation2 + $0xc] sm:$0xf0]  ;;  %v3341_v60 = vor.u32 %v3340_v43, %v3336_v33  ;;  %v2560_v19 = vrot.slane %v7695_v42, 5 }
 0x210   : > { %3089 = vst.msk [vmem:[#allocation2 + $0x1c] sm:$0xf] %vm1445_vm8, %v2948_v5  ;;  %v2662_v62 = vpop.permute.xlu0 %2661  ;;  %v5884_v10 = vld [vmem:[#allocation2 + $0x4] sm:$0xf]  ;;  %v4030_v58 = vsel %vm6623_vm7, %v4028_v50, %v4029_v44  ;;  %v2623_v5 = vrot.slane %v7652_v54, 5 }
 0x211   : > { %2802 = vst.msk [vmem:[#allocation2 + $0x28] sm:$0xf] %vm1006_vm4, %v2662_v62  ;;  %v5504_v16 = vor.u32 %v5884_v10, %v5501_v6  ;;  %v3172_v6 = vld [vmem:[%s6358_s27 + $0xac] sm:$0xf]  ;;  %v2619_v62 = vrot.slane %v9188_v28, 4 }
 0x212   : > { %3090 = vst.msk [vmem:[#allocation2 + $0x28] sm:$0xf] %vm1445_vm8, %v7525_v13  ;;  %v7619_v13 = vpop.f32.mrf.mxu2  ;;  %v3554_v26 = vshll.u32 %v3172_v6, 16  ;;  %v2624_v30 = vsel %vm6623_vm7, %v2622_v4, %v2623_v5  ;;  %v7700_v43 = vld [vmem:[%s6358_s27 + $0xb0] sm:$0xf] }
 0x213   : > { %4915 = vmatmul.bf16.gmra.mxu0 %v5584_v12  ;;  %5009 = vmatmul.bf16.vlgmr.msra.gmra.mxu1 %v5504_v16  ;;  %4174 = vst.msk [vmem:[#allocation2 + $0x11c] sm:$0xf] %vm277_vm3, %v4030_v58  ;;  %v3342_v12 = vrot.slane %v3341_v60, 4  ;;  %v7672_v16 = vrot.slane %v3344_v61, 5  ;;  %v2621_v18 = vsel %vm6623_vm7, %v2619_v62, %v2620_v1  ;;  %v3348_v60 = vshrl.u32 %v7642_v47, 16 }
 0x214   : > { %1684 = vrot.lane.b32.xlu2 %v1541_v17, %s6281_s30  ;;  %v3558_v17 = vshrl.u32 %v3172_v6, 16  ;;  %v7720_v4 = vld [vmem:[%s6358_s27 + $0x54] sm:$0xf]  ;;  %v3564_v6 = vshll.u32 %v7700_v43, 16  ;;  %v4034_v62 = vrot.slane %v4032_v46, 4 }
 0x215   : > { %2685 = vrot.lane.b32.xlu1 %v2558_v25, %s6279_s28  ;;  %v3551_v25 = vor.u32 %v3550_v2, %v7663_v57  ;;  %v1918_v2 = vrot.slane %v1916_v41, 4  ;;  %v5667_v57 = vld [vmem:[#allocation2 + $0x150] sm:$0xf] }
 0x216   : > { %2683 = vrot.lane.b32.xlu0 %v2555_v15, %s6279_s28  ;;  %v1667_v45 = vpop.permute.xlu2 %1666  ;;  %v5639_v15 = vld [vmem:[#allocation2 + $0x110] sm:$0xf]  ;;  %v3560_v39 = vrot.slane %v3558_v17, 4  ;;  %v7746_v42 = vrot.slane %v3564_v6, 5 }
 0x217   : > { %v3675_v35 = vpop.permute.xlu1 %3674  ;;  %1773 = vst.msk [vmem:[#allocation2 + $0x1c8] sm:$0xf] %vm1734_vm10, %v1667_v45  ;;  %v3552_v33 = vrot.slane %v3551_v25, 4  ;;  %v1792_v45 = vld [vmem:[%s6358_s27 + $0x30] sm:$0xf] }
 0x218   : > { %3815 = vst.msk [vmem:[#allocation2 + $0x28] sm:$0xf] %vm1734_vm10, %v3675_v35  ;;  %v3673_v14 = vpop.permute.xlu0 %3672  ;;  %v3556_v35 = vrot.slane %v3554_v26, 5  ;;  %v5607_v25 = vld [vmem:[#allocation2 + $0xd8] sm:$0xf] }
 0x219   : > { %3814 = vst.msk [vmem:[#allocation2 + $0x1c] sm:$0xf] %vm1734_vm10, %v3673_v14  ;;  %v4031_v14 = vrot.slane %v4029_v44, 4  ;;  %v2884_v44 = vld [vmem:[%s6358_s27 + $0xac] sm:$0xf] }
 0x21a   : > { %v7654_v55 = vpop.f32.mrf.mxu2  ;;  %v5919_v31 = vld [vmem:[#allocation2 + $0x118] sm:$0xf0]  ;;  %v3557_v1 = vsel %vm6368_vm2, %v3552_v33, %v3556_v35  ;;  %v5912_v26 = vld [vmem:[#allocation2 + $0xe0] sm:$0xf0] }
 0x21b   : > { %v5640_v32 = vor.u32 %v5919_v31, %v5639_v15  ;;  %v2563_v15 = vrot.slane %v7720_v4, 5  ;;  %v3152_v33 = vld [vmem:[%s6358_s27 + $0x5c] sm:$0xf] }
 0x21c   : > { %2971 = vrot.lane.b32.xlu2 %v2861_v59, %s6280_s29  ;;  %v1932_v59 = vshll.u32 %v7705_v56, 16 }
 0x21d   : > { %3696 = vrot.lane.b32.xlu1 %v3337_v53, %s6281_s30  ;;  %5868 = vmatmul.msk.bf16.gmra.mxu2 %vm4799_vm9, %v5640_v32  ;;  %v1926_v53 = vshrl.u32 %v1792_v45, 16  ;;  %v2559_v32 = vrot.slane %v2557_v0, 4 }
 0x21e   : > { %2973 = vrot.lane.b32.xlu0 %v2862_v52, %s6280_s29  ;;  %v2670_v27 = vpop.permute.xlu2 %2669  ;;  %v1922_v52 = vshll.u32 %v1792_v45, 16 }
 0x21f   : > { %v2952_v7 = vpop.permute.xlu1 %2951  ;;  %v5513_v9 = vld [vmem:[#allocation2 + $0x24] sm:$0xf0]  ;;  %2806 = vst.msk [vmem:[#allocation2 + $0x58] sm:$0xf] %vm1006_vm4, %v2670_v27  ;;  %v1928_v38 = vrot.slane %v1926_v53, 4  ;;  %v2562_v27 = vrot.slane %v2560_v19, 4  ;;  %v2561_v53 = vsel %vm6623_vm7, %v2559_v32, %v2560_v19 }
 0x220   : > { %3091 = vst.msk [vmem:[#allocation2 + $0x34] sm:$0xf] %vm1445_vm8, %v2952_v7  ;;  %v2666_v10 = vpop.permute.xlu0 %2665  ;;  %v5887_v11 = vld [vmem:[#allocation2 + $0x1c] sm:$0xf]  ;;  %v1924_v61 = vrot.slane %v1922_v52, 5  ;;  %v1936_v52 = vshrl.u32 %v7705_v56, 16 }
 0x221   : > { %2804 = vst.msk [vmem:[#allocation2 + $0x40] sm:$0xf] %vm1006_vm4, %v2666_v10  ;;  %v5516_v23 = vor.u32 %v5887_v11, %v5513_v9  ;;  %v4033_v9 = vsel %vm6623_vm7, %v4031_v14, %v4032_v46  ;;  %v4035_v10 = vrot.slane %v7717_v3, 5  ;;  %v2883_v11 = vld [vmem:[%s6358_s27 + $0xa8] sm:$0xf]  ;;  %v2564_v45 = vsel %vm6623_vm7, %v2562_v27, %v2563_v15 }
 0x222   : > { %3092 = vst.msk [vmem:[#allocation2 + $0x40] sm:$0xf] %vm1445_vm8, %v7602_v20  ;;  %v7685_v63 = vpop.f32.mrf.mxu2  ;;  %v3347_v20 = vsel %vm6368_vm2, %v3342_v12, %v7672_v16  ;;  %v3561_v12 = vor.u32 %v3560_v39, %v3556_v35  ;;  %v1929_v47 = vor.u32 %v1928_v38, %v1924_v61  ;;  %v5727_v19 = vld [vmem:[#allocation2 + $0x1c8] sm:$0xf]  ;;  %v1938_v6 = vrot.slane %v1936_v52, 4 }
 0x223   : > { %4920 = vmatmul.bf16.gmra.mxu0 %v5596_v22  ;;  %5014 = vmatmul.bf16.gmra.mxu1 %v5516_v23  ;;  %v7729_v22 = vrot.slane %v1932_v59, 5  ;;  %v1919_v23 = vor.u32 %v1918_v2, %v7598_v8  ;;  %4175 = vst.msk [vmem:[#allocation2 + $0x128] sm:$0xf] %vm277_vm3, %v4033_v9  ;;  %v3358_v59 = vshrl.u32 %v3152_v33, 16  ;;  %v7773_v38 = vld [vmem:[%s6358_s27 + $0xa8] sm:$0xf] }
 0x224   : > { %3698 = vrot.lane.b32.xlu2 %v3347_v20, %s6281_s30  ;;  %v1930_v17 = vrot.slane %v1929_v47, 4  ;;  %v3562_v41 = vrot.slane %v3561_v12, 4  ;;  %v3887_v12 = vld [vmem:[%s6358_s27 + $0x84] sm:$0xf] }
 0x225   : > { %2729 = vrot.lane.b32.xlu1 %v2624_v30, %s6279_s28  ;;  %v4036_v30 = vsel %vm6623_vm7, %v4034_v62, %v4035_v10  ;;  %v1920_v8 = vrot.slane %v1919_v23, 4  ;;  %v7777_v62 = vld [vmem:[%s6358_s27 + $0x60] sm:$0xf] }
 0x226   : > { %2727 = vrot.lane.b32.xlu0 %v2621_v18, %s6279_s28  ;;  %v7712_v58 = vpop.permute.xlu2 %3680  ;;  %v3350_v18 = vrot.slane %v3348_v60, 4  ;;  %4176 = vst.msk [vmem:[#allocation2 + $0x134] sm:$0xf] %vm277_vm3, %v4036_v30  ;;  %v1935_v14 = vsel %vm6368_vm2, %v1930_v17, %v7729_v22  ;;  %v2626_v17 = vrot.slane %v7773_v38, 5  ;;  %v7826_v38 = vld [vmem:[%s6358_s27 + $0x3c] sm:$0xf] }
 0x227   : > { %v3679_v37 = vpop.permute.xlu1 %3678  ;;  %v1925_v0 = vsel %vm6368_vm2, %v1920_v8, %v1924_v61  ;;  %2373 = vst.msk [vmem:[#allocation2 + $0x70] sm:$0xf] %vm277_vm3, %v1935_v14  ;;  %v3568_v8 = vshrl.u32 %v7700_v43, 16  ;;  %v4037_v43 = vrot.slane %v4035_v10, 4  ;;  %v4038_v14 = vrot.slane %v3887_v12, 5 }
 0x228   : > { %3817 = vst.msk [vmem:[#allocation2 + $0x40] sm:$0xf] %vm1734_vm10, %v3679_v37  ;;  %v3677_v50 = vpop.permute.xlu0 %3676  ;;  %v5608_v37 = vor.u32 %v5912_v26, %v5607_v25  ;;  %v3351_v46 = vor.u32 %v3350_v18, %v7672_v16  ;;  %v3567_v16 = vsel %vm6368_vm2, %v3562_v41, %v7746_v42  ;;  %v3360_v25 = vrot.slane %v3358_v59, 4  ;;  %v2864_v18 = vld [vmem:[%s6358_s27 + $0x5c] sm:$0xf] }
 0x229   : > { %3816 = vst.msk [vmem:[#allocation2 + $0x34] sm:$0xf] %vm1734_vm10, %v3677_v50  ;;  %v3354_v50 = vshll.u32 %v3152_v33, 16  ;;  %v1939_v26 = vor.u32 %v1938_v6, %v7729_v22  ;;  %v7795_v22 = vld [vmem:[%s6358_s27 + $0xac] sm:$0xf]  ;;  %v4039_v3 = vsel %vm6623_vm7, %v4037_v43, %v4038_v14  ;;  %v4040_v10 = vrot.slane %v4038_v14, 4 }
 0x22a   : > { %v7723_v7 = vpop.f32.mrf.mxu2  ;;  %2372 = vst.msk [vmem:[#allocation2 + $0x64] sm:$0xf] %vm277_vm3, %v1925_v0  ;;  %v3352_v60 = vrot.slane %v3351_v46, 4  ;;  %v7801_v41 = vld [vmem:[%s6358_s27 + $0x88] sm:$0xf]  ;;  %v3570_v46 = vrot.slane %v3568_v8, 4 }
 0x22b   : > { %v3356_v61 = vrot.slane %v3354_v50, 5  ;;  %v1940_v32 = vrot.slane %v1939_v26, 4  ;;  %v4041_v0 = vrot.slane %v7801_v41, 5  ;;  %v2628_v50 = vrot.slane %v2626_v17, 4  ;;  %4177 = vst.msk [vmem:[#allocation2 + $0x140] sm:$0xf] %vm277_vm3, %v4039_v3  ;;  %v7842_v26 = vpop.f32.mrf.mxu0 }
 0x22c   : > { %3015 = vrot.lane.b32.xlu2 %v2883_v11, %s6280_s29  ;;  %v1794_v11 = vld [vmem:[%s6358_s27 + $0x38] sm:$0xf]  ;;  %v2629_v52 = vrot.slane %v7795_v22, 5  ;;  %v5619_v59 = vld [vmem:[#allocation2 + $0xf0] sm:$0xf]  ;;  %v3571_v54 = vor.u32 %v3570_v46, %v7746_v42 }
 0x22d   : > { %3740 = vrot.lane.b32.xlu1 %v3557_v1, %s6281_s30  ;;  %v5922_v56 = vld [vmem:[#allocation2 + $0x130] sm:$0xf0]  ;;  %v1942_v27 = vshll.u32 %v1794_v11, 16  ;;  %v7858_v43 = vld [vmem:[%s6358_s27 + $0xb8] sm:$0xf] }
 0x22e   : > { %3017 = vrot.lane.b32.xlu0 %v2884_v44, %s6280_s29  ;;  %v1673_v48 = vpop.permute.xlu2 %1672  ;;  %v5651_v44 = vld [vmem:[#allocation2 + $0x128] sm:$0xf]  ;;  %v2630_v12 = vsel %vm6623_vm7, %v2628_v50, %v2629_v52  ;;  %v3889_v14 = vld [vmem:[%s6358_s27 + $0x8c] sm:$0xf]  ;;  %v4043_v50 = vrot.slane %v4041_v0, 4 }
 0x22f   : > { %v2668_v31 = vpop.permute.xlu1 %2667  ;;  %v5525_v20 = vld [vmem:[#allocation2 + $0x3c] sm:$0xf0]  ;;  %1776 = vst.msk [vmem:[#allocation2 + $0x1ec] sm:$0xf] %vm1734_vm10, %v1673_v48  ;;  %v5652_v2 = vor.u32 %v5922_v56, %v5651_v44  ;;  %v1944_v33 = vrot.slane %v1942_v27, 5  ;;  %v1946_v48 = vshrl.u32 %v1794_v11, 16 }
 0x230   : > { %2805 = vst.msk [vmem:[#allocation2 + $0x4c] sm:$0xf] %vm1006_vm4, %v2668_v31  ;;  %v1669_v35 = vpop.permute.xlu0 %1668  ;;  %v5890_v40 = vld [vmem:[#allocation2 + $0x34] sm:$0xf]  ;;  %v1952_v11 = vshll.u32 %v7826_v38, 16 }
 0x231   : > { %1774 = vst.msk [vmem:[#allocation2 + $0x1d4] sm:$0xf] %vm1734_vm10, %v1669_v35  ;;  %v5528_v39 = vor.u32 %v5890_v40, %v5525_v20  ;;  %5869 = vmatmul.msk.bf16.gmra.mxu2 %vm4799_vm9, %v5652_v2  ;;  %v3357_v20 = vsel %vm6368_vm2, %v3352_v60, %v3356_v61  ;;  %v3364_v35 = vshll.u32 %v7777_v62, 16  ;;  %v1948_v2 = vrot.slane %v1946_v48, 4  ;;  %v3176_v22 = vld [vmem:[%s6358_s27 + $0xbc] sm:$0xf] }
 0x232   : > { %v7764_v1 = vpop.f32.mrf.mxu2 }
 0x233   : > { %4925 = vmatmul.bf16.gmra.mxu0 %v5608_v37  ;;  %5019 = vmatmul.bf16.gmra.mxu1 %v5528_v39  ;;  %v3361_v37 = vor.u32 %v3360_v25, %v3356_v61  ;;  %v1945_v39 = vsel %vm6368_vm2, %v1940_v32, %v1944_v33  ;;  %v7820_v56 = vrot.slane %v3364_v35, 5  ;;  %v7840_v25 = vrot.slane %v1952_v11, 5  ;;  %v5663_v35 = vld [vmem:[#allocation2 + $0x140] sm:$0xf] }
 0x234   : > { %3742 = vrot.lane.b32.xlu2 %v3567_v16, %s6281_s30  ;;  %2374 = vst.msk [vmem:[#allocation2 + $0x7c] sm:$0xf] %vm277_vm3, %v1945_v39  ;;  %v2625_v16 = vrot.slane %v2623_v5, 4 }
 0x235   : > { %2689 = vrot.lane.b32.xlu1 %v2564_v45, %s6279_s28  ;;  %v5915_v45 = vld [vmem:[#allocation2 + $0xf8] sm:$0xf0]  ;;  %v3362_v61 = vrot.slane %v3361_v37, 4 }
 0x236   : > { %2687 = vrot.lane.b32.xlu0 %v2561_v53, %s6279_s28  ;;  %v7788_v31 = vpop.permute.xlu2 %2959  ;;  %v3174_v53 = vld [vmem:[%s6358_s27 + $0xb4] sm:$0xf]  ;;  %v5620_v6 = vor.u32 %v5915_v45, %v5619_v59  ;;  %v5945_v8 = vld [vmem:[#allocation2 + $0x1e8] sm:$0xf0] }
 0x237   : > { %v2958_v9 = vpop.permute.xlu1 %2957  ;;  %v3574_v5 = vshll.u32 %v3174_v53, 16  ;;  %v3578_v42 = vshrl.u32 %v3174_v53, 16  ;;  %v3367_v27 = vsel %vm6368_vm2, %v3362_v61, %v7820_v56 }
 0x238   : > { %3094 = vst.msk [vmem:[#allocation2 + $0x58] sm:$0xf] %vm1445_vm8, %v2958_v9  ;;  %v2956_v47 = vpop.permute.xlu0 %2955  ;;  %v5942_v23 = vld [vmem:[#allocation2 + $0x1d0] sm:$0xf0] }
 0x239   : > { %3093 = vst.msk [vmem:[#allocation2 + $0x4c] sm:$0xf] %vm1445_vm8, %v2956_v47  ;;  %v5728_v30 = vor.u32 %v5942_v23, %v5727_v19  ;;  %v4042_v19 = vsel %vm6623_vm7, %v4040_v10, %v4041_v0  ;;  %v1949_v47 = vor.u32 %v1948_v2, %v1944_v33  ;;  %v2627_v23 = vsel %vm6623_vm7, %v2625_v16, %v2626_v17  ;;  %v7851_v17 = vld [vmem:[%s6358_s27 + $0x58] sm:$0xf]  ;;  %v7866_v10 = vld [vmem:[%s6358_s27 + $0x5c] sm:$0xf] }
 0x23a   : > { %3818 = vst.msk [vmem:[#allocation2 + $0x4c] sm:$0xf] %vm1734_vm10, %v7712_v58  ;;  %v7798_v40 = vpop.f32.mrf.mxu2  ;;  %v2863_v58 = vld [vmem:[%s6358_s27 + $0x58] sm:$0xf]  ;;  %v3576_v32 = vrot.slane %v3574_v5, 5  ;;  %v3580_v39 = vrot.slane %v3578_v42, 4 }
 0x23b   : > { %4975 = vmatmul.bf16.gmra.mxu3 %v5728_v30  ;;  %4178 = vst.msk [vmem:[#allocation2 + $0x14c] sm:$0xf] %vm277_vm3, %v4042_v19  ;;  %v1950_v30 = vrot.slane %v1949_v47, 4  ;;  %v2566_v3 = vrot.slane %v7851_v17, 5  ;;  %v4044_v19 = vrot.slane %v3889_v14, 5  ;;  %v1956_v2 = vshrl.u32 %v7826_v38, 16 }
 0x23c   : > { %2975 = vrot.lane.b32.xlu2 %v2863_v58, %s6280_s29  ;;  %v3584_v0 = vshll.u32 %v7858_v43, 16  ;;  %v2885_v38 = vld [vmem:[%s6358_s27 + $0xb0] sm:$0xf]  ;;  %v5631_v47 = vld [vmem:[#allocation2 + $0x108] sm:$0xf] }
 0x23d   : > { %3700 = vrot.lane.b32.xlu1 %v3357_v20, %s6281_s30  ;;  %v3572_v20 = vrot.slane %v3571_v54, 4  ;;  %v1955_v41 = vsel %vm6368_vm2, %v1950_v30, %v7840_v25  ;;  %v3581_v54 = vor.u32 %v3580_v39, %v3576_v32  ;;  %v4046_v5 = vrot.slane %v4044_v19, 4 }
 0x23e   : > { %2977 = vrot.lane.b32.xlu0 %v2864_v18, %s6280_s29  ;;  %v7830_v9 = vpop.permute.xlu2 %3686  ;;  %2375 = vst.msk [vmem:[#allocation2 + $0x88] sm:$0xf] %vm277_vm3, %v1955_v41  ;;  %v2568_v42 = vrot.slane %v2566_v3, 4  ;;  %v7905_v14 = vrot.slane %v3584_v0, 5 }
 0x23f   : > { %v1671_v44 = vpop.permute.xlu1 %1670  ;;  %v3582_v41 = vrot.slane %v3581_v54, 4 }
 0x240   : > { %1775 = vst.msk [vmem:[#allocation2 + $0x1e0] sm:$0xf] %vm1734_vm10, %v1671_v44  ;;  %v3683_v60 = vpop.permute.xlu0 %3682  ;;  %v3368_v44 = vshrl.u32 %v7777_v62, 16  ;;  %v2886_v62 = vld [vmem:[%s6358_s27 + $0xb4] sm:$0xf] }
 0x241   : > { %3819 = vst.msk [vmem:[#allocation2 + $0x58] sm:$0xf] %vm1734_vm10, %v3683_v60  ;;  %v5893_v33 = vld [vmem:[#allocation2 + $0x4c] sm:$0xf]  ;;  %v3577_v60 = vsel %vm6368_vm2, %v3572_v20, %v3576_v32  ;;  %v3154_v20 = vld [vmem:[%s6358_s27 + $0x64] sm:$0xf]  ;;  %v3587_v0 = vsel %vm6368_vm2, %v3582_v41, %v7905_v14 }
 0x242   : > { %v7847_v18 = vpop.f32.mrf.mxu2  ;;  %v5925_v16 = vld [vmem:[#allocation2 + $0x148] sm:$0xf0]  ;;  %v3370_v32 = vrot.slane %v3368_v44, 4  ;;  %v7952_v41 = vld [vmem:[%s6358_s27 + $0x68] sm:$0xf] }
 0x243   : > { %4930 = vmatmul.bf16.gmra.mxu0 %v5620_v6  ;;  %v5664_v61 = vor.u32 %v5925_v16, %v5663_v35  ;;  %v7877_v6 = vld [vmem:[%s6358_s27 + $0x90] sm:$0xf]  ;;  %v2565_v35 = vrot.slane %v2563_v15, 4  ;;  %v3374_v15 = vshll.u32 %v3154_v20, 16 }
 0x244   : > { %3702 = vrot.lane.b32.xlu2 %v3367_v27, %s6281_s30  ;;  %v4047_v11 = vrot.slane %v7877_v6, 5  ;;  %v2569_v27 = vrot.slane %v7866_v10, 5  ;;  %v2865_v6 = vld [vmem:[%s6358_s27 + $0x60] sm:$0xf]  ;;  %v2888_v10 = vld [vmem:[%s6358_s27 + $0xbc] sm:$0xf] }
 0x245   : > { %2733 = vrot.lane.b32.xlu1 %v2630_v12, %s6279_s28  ;;  %5870 = vmatmul.msk.bf16.gmra.mxu2 %vm4799_vm9, %v5664_v61  ;;  %v2567_v61 = vsel %vm6623_vm7, %v2565_v35, %v2566_v3  ;;  %v3376_v3 = vrot.slane %v3374_v15, 5 }
 0x246   : > { %2731 = vrot.lane.b32.xlu0 %v2627_v23, %s6279_s28  ;;  %v2676_v59 = vpop.permute.xlu2 %2675  ;;  %v5918_v23 = vld [vmem:[#allocation2 + $0x110] sm:$0xf0]  ;;  %v4048_v30 = vsel %vm6623_vm7, %v4046_v5, %v4047_v11  ;;  %v2570_v4 = vsel %vm6623_vm7, %v2568_v42, %v2569_v27  ;;  %v7938_v5 = vld [vmem:[%s6358_s27 + $0xb0] sm:$0xf] }
 0x247   : > { %v2674_v58 = vpop.permute.xlu1 %2673  ;;  %v5739_v37 = vld [vmem:[#allocation2 + $0x1e0] sm:$0xf]  ;;  %2809 = vst.msk [vmem:[#allocation2 + $0x7c] sm:$0xf] %vm1006_vm4, %v2676_v59  ;;  %v3371_v59 = vor.u32 %v3370_v32, %v7820_v56 }
 0x248   : > { %2808 = vst.msk [vmem:[#allocation2 + $0x70] sm:$0xf] %vm1006_vm4, %v2674_v58  ;;  %v2672_v48 = vpop.permute.xlu0 %2671  ;;  %v5740_v45 = vor.u32 %v5945_v8, %v5739_v37  ;;  %v5537_v46 = vld [vmem:[#allocation2 + $0x54] sm:$0xf0]  ;;  %v7897_v8 = vpop.f32.mrf.mxu0  ;;  %v1796_v58 = vld [vmem:[%s6358_s27 + $0x40] sm:$0xf] }
 0x249   : > { %2807 = vst.msk [vmem:[#allocation2 + $0x64] sm:$0xf] %vm1006_vm4, %v2672_v48  ;;  %v5540_v53 = vor.u32 %v5893_v33, %v5537_v46  ;;  %v1958_v37 = vrot.slane %v1956_v2, 4  ;;  %v7910_v48 = vld [vmem:[%s6358_s27 + $0x44] sm:$0xf]  ;;  %v1966_v46 = vshrl.u32 %v1796_v58, 16 }
 0x24a   : > { %3095 = vst.msk [vmem:[#allocation2 + $0x64] sm:$0xf] %vm1445_vm8, %v7788_v31  ;;  %v4045_v31 = vsel %vm6623_vm7, %v4043_v50, %v4044_v19  ;;  %v7886_v12 = vpop.f32.mrf.mxu2  ;;  %v5632_v50 = vor.u32 %v5918_v23, %v5631_v47  ;;  %v1972_v44 = vshll.u32 %v7910_v48, 16  ;;  %v3378_v2 = vshrl.u32 %v3154_v20, 16 }
 0x24b   : > { %4980 = vmatmul.bf16.gmra.mxu3 %v5740_v45  ;;  %5024 = vmatmul.bf16.gmra.mxu1 %v5540_v53  ;;  %4179 = vst.msk [vmem:[#allocation2 + $0x158] sm:$0xf] %vm277_vm3, %v4045_v31  ;;  %v1962_v45 = vshll.u32 %v1796_v58, 16  ;;  %v1968_v19 = vrot.slane %v1966_v46, 4  ;;  %v3372_v17 = vrot.slane %v3371_v59, 4 }
 0x24c   : > { %4180 = vst.msk [vmem:[#allocation2 + $0x164] sm:$0xf] %vm277_vm3, %v4048_v30  ;;  %3019 = vrot.lane.b32.xlu2 %v2885_v38, %s6280_s29  ;;  %v3891_v30 = vld [vmem:[%s6358_s27 + $0x94] sm:$0xf]  ;;  %v3380_v58 = vrot.slane %v3378_v2, 4 }
 0x24d   : > { %3744 = vrot.lane.b32.xlu1 %v3577_v60, %s6281_s30  ;;  %v1964_v16 = vrot.slane %v1962_v45, 5  ;;  %v1959_v60 = vor.u32 %v1958_v37, %v7840_v25  ;;  %v2632_v45 = vrot.slane %v7938_v5, 5  ;;  %v3377_v15 = vsel %vm6368_vm2, %v3372_v17, %v3376_v3  ;;  %v7964_v59 = vld [vmem:[%s6358_s27 + $0x98] sm:$0xf] }
 0x24e   : > { %3021 = vrot.lane.b32.xlu0 %v2886_v62, %s6280_s29  ;;  %v7917_v53 = vpop.permute.xlu2 %2965 }
 0x24f   : > { %v3685_v33 = vpop.permute.xlu1 %3684  ;;  %v1969_v62 = vor.u32 %v1968_v19, %v1964_v16  ;;  %v1960_v56 = vrot.slane %v1959_v60, 4  ;;  %v7967_v19 = vld [vmem:[%s6358_s27 + $0xb4] sm:$0xf]  ;;  %v4053_v60 = vrot.slane %v7964_v59, 5 }
 0x250   : > { %3820 = vst.msk [vmem:[#allocation2 + $0x64] sm:$0xf] %vm1734_vm10, %v3685_v33  ;;  %v2962_v39 = vpop.permute.xlu0 %2961  ;;  %v7945_v20 = vpop.f32.mrf.mxu0 }
 0x251   : > { %3096 = vst.msk [vmem:[#allocation2 + $0x70] sm:$0xf] %vm1445_vm8, %v2962_v39  ;;  %v1970_v38 = vrot.slane %v1969_v62, 4  ;;  %v1965_v47 = vsel %vm6368_vm2, %v1960_v56, %v1964_v16  ;;  %v2866_v39 = vld [vmem:[%s6358_s27 + $0x64] sm:$0xf]  ;;  %v4050_v16 = vrot.slane %v3891_v30, 5 }
 0x252   : > { %3821 = vst.msk [vmem:[#allocation2 + $0x70] sm:$0xf] %vm1734_vm10, %v7830_v9  ;;  %v7931_v9 = vrot.slane %v1972_v44, 5  ;;  %v5675_v54 = vld [vmem:[#allocation2 + $0x158] sm:$0xf]  ;;  %v7934_v31 = vpop.f32.mrf.mxu2  ;;  %v3588_v44 = vshrl.u32 %v7858_v43, 16 }
 0x253   : > { %4935 = vmatmul.bf16.gmra.mxu0 %v5632_v50  ;;  %v5928_v25 = vld [vmem:[#allocation2 + $0x160] sm:$0xf0]  ;;  %2376 = vst.msk [vmem:[#allocation2 + $0x94] sm:$0xf] %vm277_vm3, %v1965_v47  ;;  %v4049_v50 = vrot.slane %v4047_v11, 4  ;;  %v3381_v11 = vor.u32 %v3380_v58, %v3376_v3  ;;  %v4052_v2 = vrot.slane %v4050_v16, 4 }
 0x254   : > { %3746 = vrot.lane.b32.xlu2 %v3587_v0, %s6281_s30  ;;  %v5676_v33 = vor.u32 %v5928_v25, %v5675_v54  ;;  %v1975_v35 = vsel %vm6368_vm2, %v1970_v38, %v7931_v9  ;;  %v5921_v0 = vld [vmem:[#allocation2 + $0x128] sm:$0xf0]  ;;  %v2631_v62 = vrot.slane %v2629_v52, 4  ;;  %v5643_v56 = vld [vmem:[#allocation2 + $0x120] sm:$0xf]  ;;  %v2634_v54 = vrot.slane %v2632_v45, 4 }
 0x255   : > { %2693 = vrot.lane.b32.xlu1 %v2570_v4, %s6279_s28  ;;  %2377 = vst.msk [vmem:[#allocation2 + $0xa0] sm:$0xf] %vm277_vm3, %v1975_v35  ;;  %v4051_v43 = vsel %vm6623_vm7, %v4049_v50, %v4050_v16  ;;  %v9189_v25 = vrot.slane %v7967_v19, 5  ;;  %v3590_v17 = vrot.slane %v3588_v44, 4  ;;  %v4054_v3 = vsel %vm6623_vm7, %v4052_v2, %v4053_v60  ;;  %v8024_v2 = vld [vmem:[%s6358_s27 + $0x9c] sm:$0xf] }
 0x256   : > { %2691 = vrot.lane.b32.xlu0 %v2567_v61, %s6279_s28  ;;  %v1679_v46 = vpop.permute.xlu2 %1678  ;;  %5871 = vmatmul.msk.bf16.gmra.mxu2 %vm4799_vm9, %v5676_v33  ;;  %v3384_v61 = vshll.u32 %v7952_v41, 16  ;;  %4181 = vst.msk [vmem:[#allocation2 + $0x170] sm:$0xf] %vm277_vm3, %v4051_v43  ;;  %v2633_v50 = vsel %vm6623_vm7, %v2631_v62, %v2632_v45  ;;  %v1798_v43 = vld [vmem:[%s6358_s27 + $0x48] sm:$0xf] }
 0x257   : > { %v1677_v23 = vpop.permute.xlu1 %1676  ;;  %v5896_v42 = vld [vmem:[#allocation2 + $0x64] sm:$0xf]  ;;  %1779 = vst.msk [vmem:[#allocation2 + $0x210] sm:$0xf] %vm1734_vm10, %v1679_v46  ;;  %v3594_v46 = vshll.u32 %v3176_v22, 16 }
 0x258   : > { %1778 = vst.msk [vmem:[#allocation2 + $0x204] sm:$0xf] %vm1734_vm10, %v1677_v23  ;;  %v1675_v32 = vpop.permute.xlu0 %1674  ;;  %v7992_v30 = vrot.slane %v3384_v61, 5  ;;  %v7995_v58 = vpop.f32.mrf.mxu0 }
 0x259   : > { %1777 = vst.msk [vmem:[#allocation2 + $0x1f8] sm:$0xf] %vm1734_vm10, %v1675_v32  ;;  %v5549_v37 = vld [vmem:[#allocation2 + $0x6c] sm:$0xf0]  ;;  %v5644_v32 = vor.u32 %v5921_v0, %v5643_v56  ;;  %v3596_v45 = vrot.slane %v3594_v46, 5 }
 0x25a   : > { %v5552_v4 = vor.u32 %v5896_v42, %v5549_v37  ;;  %v7988_v52 = vpop.f32.mrf.mxu2  ;;  %4182 = vst.msk [vmem:[#allocation2 + $0x17c] sm:$0xf] %vm277_vm3, %v4054_v3  ;;  %v3382_v42 = vrot.slane %v3381_v11, 4  ;;  %v2636_v37 = vsel %vm6623_vm7, %v2634_v54, %v9189_v25  ;;  %v8051_v46 = vld [vmem:[%s6358_s27 + $0xa0] sm:$0xf] }
 0x25c   : > { %5029 = vmatmul.bf16.gmra.mxu1 %v5552_v4  ;;  %2979 = vrot.lane.b32.xlu2 %v2865_v6, %s6280_s29  ;;  %v8008_v4 = vld [vmem:[%s6358_s27 + $0x60] sm:$0xf]  ;;  %v3387_v44 = vsel %vm6368_vm2, %v3382_v42, %v7992_v30 }
 0x25d   : > { %3704 = vrot.lane.b32.xlu1 %v3377_v15, %s6281_s30  ;;  %v1976_v15 = vshrl.u32 %v7910_v48, 16  ;;  %v2572_v6 = vrot.slane %v8008_v4, 5  ;;  %v8019_v48 = vrot.slane %v2569_v27, 4  ;;  %v3388_v27 = vshrl.u32 %v7952_v41, 16  ;;  %v8046_v41 = vld [vmem:[%s6358_s27 + $0x4c] sm:$0xf] }
 0x25e   : > { %2981 = vrot.lane.b32.xlu0 %v2866_v39, %s6280_s29  ;;  %v2682_v35 = vpop.permute.xlu2 %2681  ;;  %v3591_v39 = vor.u32 %v3590_v17, %v7905_v14  ;;  %v5687_v14 = vld [vmem:[#allocation2 + $0x170] sm:$0xf]  ;;  %v1982_v17 = vshll.u32 %v1798_v43, 16 }
 0x25f   : > { %v2964_v5 = vpop.permute.xlu1 %2963  ;;  %v5948_v38 = vld [vmem:[#allocation2 + $0x200] sm:$0xf0]  ;;  %2812 = vst.msk [vmem:[#allocation2 + $0xa0] sm:$0xf] %vm1006_vm4, %v2682_v35  ;;  %v1978_v54 = vrot.slane %v1976_v15, 4  ;;  %v2574_v42 = vrot.slane %v2572_v6, 4 }
 0x260   : > { %3097 = vst.msk [vmem:[#allocation2 + $0x7c] sm:$0xf] %vm1445_vm8, %v2964_v5  ;;  %v2678_v47 = vpop.permute.xlu0 %2677  ;;  %v5751_v23 = vld [vmem:[#allocation2 + $0x1f8] sm:$0xf]  ;;  %v3592_v16 = vrot.slane %v3591_v39, 4  ;;  %v1992_v39 = vshll.u32 %v8046_v41, 16 }
 0x261   : > { %2810 = vst.msk [vmem:[#allocation2 + $0x88] sm:$0xf] %vm1006_vm4, %v2678_v47  ;;  %v5752_v33 = vor.u32 %v5948_v38, %v5751_v23  ;;  %v5931_v11 = vld [vmem:[#allocation2 + $0x178] sm:$0xf0]  ;;  %v8035_v38 = vld [vmem:[%s6358_s27 + $0xc0] sm:$0xf] }
 0x262   : > { %3098 = vst.msk [vmem:[#allocation2 + $0x88] sm:$0xf] %vm1445_vm8, %v7917_v53  ;;  %v3598_v53 = vshrl.u32 %v3176_v22, 16  ;;  %v5688_v62 = vor.u32 %v5931_v11, %v5687_v14  ;;  %v8032_v5 = vpop.f32.mrf.mxu2  ;;  %v1986_v22 = vshrl.u32 %v1798_v43, 16  ;;  %v3597_v47 = vsel %vm6368_vm2, %v3592_v16, %v3596_v45  ;;  %v8040_v23 = vld [vmem:[%s6358_s27 + $0x64] sm:$0xf] }
 0x263   : > { %4940 = vmatmul.bf16.gmra.mxu0 %v5644_v32  ;;  %4985 = vmatmul.bf16.gmra.mxu3 %v5752_v33  ;;  %9204 = vst [vmem:[#allocation7_spill] sm:$0xff] %v8032_v5  ;;  %v1979_v32 = vor.u32 %v1978_v54, %v7931_v9  ;;  %v1984_v33 = vrot.slane %v1982_v17, 5  ;;  %v2887_v35 = vld [vmem:[%s6358_s27 + $0xb8] sm:$0xf]  ;;  %v4056_v9 = vrot.slane %v8024_v2, 5  ;;  %v4055_v54 = vrot.slane %v4053_v60, 4 }
 0x264   : > { %3706 = vrot.lane.b32.xlu2 %v3387_v44, %s6281_s30  ;;  %v3600_v56 = vrot.slane %v3598_v53, 4  ;;  %v3156_v53 = vld [vmem:[%s6358_s27 + $0x6c] sm:$0xf]  ;;  %v3604_v44 = vshll.u32 %v8035_v38, 16  ;;  %v5655_v16 = vld [vmem:[#allocation2 + $0x138] sm:$0xf] }
 0x265   : > { %2737 = vrot.lane.b32.xlu1 %v2636_v37, %s6279_s28  ;;  %v1988_v37 = vrot.slane %v1986_v22, 4  ;;  %v1980_v14 = vrot.slane %v1979_v32, 4  ;;  %v5924_v11 = vld [vmem:[#allocation2 + $0x140] sm:$0xf0]  ;;  %v4059_v17 = vrot.slane %v8051_v46, 5 }
 0x266   : > { %2735 = vrot.lane.b32.xlu0 %v2633_v50, %s6279_s28  ;;  %v8030_v3 = vpop.permute.xlu2 %3692  ;;  %v8053_v50 = vpop.f32.mrf.mxu0  ;;  %5872 = vmatmul.msk.bf16.gmra.mxu2 %vm4799_vm9, %v5688_v62  ;;  %v3601_v15 = vor.u32 %v3600_v56, %v3596_v45  ;;  %v9190_v45 = vrot.slane %v8040_v23, 5  ;;  %v8067_v62 = vld [vmem:[%s6358_s27 + $0xb8] sm:$0xf]  ;;  %v4058_v56 = vrot.slane %v4056_v9, 4 }
 0x267   : > { %v3691_v61 = vpop.permute.xlu1 %3690  ;;  %v1989_v43 = vor.u32 %v1988_v37, %v1984_v33  ;;  %v1985_v2 = vsel %vm6368_vm2, %v1980_v14, %v1984_v33 }
 0x268   : > { %3823 = vst.msk [vmem:[#allocation2 + $0x88] sm:$0xf] %vm1734_vm10, %v3691_v61  ;;  %v3689_v0 = vpop.permute.xlu0 %3688  ;;  %v3390_v61 = vrot.slane %v3388_v27, 4  ;;  %v3602_v37 = vrot.slane %v3601_v15, 4  ;;  %v2576_v15 = vsel %vm6623_vm7, %v2574_v42, %v9190_v45 }
 0x269   : > { %3822 = vst.msk [vmem:[#allocation2 + $0x7c] sm:$0xf] %vm1734_vm10, %v3689_v0  ;;  %v8060_v0 = vrot.slane %v1992_v39, 5  ;;  %v1990_v59 = vrot.slane %v1989_v43, 4  ;;  %v8075_v39 = vrot.slane %v3604_v44, 5  ;;  %v4057_v43 = vsel %vm6623_vm7, %v4055_v54, %v4056_v9 }
 0x26a   : > { %2378 = vst.msk [vmem:[#allocation2 + $0xac] sm:$0xf] %vm277_vm3, %v1985_v2  ;;  %v3391_v14 = vor.u32 %v3390_v61, %v7992_v30  ;;  %v8079_v25 = vpop.f32.mrf.mxu2  ;;  %v9191_v30 = vrot.slane %v8067_v62, 5  ;;  %v4060_v44 = vsel %vm6623_vm7, %v4058_v56, %v4059_v17  ;;  %v2573_v9 = vsel %vm6623_vm7, %v8019_v48, %v2572_v6  ;;  %v1819_v6 = vld [vmem:[%s6358_s27 + $0x9c] sm:$0xf] }
 0x26b   : > { %9205 = vst [vmem:[#allocation8_spill] sm:$0xff] %v8079_v25  ;;  %v3607_v42 = vsel %vm6368_vm2, %v3602_v37, %v8075_v39  ;;  %v8121_v2 = vld [vmem:[%s6358_s27 + $0x70] sm:$0xf]  ;;  %v1820_v56 = vld [vmem:[%s6358_s27 + $0xa0] sm:$0xf] }
 0x26c   : > { %3023 = vrot.lane.b32.xlu2 %v2887_v35, %s6280_s29  ;;  %v1995_v35 = vsel %vm6368_vm2, %v1990_v59, %v8060_v0  ;;  %4183 = vst.msk [vmem:[#allocation2 + $0x188] sm:$0xf] %vm277_vm3, %v4057_v43  ;;  %v3392_v4 = vrot.slane %v3391_v14, 4  ;;  %v8117_v61 = vrot.slane %v9191_v30, 4  ;;  %v8126_v59 = vld [vmem:[%s6358_s27 + $0xbc] sm:$0xf] }
 0x26d   : > { %3748 = vrot.lane.b32.xlu1 %v3597_v47, %s6281_s30  ;;  %v3394_v47 = vshll.u32 %v3156_v53, 16  ;;  %2379 = vst.msk [vmem:[#allocation2 + $0xb8] sm:$0xf] %vm277_vm3, %v1995_v35  ;;  %v2868_v37 = vld [vmem:[%s6358_s27 + $0x6c] sm:$0xf] }
 0x26e   : > { %3025 = vrot.lane.b32.xlu0 %v2888_v10, %s6280_s29  ;;  %v5656_v10 = vor.u32 %v5924_v11, %v5655_v16  ;;  %v1685_v28 = vpop.permute.xlu2 %1684  ;;  %v3398_v16 = vshrl.u32 %v3156_v53, 16  ;;  %v3608_v11 = vshrl.u32 %v8035_v38, 16  ;;  %4184 = vst.msk [vmem:[#allocation2 + $0x194] sm:$0xf] %vm277_vm3, %v4060_v44  ;;  %v8112_v48 = vpop.f32.mrf.mxu0  ;;  %v5763_v53 = vld [vmem:[#allocation2 + $0x210] sm:$0xf] }
 0x26f   : > { %v2680_v22 = vpop.permute.xlu1 %2679  ;;  %v5561_v27 = vld [vmem:[#allocation2 + $0x84] sm:$0xf0]  ;;  %1782 = vst.msk [vmem:[#allocation2 + $0x234] sm:$0xf] %vm1734_vm10, %v1685_v28  ;;  %v8102_v28 = vrot.slane %v3394_v47, 5 }
 0x270   : > { %2811 = vst.msk [vmem:[#allocation2 + $0x94] sm:$0xf] %vm1006_vm4, %v2680_v22  ;;  %v1681_v60 = vpop.permute.xlu0 %1680  ;;  %v5899_v32 = vld [vmem:[#allocation2 + $0x7c] sm:$0xf]  ;;  %v3400_v38 = vrot.slane %v3398_v16, 4  ;;  %v2192_v22 = vshll.u32 %v1819_v6, 16 }
 0x271   : > { %1780 = vst.msk [vmem:[#allocation2 + $0x21c] sm:$0xf] %vm1734_vm10, %v1681_v60  ;;  %v5564_v33 = vor.u32 %v5899_v32, %v5561_v27  ;;  %v2196_v60 = vshrl.u32 %v1819_v6, 16  ;;  %v3610_v35 = vrot.slane %v3608_v11, 4  ;;  %v3895_v44 = vld [vmem:[%s6358_s27 + $0xa4] sm:$0xf] }
 0x272   : > { %v8135_v43 = vpop.f32.mrf.mxu2  ;;  %v3404_v16 = vshll.u32 %v8121_v2, 16 }
 0x273   : > { %4945 = vmatmul.bf16.gmra.mxu0 %v5656_v10  ;;  %5034 = vmatmul.bf16.gmra.mxu1 %v5564_v33  ;;  %v2202_v10 = vshll.u32 %v1820_v56, 16  ;;  %v3397_v33 = vsel %vm6368_vm2, %v3392_v4, %v8102_v28  ;;  %9206 = vst [vmem:[#allocation9_spill] sm:$0xff] %v8135_v43  ;;  %v5699_v4 = vld [vmem:[#allocation2 + $0x188] sm:$0xf]  ;;  %v4062_v43 = vrot.slane %v3895_v44, 5  ;;  %v3611_v46 = vor.u32 %v3610_v35, %v8075_v39 }
 0x274   : > { %3750 = vrot.lane.b32.xlu2 %v3607_v42, %s6281_s30  ;;  %v2198_v42 = vrot.slane %v2196_v60, 4  ;;  %v5927_v60 = vld [vmem:[#allocation2 + $0x158] sm:$0xf0] }
 0x275   : > { %2697 = vrot.lane.b32.xlu1 %v2576_v15, %s6279_s28  ;;  %v8137_v15 = vrot.slane %v2192_v22, 5  ;;  %v2204_v6 = vrot.slane %v2202_v10, 5  ;;  %v5934_v11 = vld [vmem:[#allocation2 + $0x190] sm:$0xf0]  ;;  %v3401_v22 = vor.u32 %v3400_v38, %v8102_v28  ;;  %v5668_v39 = vor.u32 %v5927_v60, %v5667_v57 }
 0x276   : > { %2695 = vrot.lane.b32.xlu0 %v2573_v9, %s6279_s28  ;;  %v8133_v14 = vpop.permute.xlu2 %2971  ;;  %v2867_v9 = vld [vmem:[%s6358_s27 + $0x68] sm:$0xf]  ;;  %v5700_v10 = vor.u32 %v5934_v11, %v5699_v4  ;;  %v8173_v44 = vpop.f32.mrf.mxu0  ;;  %v8176_v11 = vrot.slane %v3404_v16, 5 }
 0x277   : > { %v2970_v54 = vpop.permute.xlu1 %2969  ;;  %9207 = vst [vmem:[#allocation10_spill] sm:$0xff] %v8137_v15  ;;  %v2199_v45 = vor.u32 %v2198_v42, %v8137_v15  ;;  %v3402_v4 = vrot.slane %v3401_v22, 4  ;;  %v1996_v22 = vshrl.u32 %v8046_v41, 16  ;;  %v3897_v41 = vld [vmem:[%s6358_s27 + $0xac] sm:$0xf] }
 0x278   : > { %3100 = vst.msk [vmem:[#allocation2 + $0xa0] sm:$0xf] %vm1445_vm8, %v2970_v54  ;;  %v2968_v27 = vpop.permute.xlu0 %2967  ;;  %v5951_v47 = vld [vmem:[#allocation2 + $0x218] sm:$0xf0]  ;;  %v8145_v54 = vld [vmem:[%s6358_s27 + $0xa4] sm:$0xf]  ;;  %5873 = vmatmul.msk.bf16.gmra.mxu2 %vm4799_vm9, %v5700_v10 }
 0x279   : > { %3099 = vst.msk [vmem:[#allocation2 + $0x94] sm:$0xf] %vm1445_vm8, %v2968_v27  ;;  %v5764_v32 = vor.u32 %v5951_v47, %v5763_v53  ;;  %v2206_v53 = vshrl.u32 %v1820_v56, 16  ;;  %v8148_v27 = vld [vmem:[%s6358_s27 + $0xa8] sm:$0xf]  ;;  %v2212_v30 = vshll.u32 %v8145_v54, 16 }
 0x27a   : > { %3824 = vst.msk [vmem:[#allocation2 + $0x94] sm:$0xf] %vm1734_vm10, %v8030_v3  ;;  %v8151_v47 = vld [vmem:[%s6358_s27 + $0xc4] sm:$0xf]  ;;  %v9194_v56 = vrot.slane %v8126_v59, 5  ;;  %v2200_v28 = vrot.slane %v2199_v45, 4 }
 0x27b   : > { %4990 = vmatmul.bf16.gmra.mxu3 %v5764_v32  ;;  %v2208_v3 = vrot.slane %v2206_v53, 4  ;;  %v4061_v32 = vrot.slane %v4059_v17, 4  ;;  %v8161_v42 = vrot.slane %v2212_v30, 5  ;;  %v4065_v53 = vrot.slane %v8148_v27, 5 }
 0x27c   : > { %2983 = vrot.lane.b32.xlu2 %v2867_v9, %s6280_s29  ;;  %v3614_v17 = vshll.u32 %v8151_v47, 16  ;;  %v4064_v45 = vrot.slane %v4062_v43, 4  ;;  %v8183_v9 = vpop.f32.mrf.mxu2  ;;  %v3618_v60 = vshrl.u32 %v8151_v47, 16 }
 0x27d   : > { %3708 = vrot.lane.b32.xlu1 %v3397_v33, %s6281_s30  ;;  %v2209_v38 = vor.u32 %v2208_v3, %v2204_v6  ;;  %v9208_v33 = vrot.slane %v7967_v19, 5  ;;  %v2205_v19 = vsel %vm6368_vm2, %v2200_v28, %v2204_v6  ;;  %9209 = vst [vmem:[#allocation11_spill] sm:$0xff] %v8183_v9  ;;  %v4063_v10 = vsel %vm6623_vm7, %v4061_v32, %v4062_v43 }
 0x27e   : > { %2985 = vrot.lane.b32.xlu0 %v2868_v37, %s6280_s29  ;;  %v8171_v37 = vld [vmem:[%s6358_s27 + $0x68] sm:$0xf]  ;;  %v8181_v35 = vpop.permute.xlu2 %3698  ;;  %2400 = vst.msk [vmem:[#allocation2 + $0x1b4] sm:$0xf] %vm277_vm3, %v2205_v19  ;;  %v4066_v43 = vsel %vm6623_vm7, %v4064_v45, %v4065_v53  ;;  %v9210_v6 = vrot.slane %v8067_v62, 5  ;;  %v3612_v32 = vrot.slane %v3611_v46, 4 }
 0x27f   : > { %v1683_v15 = vpop.permute.xlu1 %1682  ;;  %v2637_v25 = vrot.slane %v9208_v33, 4  ;;  %v2210_v3 = vrot.slane %v2209_v38, 4  ;;  %v9195_v16 = vrot.slane %v8171_v37, 5  ;;  %v8208_v28 = vrot.slane %v3614_v17, 5  ;;  %4185 = vst.msk [vmem:[#allocation2 + $0x1a0] sm:$0xf] %vm277_vm3, %v4063_v10 }
 0x280   : > { %1781 = vst.msk [vmem:[#allocation2 + $0x228] sm:$0xf] %vm1734_vm10, %v1683_v15  ;;  %v3695_v30 = vpop.permute.xlu0 %3694  ;;  %v2642_v15 = vsel %vm6623_vm7, %v8117_v61, %v9194_v56  ;;  %v3407_v38 = vsel %vm6368_vm2, %v3402_v4, %v8176_v11  ;;  %v3408_v33 = vshrl.u32 %v8121_v2, 16  ;;  %v8225_v17 = vld [vmem:[%s6358_s27 + $0xc8] sm:$0xf]  ;;  %v3620_v45 = vrot.slane %v3618_v60, 4 }
 0x281   : > { %3825 = vst.msk [vmem:[#allocation2 + $0xa0] sm:$0xf] %vm1734_vm10, %v3695_v30  ;;  %v2215_v57 = vsel %vm6368_vm2, %v2210_v3, %v8161_v42  ;;  %v2639_v61 = vsel %vm6623_vm7, %v2637_v25, %v9210_v6  ;;  %v5954_v25 = vld [vmem:[#allocation2 + $0x230] sm:$0xf0]  ;;  %v8221_v47 = vrot.slane %v9195_v16, 4  ;;  %v4068_v30 = vrot.slane %v3897_v41, 5 }
 0x282   : > { %2401 = vst.msk [vmem:[#allocation2 + $0x1c0] sm:$0xf] %vm277_vm3, %v2215_v57  ;;  %v5902_v62 = vld [vmem:[#allocation2 + $0x94] sm:$0xf]  ;;  %v3617_v57 = vsel %vm6368_vm2, %v3612_v32, %v8208_v28  ;;  %v2889_v41 = vld [vmem:[%s6358_s27 + $0xc0] sm:$0xf] }
 0x283   : > { %4950 = vmatmul.bf16.gmra.mxu0 %v5668_v39  ;;  %4186 = vst.msk [vmem:[#allocation2 + $0x1ac] sm:$0xf] %vm277_vm3, %v4066_v43  ;;  %v1800_v39 = vld [vmem:[%s6358_s27 + $0x50] sm:$0xf]  ;;  %v8235_v43 = vld [vmem:[%s6358_s27 + $0x6c] sm:$0xf] }
 0x284   : > { %3710 = vrot.lane.b32.xlu2 %v3407_v38, %s6281_s30  ;;  %v8241_v60 = vpop.f32.mrf.mxu2  ;;  %v1998_v38 = vrot.slane %v1996_v22, 4  ;;  %v2006_v32 = vshrl.u32 %v1800_v39, 16  ;;  %v4070_v56 = vrot.slane %v4068_v30, 4 }
 0x285   : > { %2741 = vrot.lane.b32.xlu1 %v2642_v15, %s6279_s28  ;;  %v2890_v15 = vld [vmem:[%s6358_s27 + $0xc4] sm:$0xf]  ;;  %9211 = vst [vmem:[#allocation12_spill] sm:$0xff] %v8241_v60  ;;  %v3621_v60 = vor.u32 %v3620_v45, %v8208_v28  ;;  %v9196_v28 = vrot.slane %v8235_v43, 5  ;;  %v3158_v45 = vld [vmem:[%s6358_s27 + $0x74] sm:$0xf] }
 0x286   : > { %2739 = vrot.lane.b32.xlu0 %v2639_v61, %s6279_s28  ;;  %v8237_v6 = vpop.permute.xlu2 %3015  ;;  %v8239_v61 = vrot.slane %v3408_v33, 4  ;;  %v5711_v33 = vld [vmem:[#allocation2 + $0x1a0] sm:$0xf]  ;;  %v1999_v22 = vor.u32 %v1998_v38, %v8060_v0  ;;  %v2008_v9 = vrot.slane %v2006_v32, 4 }
 0x287   : > { %v2686_v46 = vpop.permute.xlu1 %2685  ;;  %v5775_v2 = vld [vmem:[#allocation2 + $0x228] sm:$0xf] }
 0x288   : > { %v2684_v4 = vpop.permute.xlu0 %2683  ;;  %2814 = vst.msk [vmem:[#allocation2 + $0xb8] sm:$0xf] %vm1006_vm4, %v2686_v46  ;;  %v5776_v19 = vor.u32 %v5954_v25, %v5775_v2  ;;  %v5573_v3 = vld [vmem:[#allocation2 + $0x9c] sm:$0xf0]  ;;  %v8244_v25 = vld [vmem:[%s6358_s27 + $0xb0] sm:$0xf] }
 0x289   : > { %2813 = vst.msk [vmem:[#allocation2 + $0xac] sm:$0xf] %vm1006_vm4, %v2684_v4  ;;  %v5576_v10 = vor.u32 %v5902_v62, %v5573_v3  ;;  %v3624_v62 = vshll.u32 %v8225_v17, 16  ;;  %v2002_v46 = vshll.u32 %v1800_v39, 16  ;;  %v4067_v2 = vrot.slane %v4065_v53, 4  ;;  %v8252_v4 = vpop.f32.mrf.mxu0 }
 0x28a   : > { %3101 = vst.msk [vmem:[#allocation2 + $0xac] sm:$0xf] %vm1445_vm8, %v8133_v14  ;;  %v8256_v3 = vld [vmem:[%s6358_s27 + $0x54] sm:$0xf]  ;;  %v4071_v14 = vrot.slane %v8244_v25, 5  ;;  %v2000_v5 = vrot.slane %v1999_v22, 4 }
 0x28b   : > { %4995 = vmatmul.bf16.gmra.mxu3 %v5776_v19  ;;  %5039 = vmatmul.bf16.gmra.mxu1 %v5576_v10  ;;  %v5937_v16 = vld [vmem:[#allocation2 + $0x1a8] sm:$0xf0]  ;;  %v2004_v39 = vrot.slane %v2002_v46, 5  ;;  %v2012_v27 = vshll.u32 %v8256_v3, 16  ;;  %v5679_v53 = vld [vmem:[#allocation2 + $0x168] sm:$0xf]  ;;  %v4069_v0 = vsel %vm6623_vm7, %v4067_v2, %v4068_v30 }
 0x28c   : > { %v5930_v19 = vld [vmem:[#allocation2 + $0x170] sm:$0xf0]  ;;  %v5712_v10 = vor.u32 %v5937_v16, %v5711_v33  ;;  %v4072_v38 = vsel %vm6623_vm7, %v4070_v56, %v4071_v14  ;;  %4187 = vst.msk [vmem:[#allocation2 + $0x1b8] sm:$0xf] %vm277_vm3, %v4069_v0  ;;  %3027 = vrot.lane.b32.xlu2 %v2889_v41, %s6280_s29  ;;  %v3411_v41 = vor.u32 %v8239_v61, %v8176_v11  ;;  %v9213_v11 = vrot.slane %v8171_v37, 5 }
 0x28d   : > { %3752 = vrot.lane.b32.xlu1 %v3617_v57, %s6281_s30  ;;  %v2009_v46 = vor.u32 %v2008_v9, %v2004_v39  ;;  %v8271_v32 = vrot.slane %v2012_v27, 5  ;;  %v9212_v57 = vrot.slane %v8040_v23, 5  ;;  %4188 = vst.msk [vmem:[#allocation2 + $0x1c4] sm:$0xf] %vm277_vm3, %v4072_v38  ;;  %v3622_v9 = vrot.slane %v3621_v60, 4 }
 0x28e   : > { %3029 = vrot.lane.b32.xlu0 %v2890_v15, %s6280_s29  ;;  %5874 = vmatmul.msk.bf16.gmra.mxu2 %vm4799_vm9, %v5712_v10  ;;  %v8280_v15 = vrot.slane %v3624_v62, 5  ;;  %v2005_v2 = vsel %vm6368_vm2, %v2000_v5, %v2004_v39  ;;  %v5680_v22 = vor.u32 %v5930_v19, %v5679_v53  ;;  %v3414_v27 = vshll.u32 %v3158_v45, 16  ;;  %v8287_v10 = vpop.permute.xlu2 %3742  ;;  %v8296_v5 = vpop.f32.mrf.mxu2 }
 0x28f   : > { %v3697_v16 = vpop.permute.xlu1 %3696  ;;  %v2577_v33 = vrot.slane %v9212_v57, 4  ;;  %v2010_v23 = vrot.slane %v2009_v46, 4  ;;  %v2582_v60 = vsel %vm6623_vm7, %v8221_v47, %v9196_v28  ;;  %2380 = vst.msk [vmem:[#allocation2 + $0xc4] sm:$0xf] %vm277_vm3, %v2005_v2  ;;  %v2216_v47 = vshrl.u32 %v8145_v54, 16 }
 0x290   : > { %v5010_v56 = vpop.f32.mrf.mxu1  ;;  %v2974_v30 = vpop.permute.xlu0 %2973  ;;  %3826 = vst.msk [vmem:[#allocation2 + $0xac] sm:$0xf] %vm1734_vm10, %v3697_v16  ;;  %v3418_v39 = vshrl.u32 %v3158_v45, 16  ;;  %v3627_v53 = vsel %vm6368_vm2, %v3622_v9, %v8280_v15  ;;  %v3412_v19 = vrot.slane %v3411_v41, 4  ;;  %v8318_v0 = vrot.slane %v3414_v27, 5 }
 0x291   : > { %3102 = vst.msk [vmem:[#allocation2 + $0xb8] sm:$0xf] %vm1445_vm8, %v2974_v30  ;;  %v2015_v62 = vsel %vm6368_vm2, %v2010_v23, %v8271_v32  ;;  %v2579_v61 = vsel %vm6623_vm7, %v2577_v33, %v9213_v11  ;;  %v8315_v37 = vpop.f32.mrf.mxu0  ;;  %v3628_v38 = vshrl.u32 %v8225_v17, 16  ;;  %v5011_v54 = vadd.f32 %v5010_v56, %v7842_v26  ;;  %v8330_v30 = vld [vmem:[%s6358_s27 + $0x78] sm:$0xf] }
 0x292   : > { %3827 = vst.msk [vmem:[#allocation2 + $0xb8] sm:$0xf] %vm1734_vm10, %v8181_v35  ;;  %v8307_v35 = vld [vmem:[%s6358_s27 + $0xc0] sm:$0xf]  ;;  %v3420_v26 = vrot.slane %v3418_v39, 4  ;;  %v2218_v2 = vrot.slane %v2216_v47, 4  ;;  %v3417_v41 = vsel %vm6368_vm2, %v3412_v19, %v8318_v0 }
 0x293   : > { %4955 = vmatmul.bf16.gmra.mxu0 %v5680_v22  ;;  %2381 = vst.msk [vmem:[#allocation2 + $0xd0] sm:$0xf] %vm277_vm3, %v2015_v62  ;;  %v2644_v45 = vrot.slane %v8307_v35, 5  ;;  %v5723_v46 = vld [vmem:[#allocation2 + $0x1b8] sm:$0xf]  ;;  %v5140_v11 = vadd.f32 %v7462_v21, %v5011_v54 }
 0x294   : > { %3754 = vrot.lane.b32.xlu2 %v3627_v53, %s6281_s30  ;;  %v5940_v33 = vld [vmem:[#allocation2 + $0x1c0] sm:$0xf0]  ;;  %v1822_v56 = vld [vmem:[%s6358_s27 + $0xa8] sm:$0xf]  ;;  %v2219_v53 = vor.u32 %v2218_v2, %v8161_v42  ;;  %v3421_v54 = vor.u32 %v3420_v26, %v8318_v0  ;;  %v3180_v42 = vld [vmem:[%s6358_s27 + $0xcc] sm:$0xf] }
 0x295   : > { %2701 = vrot.lane.b32.xlu1 %v2582_v60, %s6279_s28  ;;  %v3630_v60 = vrot.slane %v3628_v38, 4  ;;  %v2222_v62 = vshll.u32 %v1822_v56, 16  ;;  %v5724_v47 = vor.u32 %v5940_v33, %v5723_v46  ;;  %v8353_v38 = vld [vmem:[%s6358_s27 + $0xc4] sm:$0xf]  ;;  %v3424_v46 = vshll.u32 %v8330_v30, 16 }
 0x296   : > { %2699 = vrot.lane.b32.xlu0 %v2579_v61, %s6279_s28  ;;  %v8339_v27 = vpop.permute.xlu2 %2975  ;;  %v8345_v39 = vpop.f32.mrf.mxu2  ;;  %v5691_v26 = vld [vmem:[#allocation2 + $0x180] sm:$0xf] }
 0x297   : > { %v2730_v16 = vpop.permute.xlu1 %2729  ;;  %v5905_v57 = vld [vmem:[#allocation2 + $0xac] sm:$0xf]  ;;  %v8379_v28 = vrot.slane %v3424_v46, 5  ;;  %v3638_v46 = vshrl.u32 %v3180_v42, 16 }
 0x298   : > { %v5012_v9 = vpop.f32.mrf.mxu1  ;;  %v2728_v17 = vpop.permute.xlu0 %2727  ;;  %2836 = vst.msk [vmem:[#allocation2 + $0x1c0] sm:$0xf] %vm1006_vm4, %v2730_v16  ;;  %v8349_v16 = vld [vmem:[%s6358_s27 + $0xac] sm:$0xf] }
 0x299   : > { %v5013_v23 = vadd.f32 %v5012_v9, %v7897_v8  ;;  %2835 = vst.msk [vmem:[#allocation2 + $0x1b4] sm:$0xf] %vm1006_vm4, %v2728_v17  ;;  %v5585_v22 = vld [vmem:[#allocation2 + $0xb4] sm:$0xf0]  ;;  %v2870_v8 = vld [vmem:[%s6358_s27 + $0x74] sm:$0xf] }
 0x29a   : > { %3123 = vst.msk [vmem:[#allocation2 + $0x1b4] sm:$0xf] %vm1445_vm8, %v8237_v6  ;;  %v5588_v61 = vor.u32 %v5905_v57, %v5585_v22  ;;  %v2224_v9 = vrot.slane %v2222_v62, 5  ;;  %v2226_v17 = vshrl.u32 %v1822_v56, 16  ;;  %v2232_v21 = vshll.u32 %v8349_v16, 16  ;;  %v8365_v22 = vpop.f32.mrf.mxu0 }
 0x29b   : > { %v5142_v19 = vadd.f32 %v7497_v49, %v5013_v23  ;;  %v2869_v6 = vld [vmem:[%s6358_s27 + $0x70] sm:$0xf]  ;;  %v2220_v57 = vrot.slane %v2219_v53, 4  ;;  %v5933_v49 = vld [vmem:[#allocation2 + $0x188] sm:$0xf0]  ;;  %v2646_v56 = vrot.slane %v2644_v45, 4 }
 0x29c   : > { %5044 = vmatmul.bf16.gmra.mxu1 %v5588_v61  ;;  %v2228_v2 = vrot.slane %v2226_v17, 4  ;;  %v2647_v23 = vrot.slane %v8353_v38, 5  ;;  %2987 = vrot.lane.b32.xlu2 %v2869_v6, %s6280_s29  ;;  %v3634_v17 = vshll.u32 %v3180_v42, 16 }
 0x29d   : > { %v5977_v33 = vpack.c.bf16 %v5142_v19, %v5140_v11  ;;  %3712 = vrot.lane.b32.xlu1 %v3417_v41, %s6281_s30  ;;  %v9214_v41 = vrot.slane %v8126_v59, 5  ;;  %v3631_v11 = vor.u32 %v3630_v60, %v8280_v15  ;;  %v2225_v59 = vsel %vm6368_vm2, %v2220_v57, %v2224_v9 }
 0x29e   : > { %2989 = vrot.lane.b32.xlu0 %v2870_v8, %s6280_s29  ;;  %5875 = vmatmul.msk.bf16.gmra.mxu2 %vm4799_vm9, %v5724_v47  ;;  %v2229_v61 = vor.u32 %v2228_v2, %v2224_v9  ;;  %v8376_v8 = vrot.slane %v2232_v21, 5  ;;  %v5692_v47 = vor.u32 %v5933_v49, %v5691_v26  ;;  %v8384_v6 = vpop.permute.xlu2 %3702  ;;  %v2648_v60 = vsel %vm6623_vm7, %v2646_v56, %v2647_v23  ;;  %v8392_v21 = vpop.f32.mrf.mxu2  ;;  %v8406_v49 = vld [vmem:[%s6358_s27 + $0x70] sm:$0xf] }
 0x29f   : > { %5978 = vst [vmem:[%s8368_s3] sm:$0xff] %v5977_v33   ;;  %v3741_v0 = vpop.permute.xlu1 %3740  ;;  %v2643_v62 = vrot.slane %v9214_v41, 4  ;;  %v3422_v33 = vrot.slane %v3421_v54, 4  ;;  %v2016_v54 = vshrl.u32 %v8256_v3, 16  ;;  %v3632_v57 = vrot.slane %v3631_v11, 4  ;;  %v8419_v26 = vld [vmem:[%s6358_s27 + $0xd0] sm:$0xf] }
 0x2a0   : > { %v5015_v53 = vpop.f32.mrf.mxu1  ;;  %v3018_v19 = vpop.permute.xlu0 %3017  ;;  %3848 = vst.msk [vmem:[#allocation2 + $0x1b4] sm:$0xf] %vm1734_vm10, %v3741_v0  ;;  %v2230_v15 = vrot.slane %v2229_v61, 4  ;;  %v8403_v2 = vrot.slane %v3634_v17, 5  ;;  %v2584_v0 = vrot.slane %v8406_v49, 5  ;;  %v3640_v41 = vrot.slane %v3638_v46, 4 }
 0x2a1   : > { %3124 = vst.msk [vmem:[#allocation2 + $0x1c0] sm:$0xf] %vm1445_vm8, %v3018_v19  ;;  %v2645_v9 = vsel %vm6623_vm7, %v2643_v62, %v2644_v45  ;;  %v3427_v35 = vsel %vm6368_vm2, %v3422_v33, %v8379_v28  ;;  %v5016_v3 = vadd.f32 %v5015_v53, %v7945_v20  ;;  %v3899_v45 = vld [vmem:[%s6358_s27 + $0xb4] sm:$0xf]  ;;  %v1802_v53 = vld [vmem:[%s6358_s27 + $0x58] sm:$0xf] }
 0x2a2   : > { %3849 = vst.msk [vmem:[#allocation2 + $0x1c0] sm:$0xf] %vm1734_vm10, %v8287_v10  ;;  %v2235_v10 = vsel %vm6368_vm2, %v2230_v15, %v8376_v8  ;;  %v3637_v20 = vsel %vm6368_vm2, %v3632_v57, %v8403_v2  ;;  %v8426_v61 = vld [vmem:[%s6358_s27 + $0x74] sm:$0xf]  ;;  %v2018_v19 = vrot.slane %v2016_v54, 4  ;;  %v4073_v17 = vrot.slane %v4071_v14, 4  ;;  %v8431_v33 = vpop.f32.mrf.mxu0 }
 0x2a3   : > { %4960 = vmatmul.bf16.gmra.mxu0 %v5692_v47  ;;  %2402 = vst.msk [vmem:[#allocation2 + $0x1cc] sm:$0xf] %vm277_vm3, %v2225_v59  ;;  %v5145_v59 = vadd.f32 %v7540_v29, %v5016_v3  ;;  %v2022_v54 = vshll.u32 %v1802_v53, 16  ;;  %v4074_v57 = vrot.slane %v3899_v45, 5 }
 0x2a4   : > { %2403 = vst.msk [vmem:[#allocation2 + $0x1d8] sm:$0xf] %vm277_vm3, %v2235_v10  ;;  %3714 = vrot.lane.b32.xlu2 %v3427_v35, %s6281_s30  ;;  %v2019_v29 = vor.u32 %v2018_v19, %v8271_v32  ;;  %v8446_v10 = vld [vmem:[%s6358_s27 + $0x5c] sm:$0xf] }
 0x2a5   : > { %2745 = vrot.lane.b32.xlu1 %v2648_v60, %s6279_s28  ;;  %v2892_v60 = vld [vmem:[%s6358_s27 + $0xcc] sm:$0xf]  ;;  %v2024_v3 = vrot.slane %v2022_v54, 5  ;;  %v4075_v45 = vsel %vm6623_vm7, %v4073_v17, %v4074_v57 }
 0x2a6   : > { %2743 = vrot.lane.b32.xlu0 %v2645_v9, %s6279_s28  ;;  %v3428_v9 = vshrl.u32 %v8330_v30, 16  ;;  %v8438_v46 = vpop.permute.xlu2 %3019  ;;  %v8442_v14 = vpop.f32.mrf.mxu2  ;;  %v3644_v30 = vshll.u32 %v8419_v26, 16  ;;  %v2020_v32 = vrot.slane %v2019_v29, 4  ;;  %4189 = vst.msk [vmem:[#allocation2 + $0x1d0] sm:$0xf] %vm277_vm3, %v4075_v45 }
 0x2a7   : > { %v2690_v42 = vpop.permute.xlu1 %2689  ;;  %v5938_v56 = vld [vmem:[#allocation2 + $0x1b4] sm:$0xf] }
 0x2a8   : > { %v5017_v62 = vpop.f32.mrf.mxu1  ;;  %v2688_v11 = vpop.permute.xlu0 %2687  ;;  %2816 = vst.msk [vmem:[#allocation2 + $0xd0] sm:$0xf] %vm1006_vm4, %v2690_v42  ;;  %v2032_v42 = vshll.u32 %v8446_v10, 16  ;;  %v8473_v45 = vrot.slane %v3644_v30, 5 }
 0x2a9   : > { %v5018_v47 = vadd.f32 %v5017_v62, %v7995_v58  ;;  %2815 = vst.msk [vmem:[#allocation2 + $0xc4] sm:$0xf] %vm1006_vm4, %v2688_v11  ;;  %v5717_v15 = vld [vmem:[#allocation2 + $0x1bc] sm:$0xf0]  ;;  %v2026_v58 = vshrl.u32 %v1802_v53, 16  ;;  %v3641_v11 = vor.u32 %v3640_v41, %v8403_v2 }
 0x2aa   : > { %3103 = vst.msk [vmem:[#allocation2 + $0xc4] sm:$0xf] %vm1445_vm8, %v8339_v27  ;;  %v5720_v25 = vor.u32 %v5938_v56, %v5717_v15  ;;  %v8452_v62 = vld [vmem:[%s6358_s27 + $0xb8] sm:$0xf]  ;;  %v5936_v27 = vld [vmem:[#allocation2 + $0x1a0] sm:$0xf0] }
 0x2ab   : > { %v5147_v35 = vadd.f32 %v7583_v51, %v5018_v47  ;;  %v2891_v56 = vld [vmem:[%s6358_s27 + $0xc8] sm:$0xf]  ;;  %v2028_v53 = vrot.slane %v2026_v58, 4  ;;  %v2586_v51 = vrot.slane %v2584_v0, 4  ;;  %v2587_v47 = vrot.slane %v8426_v61, 5 }
 0x2ac   : > { %5099 = vmatmul.bf16.vlgmr.msrb.gmra.mxu3 %v5720_v25  ;;  %v3430_v15 = vrot.slane %v3428_v9, 4  ;;  %v5703_v2 = vld [vmem:[#allocation2 + $0x198] sm:$0xf]  ;;  %v8464_v54 = vrot.slane %v2032_v42, 5  ;;  %v4076_v25 = vrot.slane %v4074_v57, 4  ;;  %v4077_v17 = vrot.slane %v8452_v62, 5  ;;  %3031 = vrot.lane.b32.xlu2 %v2891_v56, %s6280_s29 }
 0x2ad   : > { %v5982_v19 = vpack.c.bf16 %v5147_v35, %v5145_v59  ;;  %3756 = vrot.lane.b32.xlu1 %v3637_v20, %s6281_s30  ;;  %v2029_v41 = vor.u32 %v2028_v53, %v2024_v3  ;;  %v9215_v20 = vrot.slane %v8235_v43, 5  ;;  %v3160_v58 = vld [vmem:[%s6358_s27 + $0x7c] sm:$0xf]  ;;  %v2025_v57 = vsel %vm6368_vm2, %v2020_v32, %v2024_v3  ;;  %v8496_v32 = vpop.f32.mrf.mxu0 }
 0x2ae   : > { %3033 = vrot.lane.b32.xlu0 %v2892_v60, %s6280_s29  ;;  %v3642_v60 = vrot.slane %v3641_v11, 4  ;;  %v5704_v53 = vor.u32 %v5936_v27, %v5703_v2  ;;  %v2588_v43 = vsel %vm6623_vm7, %v2586_v51, %v2587_v47  ;;  %v8482_v56 = vpop.permute.xlu2 %3746  ;;  %v3431_v30 = vor.u32 %v3430_v15, %v8379_v28  ;;  %2382 = vst.msk [vmem:[#allocation2 + $0xdc] sm:$0xf] %vm277_vm3, %v2025_v57  ;;  %v8505_v15 = vld [vmem:[%s6358_s27 + $0xc8] sm:$0xf] }
 0x2af   : > { %6094 = vst [vmem:[%s8368_s3 + $0x8] sm:$0xff] %v5982_v19   ;;  %v3701_v59 = vpop.permute.xlu1 %3700  ;;  %v2583_v29 = vrot.slane %v9215_v20, 4  ;;  %v2030_v42 = vrot.slane %v2029_v41, 4  ;;  %v3434_v11 = vshll.u32 %v3160_v58, 16  ;;  %v8487_v19 = vpop.f32.mrf.mxu2  ;;  %v4078_v27 = vsel %vm6623_vm7, %v4076_v25, %v4077_v17 }
 0x2b0   : > { %v5020_v9 = vpop.f32.mrf.mxu1  ;;  %v2978_v35 = vpop.permute.xlu0 %2977  ;;  %3828 = vst.msk [vmem:[#allocation2 + $0xc4] sm:$0xf] %vm1734_vm10, %v3701_v59  ;;  %v2236_v51 = vshrl.u32 %v8349_v16, 16  ;;  %v3647_v2 = vsel %vm6368_vm2, %v3642_v60, %v8473_v45  ;;  %v3432_v49 = vrot.slane %v3431_v30, 4  ;;  %v2650_v59 = vrot.slane %v8505_v15, 5 }
 0x2b1   : > { %3104 = vst.msk [vmem:[#allocation2 + $0xd0] sm:$0xf] %vm1445_vm8, %v2978_v35  ;;  %v2035_v3 = vsel %vm6368_vm2, %v2030_v42, %v8464_v54  ;;  %v2585_v28 = vsel %vm6623_vm7, %v2583_v29, %v2584_v0  ;;  %v3436_v0 = vrot.slane %v3434_v11, 5  ;;  %v5021_v16 = vadd.f32 %v5020_v9, %v8053_v50  ;;  %v8520_v60 = vld [vmem:[%s6358_s27 + $0x80] sm:$0xf] }
 0x2b2   : > { %3829 = vst.msk [vmem:[#allocation2 + $0xd0] sm:$0xf] %vm1734_vm10, %v8384_v6  ;;  %v3438_v6 = vshrl.u32 %v3160_v58, 16  ;;  %v3648_v35 = vshrl.u32 %v8419_v26, 16  ;;  %v2238_v57 = vrot.slane %v2236_v51, 4 }
 0x2b3   : > { %4965 = vmatmul.bf16.gmra.mxu0 %v5704_v53  ;;  %2383 = vst.msk [vmem:[#allocation2 + $0xe8] sm:$0xf] %vm277_vm3, %v2035_v3  ;;  %v2872_v42 = vld [vmem:[%s6358_s27 + $0x7c] sm:$0xf]  ;;  %v3437_v26 = vsel %vm6368_vm2, %v3432_v49, %v3436_v0  ;;  %v2460_v11 = vld [vmem:[%s6358_s27 + $0xcc] sm:$0x1] }
 0x2b4   : > { %4190 = vst.msk [vmem:[#allocation2 + $0x1dc] sm:$0xf] %vm277_vm3, %v4078_v27  ;;  %3758 = vrot.lane.b32.xlu2 %v3647_v2, %s6281_s30  ;;  %v3440_v20 = vrot.slane %v3438_v6, 4  ;;  %v5735_v3 = vld [vmem:[#allocation2 + $0x1d0] sm:$0xf]  ;;  %v2239_v27 = vor.u32 %v2238_v57, %v8376_v8  ;;  %v2653_v57 = vrot.slane %v2460_v11, 5 }
 0x2b5   : > { %2705 = vrot.lane.b32.xlu1 %v2588_v43, %s6279_s28  ;;  %v1824_v43 = vld [vmem:[%s6358_s27 + $0xb0] sm:$0xf]  ;;  %v2871_v6 = vld [vmem:[%s6358_s27 + $0x78] sm:$0xf] }
 0x2b6   : > { %2703 = vrot.lane.b32.xlu0 %v2585_v28, %s6279_s28  ;;  %v8525_v53 = vpop.permute.xlu2 %2979  ;;  %v3441_v2 = vor.u32 %v3440_v20, %v3436_v0  ;;  %v2242_v8 = vshll.u32 %v1824_v43, 16  ;;  %v3650_v0 = vrot.slane %v3648_v35, 4  ;;  %v2652_v20 = vrot.slane %v2650_v59, 4 }
 0x2b7   : > { %v2734_v41 = vpop.permute.xlu1 %2733  ;;  %v5908_v25 = vld [vmem:[#allocation2 + $0xc4] sm:$0xf]  ;;  %v8537_v51 = vpop.f32.mrf.mxu2 }
 0x2b8   : > { %v5022_v29 = vpop.f32.mrf.mxu1  ;;  %v2732_v58 = vpop.permute.xlu0 %2731  ;;  %2838 = vst.msk [vmem:[#allocation2 + $0x1d8] sm:$0xf] %vm1006_vm4, %v2734_v41  ;;  %v3444_v41 = vshll.u32 %v8520_v60, 16  ;;  %v3651_v38 = vor.u32 %v3650_v0, %v8473_v45  ;;  %v2036_v45 = vshrl.u32 %v8446_v10, 16  ;;  %v8591_v10 = vld [vmem:[%s6358_s27 + $0x78] sm:$0xf] }
 0x2b9   : > { %v5023_v50 = vadd.f32 %v5022_v29, %v8112_v48  ;;  %2837 = vst.msk [vmem:[#allocation2 + $0x1cc] sm:$0xf] %vm1006_vm4, %v2732_v58  ;;  %v5597_v9 = vld [vmem:[#allocation2 + $0xcc] sm:$0xf0]  ;;  %v5150_v48 = vadd.f32 %v7619_v13, %v5021_v16  ;;  %v2240_v29 = vrot.slane %v2239_v27, 4  ;;  %v2246_v58 = vshrl.u32 %v1824_v43, 16 }
 0x2ba   : > { %3125 = vst.msk [vmem:[#allocation2 + $0x1cc] sm:$0xf] %vm1445_vm8, %v8438_v46  ;;  %v5600_v30 = vor.u32 %v5908_v25, %v5597_v9  ;;  %v8541_v46 = vld [vmem:[%s6358_s27 + $0xb4] sm:$0xf]  ;;  %v8543_v25 = vpop.f32.mrf.mxu3  ;;  %v2244_v9 = vrot.slane %v2242_v8, 5  ;;  %v2649_v43 = vrot.slane %v2647_v23, 4 }
 0x2bb   : > { %v5152_v28 = vadd.f32 %v7654_v55, %v5023_v50  ;;  %v5943_v49 = vld [vmem:[#allocation2 + $0x1d8] sm:$0xf0]  ;;  %v2252_v13 = vshll.u32 %v8541_v46, 16  ;;  %v3182_v50 = vld [vmem:[%s6358_s27 + $0xd4] sm:$0xf]  ;;  %v3652_v8 = vrot.slane %v3651_v38, 4 }
 0x2bc   : > { %5049 = vmatmul.bf16.gmra.mxu1 %v5600_v30  ;;  %v5736_v16 = vor.u32 %v5943_v49, %v5735_v3  ;;  %v2248_v30 = vrot.slane %v2246_v58, 4  ;;  %2991 = vrot.lane.b32.xlu2 %v2871_v6, %s6280_s29  ;;  %v2245_v11 = vsel %vm6368_vm2, %v2240_v29, %v2244_v9  ;;  %v3654_v23 = vshll.u32 %v3182_v50, 16  ;;  %v3183_v38 = vld [vmem:[%s6358_s27 + $0xd8] sm:$0x1] }
 0x2bd   : > { %v5987_v55 = vpack.c.bf16 %v5152_v28, %v5150_v48  ;;  %3716 = vrot.lane.b32.xlu1 %v3437_v26, %s6281_s30  ;;  %v3442_v26 = vrot.slane %v3441_v2, 4  ;;  %v8561_v48 = vrot.slane %v2252_v13, 5  ;;  %v2654_v6 = vsel %vm6623_vm7, %v2652_v20, %v2653_v57  ;;  %2404 = vst.msk [vmem:[#allocation2 + $0x1e4] sm:$0xf] %vm277_vm3, %v2245_v11  ;;  %v1804_v13 = vld [vmem:[%s6358_s27 + $0x60] sm:$0xf] }
 0x2be   : > { %2993 = vrot.lane.b32.xlu0 %v2872_v42, %s6280_s29  ;;  %5876 = vmatmul.msk.bf16.gmra.mxu2 %vm4799_vm9, %v5736_v16  ;;  %v8557_v42 = vrot.slane %v3444_v41, 5  ;;  %v2249_v3 = vor.u32 %v2248_v30, %v2244_v9  ;;  %v8565_v28 = vpop.permute.xlu2 %3706  ;;  %v2651_v41 = vsel %vm6623_vm7, %v2649_v43, %v2650_v59  ;;  %v3658_v49 = vshrl.u32 %v3182_v50, 16 }
 0x2bf   : > { %6095 = vst [vmem:[%s8368_s3 + $0x10] sm:$0xff] %v5987_v55   ;;  %v3745_v27 = vpop.permute.xlu1 %3744  ;;  %v3656_v15 = vrot.slane %v3654_v23, 5  ;;  %v8584_v58 = vpop.f32.mrf.mxu2  ;;  %v2042_v0 = vshll.u32 %v1804_v13, 16  ;;  %v2038_v9 = vrot.slane %v2036_v45, 4  ;;  %v2046_v30 = vshrl.u32 %v1804_v13, 16 }
 0x2c0   : > { %v3022_v35 = vpop.permute.xlu0 %3021  ;;  %3850 = vst.msk [vmem:[#allocation2 + $0x1cc] sm:$0xf] %vm1734_vm10, %v3745_v27  ;;  %v2250_v2 = vrot.slane %v2249_v3, 4  ;;  %v3660_v50 = vrot.slane %v3658_v49, 4  ;;  %v3448_v3 = vshrl.u32 %v8520_v60, 16 }
 0x2c1   : > { %3126 = vst.msk [vmem:[#allocation2 + $0x1d8] sm:$0xf] %vm1445_vm8, %v3022_v35  ;;  %v3657_v43 = vsel %vm6368_vm2, %v3652_v8, %v3656_v15  ;;  %v2039_v23 = vor.u32 %v2038_v9, %v8464_v54  ;;  %v8612_v45 = vld [vmem:[%s6358_s27 + $0x64] sm:$0xf]  ;;  %v2893_v49 = vld [vmem:[%s6358_s27 + $0xd0] sm:$0xf] }
 0x2c2   : > { %3851 = vst.msk [vmem:[#allocation2 + $0x1d8] sm:$0xf] %vm1734_vm10, %v8482_v56  ;;  %v3447_v56 = vsel %vm6368_vm2, %v3442_v26, %v8557_v42  ;;  %v2255_v29 = vsel %vm6368_vm2, %v2250_v2, %v8561_v48  ;;  %v8587_v59 = vpop.f32.mrf.mxu3  ;;  %v2590_v26 = vrot.slane %v8591_v10, 5  ;;  %v2894_v2 = vld [vmem:[%s6358_s27 + $0xd4] sm:$0xf]  ;;  %v2048_v10 = vrot.slane %v2046_v30, 4 }
 0x2c3   : > { %2405 = vst.msk [vmem:[#allocation2 + $0x1f0] sm:$0xf] %vm277_vm3, %v2255_v29  ;;  %v3664_v29 = vshll.u32 %v3183_v38, 16  ;;  %v2040_v8 = vrot.slane %v2039_v23, 4  ;;  %v2052_v60 = vshll.u32 %v8612_v45, 16 }
 0x2c4   : > { %3718 = vrot.lane.b32.xlu2 %v3447_v56, %s6281_s30  ;;  %v3661_v56 = vor.u32 %v3660_v50, %v3656_v15  ;;  %v2589_v50 = vrot.slane %v2587_v47, 4  ;;  %v3162_v9 = vld [vmem:[%s6358_s27 + $0x84] sm:$0xf] }
 0x2c5   : > { %2749 = vrot.lane.b32.xlu1 %v2654_v6, %s6279_s28  ;;  %v2044_v6 = vrot.slane %v2042_v0, 5  ;;  %v3666_v38 = vrot.slane %v3664_v29, 5 }
 0x2c6   : > { %2747 = vrot.lane.b32.xlu0 %v2651_v41, %s6279_s28  ;;  %v8600_v35 = vpop.permute.xlu2 %3023  ;;  %v8609_v41 = vld [vmem:[%s6358_s27 + $0x7c] sm:$0xf] }
 0x2c7   : > { %v2694_v55 = vpop.permute.xlu1 %2693  ;;  %v5941_v16 = vld [vmem:[#allocation2 + $0x1cc] sm:$0xf]  ;;  %v2593_v54 = vrot.slane %v8609_v41, 5  ;;  %v2049_v15 = vor.u32 %v2048_v10, %v2044_v6  ;;  %v3163_v10 = vld [vmem:[%s6358_s27 + $0x88] sm:$0xf] }
 0x2c8   : > { %v5025_v20 = vpop.f32.mrf.mxu1  ;;  %v2692_v57 = vpop.permute.xlu0 %2691  ;;  %2818 = vst.msk [vmem:[#allocation2 + $0xe8] sm:$0xf] %vm1006_vm4, %v2694_v55  ;;  %v3450_v55 = vrot.slane %v3448_v3, 4  ;;  %v3662_v3 = vrot.slane %v3661_v56, 4  ;;  %v2256_v56 = vshrl.u32 %v8541_v46, 16 }
 0x2c9   : > { %2817 = vst.msk [vmem:[#allocation2 + $0xdc] sm:$0xf] %vm1006_vm4, %v2692_v57  ;;  %v5729_v27 = vld [vmem:[#allocation2 + $0x1d4] sm:$0xf0]  ;;  %v5026_v0 = vadd.f32 %v5025_v20, %v8173_v44  ;;  %v8628_v30 = vpop.f32.mrf.mxu2  ;;  %v2050_v44 = vrot.slane %v2049_v15, 4 }
 0x2ca   : > { %3105 = vst.msk [vmem:[#allocation2 + $0xdc] sm:$0xf] %vm1445_vm8, %v8525_v53  ;;  %v5732_v11 = vor.u32 %v5941_v16, %v5729_v27  ;;  %v2592_v53 = vrot.slane %v2590_v26, 4  ;;  %v8617_v13 = vpop.f32.mrf.mxu3  ;;  %v2045_v16 = vsel %vm6368_vm2, %v2040_v8, %v2044_v6  ;;  %v8631_v27 = vrot.slane %v2052_v60, 5  ;;  %v1826_v60 = vld [vmem:[%s6358_s27 + $0xb8] sm:$0xf] }
 0x2cb   : > { %2384 = vst.msk [vmem:[#allocation2 + $0xf4] sm:$0xf] %vm277_vm3, %v2045_v16  ;;  %v3451_v23 = vor.u32 %v3450_v55, %v8557_v42  ;;  %v3454_v6 = vshll.u32 %v3162_v9, 16  ;;  %v3458_v42 = vshrl.u32 %v3162_v9, 16  ;;  %v3667_v29 = vsel %vm6368_vm2, %v3662_v3, %v3666_v38 }
 0x2cc   : > { %5104 = vmatmul.bf16.gmra.mxu3 %v5732_v11  ;;  %3035 = vrot.lane.b32.xlu2 %v2893_v49, %s6280_s29  ;;  %v2594_v47 = vsel %vm6623_vm7, %v2592_v53, %v2593_v54  ;;  %v2262_v16 = vshll.u32 %v1826_v60, 16  ;;  %v2266_v15 = vshrl.u32 %v1826_v60, 16 }
 0x2cd   : > { %3760 = vrot.lane.b32.xlu1 %v3657_v43, %s6281_s30  ;;  %v3456_v53 = vrot.slane %v3454_v6, 5  ;;  %v3460_v9 = vrot.slane %v3458_v42, 4 }
 0x2ce   : > { %3037 = vrot.lane.b32.xlu0 %v2894_v2, %s6280_s29  ;;  %v8636_v61 = vpop.permute.xlu2 %3750  ;;  %v5155_v2 = vadd.f32 %v7685_v63, %v5026_v0  ;;  %v3452_v63 = vrot.slane %v3451_v23, 4  ;;  %v2264_v38 = vrot.slane %v2262_v16, 5  ;;  %v3164_v16 = vld [vmem:[%s6358_s27 + $0x8c] sm:$0xf] }
 0x2cf   : > { %v3705_v57 = vpop.permute.xlu1 %3704 }
 0x2d0   : > { %v5027_v43 = vpop.f32.mrf.mxu1  ;;  %v2982_v11 = vpop.permute.xlu0 %2981  ;;  %3830 = vst.msk [vmem:[#allocation2 + $0xdc] sm:$0xf] %vm1734_vm10, %v3705_v57  ;;  %v3464_v57 = vshll.u32 %v3163_v10, 16  ;;  %v3457_v23 = vsel %vm6368_vm2, %v3452_v63, %v3456_v53 }
 0x2d1   : > { %v5028_v20 = vadd.f32 %v5027_v43, %v8252_v4  ;;  %3106 = vst.msk [vmem:[#allocation2 + $0xe8] sm:$0xf] %vm1445_vm8, %v2982_v11  ;;  %v2055_v4 = vsel %vm6368_vm2, %v2050_v44, %v8631_v27  ;;  %v8665_v46 = vpop.f32.mrf.mxu2  ;;  %v2258_v43 = vrot.slane %v2256_v56, 4  ;;  %v2268_v44 = vrot.slane %v2266_v15, 4  ;;  %v8684_v56 = vld [vmem:[%s6358_s27 + $0x84] sm:$0xf] }
 0x2d2   : > { %3831 = vst.msk [vmem:[#allocation2 + $0xe8] sm:$0xf] %vm1734_vm10, %v8565_v28  ;;  %v2591_v28 = vsel %vm6623_vm7, %v2589_v50, %v2590_v26  ;;  %v3468_v50 = vshrl.u32 %v3163_v10, 16  ;;  %v3466_v63 = vrot.slane %v3464_v57, 5 }
 0x2d3   : > { %v5157_v49 = vadd.f32 %v7723_v7, %v5028_v20  ;;  %2385 = vst.msk [vmem:[#allocation2 + $0x100] sm:$0xf] %vm277_vm3, %v2055_v4  ;;  %v8660_v7 = vld [vmem:[%s6358_s27 + $0x80] sm:$0xf]  ;;  %v8669_v20 = vpop.f32.mrf.mxu3  ;;  %v2269_v42 = vor.u32 %v2268_v44, %v2264_v38 }
 0x2d4   : > { %3762 = vrot.lane.b32.xlu2 %v3667_v29, %s6281_s30  ;;  %v2596_v6 = vrot.slane %v8660_v7, 5  ;;  %v3470_v7 = vrot.slane %v3468_v50, 4 }
 0x2d5   : > { %v5992_v8 = vpack.c.bf16 %v5157_v49, %v5155_v2  ;;  %2709 = vrot.lane.b32.xlu1 %v2594_v47, %s6279_s28  ;;  %v2259_v2 = vor.u32 %v2258_v43, %v8561_v48  ;;  %v8680_v49 = vld [vmem:[%s6358_s27 + $0xbc] sm:$0xf]  ;;  %v2270_v60 = vrot.slane %v2269_v42, 4 }
 0x2d6   : > { %2707 = vrot.lane.b32.xlu0 %v2591_v28, %s6279_s28  ;;  %v8676_v4 = vpop.permute.xlu2 %2983  ;;  %v2874_v28 = vld [vmem:[%s6358_s27 + $0x84] sm:$0xf]  ;;  %v2272_v29 = vshll.u32 %v8680_v49, 16  ;;  %v2598_v48 = vrot.slane %v2596_v6, 4 }
 0x2d7   : > { %6096 = vst [vmem:[%s8368_s3 + $0x18] sm:$0xff] %v5992_v8   ;;  %v2738_v26 = vpop.permute.xlu1 %2737  ;;  %v5911_v55 = vld [vmem:[#allocation2 + $0xdc] sm:$0xf]  ;;  %v3461_v8 = vor.u32 %v3460_v9, %v3456_v53  ;;  %v2260_v10 = vrot.slane %v2259_v2, 4  ;;  %v2595_v53 = vrot.slane %v2593_v54, 4  ;;  %v3471_v54 = vor.u32 %v3470_v7, %v3466_v63 }
 0x2d8   : > { %v2736_v0 = vpop.permute.xlu0 %2735  ;;  %2840 = vst.msk [vmem:[#allocation2 + $0x1f0] sm:$0xf] %vm1006_vm4, %v2738_v26  ;;  %v8689_v26 = vrot.slane %v2272_v29, 5  ;;  %v3165_v7 = vld [vmem:[%s6358_s27 + $0x90] sm:$0xf] }
 0x2d9   : > { %2839 = vst.msk [vmem:[#allocation2 + $0x1e4] sm:$0xf] %vm1006_vm4, %v2736_v0  ;;  %v5030_v11 = vpop.f32.mrf.mxu1  ;;  %v5609_v3 = vld [vmem:[#allocation2 + $0xe4] sm:$0xf0]  ;;  %v2265_v15 = vsel %vm6368_vm2, %v2260_v10, %v2264_v38  ;;  %v8699_v57 = vpop.f32.mrf.mxu2  ;;  %v3462_v43 = vrot.slane %v3461_v8, 4  ;;  %v3474_v38 = vshll.u32 %v3164_v16, 16 }
 0x2da   : > { %3127 = vst.msk [vmem:[#allocation2 + $0x1e4] sm:$0xf] %vm1445_vm8, %v8600_v35  ;;  %v5612_v47 = vor.u32 %v5911_v55, %v5609_v3  ;;  %v2873_v35 = vld [vmem:[%s6358_s27 + $0x80] sm:$0xf]  ;;  %v2599_v55 = vrot.slane %v8684_v56, 5  ;;  %v5031_v50 = vadd.f32 %v5030_v11, %v8315_v37  ;;  %v2275_v3 = vsel %vm6368_vm2, %v2270_v60, %v8689_v26 }
 0x2db   : > { %2406 = vst.msk [vmem:[#allocation2 + $0x1fc] sm:$0xf] %vm277_vm3, %v2265_v15  ;;  %v8721_v2 = vpop.f32.mrf.mxu3  ;;  %v3467_v42 = vsel %vm6368_vm2, %v3462_v43, %v3466_v63  ;;  %v3472_v29 = vrot.slane %v3471_v54, 4  ;;  %v1806_v8 = vld [vmem:[%s6358_s27 + $0x68] sm:$0xf] }
 0x2dc   : > { %5054 = vmatmul.bf16.gmra.mxu1 %v5612_v47  ;;  %2995 = vrot.lane.b32.xlu2 %v2873_v35, %s6280_s29  ;;  %v2600_v37 = vsel %vm6623_vm7, %v2598_v48, %v2599_v55  ;;  %v2597_v47 = vsel %vm6623_vm7, %v2595_v53, %v2596_v6  ;;  %2407 = vst.msk [vmem:[#allocation2 + $0x208] sm:$0xf] %vm277_vm3, %v2275_v3  ;;  %v3476_v6 = vrot.slane %v3474_v38, 5  ;;  %v8729_v35 = vld [vmem:[%s6358_s27 + $0x88] sm:$0xf]  ;;  %v2062_v60 = vshll.u32 %v1806_v8, 16 }
 0x2dd   : > { %3720 = vrot.lane.b32.xlu1 %v3457_v23, %s6281_s30  ;;  %v2056_v23 = vshrl.u32 %v8612_v45, 16  ;;  %v2066_v63 = vshrl.u32 %v1806_v8, 16  ;;  %v3484_v38 = vshll.u32 %v3165_v7, 16 }
 0x2de   : > { %2997 = vrot.lane.b32.xlu0 %v2874_v28, %s6280_s29  ;;  %v8715_v11 = vpop.permute.xlu2 %3710  ;;  %v3478_v28 = vshrl.u32 %v3164_v16, 16  ;;  %v2602_v16 = vrot.slane %v8729_v35, 5  ;;  %v2064_v43 = vrot.slane %v2062_v60, 5 }
 0x2df   : > { %v3749_v0 = vpop.permute.xlu1 %3748  ;;  %v2068_v3 = vrot.slane %v2066_v63, 4  ;;  %v3166_v63 = vld [vmem:[%s6358_s27 + $0x94] sm:$0xf] }
 0x2e0   : > { %v3026_v9 = vpop.permute.xlu0 %3025  ;;  %3852 = vst.msk [vmem:[#allocation2 + $0x1e4] sm:$0xf] %vm1734_vm10, %v3749_v0  ;;  %v3480_v15 = vrot.slane %v3478_v28, 4  ;;  %v2058_v0 = vrot.slane %v2056_v23, 4  ;;  %v8753_v23 = vld [vmem:[%s6358_s27 + $0x8c] sm:$0xf] }
 0x2e1   : > { %3128 = vst.msk [vmem:[#allocation2 + $0x1f0] sm:$0xf] %vm1445_vm8, %v3026_v9  ;;  %v5032_v41 = vpop.f32.mrf.mxu1  ;;  %v3477_v9 = vsel %vm6368_vm2, %v3472_v29, %v3476_v6  ;;  %v2875_v28 = vld [vmem:[%s6358_s27 + $0x88] sm:$0xf]  ;;  %v2604_v29 = vrot.slane %v2602_v16, 4  ;;  %v2605_v8 = vrot.slane %v8753_v23, 5 }
 0x2e2   : > { %3853 = vst.msk [vmem:[#allocation2 + $0x1f0] sm:$0xf] %vm1734_vm10, %v8636_v61  ;;  %v5033_v44 = vadd.f32 %v5032_v41, %v8365_v22  ;;  %v5160_v22 = vadd.f32 %v7764_v1, %v5031_v50  ;;  %v2876_v50 = vld [vmem:[%s6358_s27 + $0x8c] sm:$0xf] }
 0x2e3   : > { %v2606_v56 = vsel %vm6623_vm7, %v2604_v29, %v2605_v8  ;;  %v8800_v29 = vld [vmem:[%s6358_s27 + $0x90] sm:$0xf] }
 0x2e4   : > { %v5162_v61 = vadd.f32 %v7798_v40, %v5033_v44  ;;  %3722 = vrot.lane.b32.xlu2 %v3467_v42, %s6281_s30  ;;  %v8734_v40 = vpop.f32.mrf.mxu2  ;;  %v3488_v44 = vshrl.u32 %v3165_v7, 16 }
 0x2e5   : > { %2713 = vrot.lane.b32.xlu1 %v2600_v37, %s6279_s28  ;;  %v2059_v37 = vor.u32 %v2058_v0, %v8631_v27  ;;  %v8760_v27 = vpop.f32.mrf.mxu3 }
 0x2e6   : > { %v5997_v45 = vpack.c.bf16 %v5162_v61, %v5160_v22  ;;  %2711 = vrot.lane.b32.xlu0 %v2597_v47, %s6279_s28  ;;  %v8745_v54 = vpop.permute.xlu2 %3027  ;;  %v8749_v47 = vld [vmem:[%s6358_s27 + $0x6c] sm:$0xf]  ;;  %v2069_v22 = vor.u32 %v2068_v3, %v2064_v43 }
 0x2e7   : > { %v2698_v10 = vpop.permute.xlu1 %2697  ;;  %v5944_v1 = vld [vmem:[#allocation2 + $0x1e4] sm:$0xf]  ;;  %v2072_v61 = vshll.u32 %v8749_v47, 16  ;;  %v2060_v42 = vrot.slane %v2059_v37, 4 }
 0x2e8   : > { %6097 = vst [vmem:[%s8368_s3 + $0x20] sm:$0xff] %v5997_v45   ;;  %v2696_v48 = vpop.permute.xlu0 %2695  ;;  %v2070_v35 = vrot.slane %v2069_v22, 4  ;;  %v3167_v22 = vld [vmem:[%s6358_s27 + $0x98] sm:$0xf] }
 0x2e9   : > { %2819 = vst.msk [vmem:[#allocation2 + $0xf4] sm:$0xf] %vm1006_vm4, %v2696_v48  ;;  %v5741_v53 = vld [vmem:[#allocation2 + $0x1ec] sm:$0xf0]  ;;  %v8758_v45 = vrot.slane %v2072_v61, 5  ;;  %v2065_v7 = vsel %vm6368_vm2, %v2060_v42, %v2064_v43 }
 0x2ea   : > { %3107 = vst.msk [vmem:[#allocation2 + $0xf4] sm:$0xf] %vm1445_vm8, %v8676_v4  ;;  %v5744_v41 = vor.u32 %v5944_v1, %v5741_v53  ;;  %v3481_v4 = vor.u32 %v3480_v15, %v3476_v6  ;;  %v3490_v1 = vrot.slane %v3488_v44, 4  ;;  %v2601_v6 = vrot.slane %v2599_v55, 4  ;;  %v1828_v61 = vld [vmem:[%s6358_s27 + $0xc0] sm:$0xf] }
 0x2eb   : > { %2820 = vst.msk [vmem:[#allocation2 + $0x100] sm:$0xf] %vm1006_vm4, %v2698_v10  ;;  %v3486_v10 = vrot.slane %v3484_v38, 5  ;;  %v3498_v38 = vshrl.u32 %v3166_v63, 16 }
 0x2ec   : > { %5109 = vmatmul.bf16.gmra.mxu3 %v5744_v41  ;;  %2999 = vrot.lane.b32.xlu2 %v2875_v28, %s6280_s29  ;;  %v8770_v48 = vpop.f32.mrf.mxu2  ;;  %2386 = vst.msk [vmem:[#allocation2 + $0x10c] sm:$0xf] %vm277_vm3, %v2065_v7  ;;  %v3482_v53 = vrot.slane %v3481_v4, 4  ;;  %v2603_v3 = vsel %vm6623_vm7, %v2601_v6, %v2602_v16  ;;  %v2276_v41 = vshrl.u32 %v8680_v49, 16  ;;  %v2282_v7 = vshll.u32 %v1828_v61, 16 }
 0x2ed   : > { %3724 = vrot.lane.b32.xlu1 %v3477_v9, %s6281_s30  ;;  %v3491_v55 = vor.u32 %v3490_v1, %v3486_v10  ;;  %v3494_v9 = vshll.u32 %v3166_v63, 16  ;;  %v8796_v28 = vpop.f32.mrf.mxu3  ;;  %v3504_v63 = vshll.u32 %v3167_v22, 16 }
 0x2ee   : > { %3001 = vrot.lane.b32.xlu0 %v2876_v50, %s6280_s29  ;;  %v2075_v50 = vsel %vm6368_vm2, %v2070_v35, %v8758_v45  ;;  %v8784_v43 = vpop.permute.xlu2 %3754  ;;  %v2278_v1 = vrot.slane %v2276_v41, 4 }
 0x2ef   : > { %v3709_v60 = vpop.permute.xlu1 %3708  ;;  %2387 = vst.msk [vmem:[#allocation2 + $0x118] sm:$0xf] %vm277_vm3, %v2075_v50  ;;  %v3492_v44 = vrot.slane %v3491_v55, 4  ;;  %v3496_v37 = vrot.slane %v3494_v9, 5  ;;  %v2608_v50 = vrot.slane %v8800_v29, 5  ;;  %v3506_v29 = vrot.slane %v3504_v63, 5 }
 0x2f0   : > { %v5035_v15 = vpop.f32.mrf.mxu1  ;;  %v2986_v0 = vpop.permute.xlu0 %2985  ;;  %3832 = vst.msk [vmem:[#allocation2 + $0xf4] sm:$0xf] %vm1734_vm10, %v3709_v60  ;;  %v2286_v60 = vshrl.u32 %v1828_v61, 16  ;;  %v8817_v9 = vld [vmem:[%s6358_s27 + $0xc4] sm:$0xf] }
 0x2f1   : > { %3108 = vst.msk [vmem:[#allocation2 + $0x100] sm:$0xf] %vm1445_vm8, %v2986_v0  ;;  %v5036_v16 = vadd.f32 %v5035_v15, %v8431_v33  ;;  %v3508_v15 = vshrl.u32 %v3167_v22, 16  ;;  %v2877_v22 = vld [vmem:[%s6358_s27 + $0x90] sm:$0xf] }
 0x2f2   : > { %3833 = vst.msk [vmem:[#allocation2 + $0x100] sm:$0xf] %vm1734_vm10, %v8715_v11  ;;  %v3487_v11 = vsel %vm6368_vm2, %v3482_v53, %v3486_v10  ;;  %v3500_v10 = vrot.slane %v3498_v38, 4  ;;  %v3497_v53 = vsel %vm6368_vm2, %v3492_v44, %v3496_v37  ;;  %v2878_v38 = vld [vmem:[%s6358_s27 + $0x94] sm:$0xf]  ;;  %v2288_v44 = vrot.slane %v2286_v60, 4 }
 0x2f4   : > { %3726 = vrot.lane.b32.xlu2 %v3487_v11, %s6281_s30  ;;  %v2284_v11 = vrot.slane %v2282_v7, 5  ;;  %v3501_v61 = vor.u32 %v3500_v10, %v3496_v37  ;;  %v2607_v37 = vrot.slane %v2605_v8, 4 }
 0x2f5   : > { %2717 = vrot.lane.b32.xlu1 %v2606_v56, %s6279_s28  ;;  %v8811_v56 = vpop.f32.mrf.mxu2  ;;  %v8840_v63 = vpop.f32.mrf.mxu3 }
 0x2f6   : > { %2715 = vrot.lane.b32.xlu0 %v2603_v3, %s6279_s28  ;;  %v8813_v55 = vpop.permute.xlu2 %2987  ;;  %v5165_v3 = vadd.f32 %v7847_v18, %v5036_v16  ;;  %v3510_v18 = vrot.slane %v3508_v15, 4  ;;  %v2289_v16 = vor.u32 %v2288_v44, %v2284_v11 }
 0x2f7   : > { %v2742_v4 = vpop.permute.xlu1 %2741  ;;  %v5914_v42 = vld [vmem:[#allocation2 + $0xf4] sm:$0xf] }
 0x2f8   : > { %v5037_v49 = vpop.f32.mrf.mxu1  ;;  %v2740_v35 = vpop.permute.xlu0 %2739  ;;  %2842 = vst.msk [vmem:[#allocation2 + $0x208] sm:$0xf] %vm1006_vm4, %v2742_v4  ;;  %v2290_v10 = vrot.slane %v2289_v16, 4  ;;  %v3511_v15 = vor.u32 %v3510_v18, %v3506_v29 }
 0x2f9   : > { %v5038_v6 = vadd.f32 %v5037_v49, %v8496_v32  ;;  %2841 = vst.msk [vmem:[#allocation2 + $0x1fc] sm:$0xf] %vm1006_vm4, %v2740_v35  ;;  %v5621_v33 = vld [vmem:[#allocation2 + $0xfc] sm:$0xf0]  ;;  %v2279_v32 = vor.u32 %v2278_v1, %v8689_v26  ;;  %v3168_v35 = vld [vmem:[%s6358_s27 + $0x9c] sm:$0xf] }
 0x2fa   : > { %3129 = vst.msk [vmem:[#allocation2 + $0x1fc] sm:$0xf] %vm1445_vm8, %v8745_v54  ;;  %v5624_v0 = vor.u32 %v5914_v42, %v5621_v33  ;;  %v8823_v54 = vld [vmem:[%s6358_s27 + $0x94] sm:$0xf]  ;;  %v2292_v42 = vshll.u32 %v8817_v9, 16  ;;  %v3512_v44 = vrot.slane %v3511_v15, 4 }
 0x2fb   : > { %v5167_v41 = vadd.f32 %v7886_v12, %v5038_v6  ;;  %v2280_v4 = vrot.slane %v2279_v32, 4  ;;  %v2610_v12 = vrot.slane %v2608_v50, 4  ;;  %v2611_v49 = vrot.slane %v8823_v54, 5  ;;  %v4911_v32 = vpop.f32.mrf.mxu0 }
 0x2fc   : > { %5059 = vmatmul.bf16.gmra.mxu1 %v5624_v0  ;;  %v8831_v1 = vrot.slane %v2292_v42, 5  ;;  %3003 = vrot.lane.b32.xlu2 %v2877_v22, %s6280_s29  ;;  %v3502_v6 = vrot.slane %v3501_v61, 4  ;;  %v3514_v0 = vshll.u32 %v3168_v35, 16  ;;  %v8865_v61 = vld [vmem:[%s6358_s27 + $0x98] sm:$0xf]  ;;  %v9216_v54 = vrot.slane %v7629_v34, 5 }
 0x2fd   : > { %v6002_v26 = vpack.c.bf16 %v5167_v41, %v5165_v3  ;;  %3728 = vrot.lane.b32.xlu1 %v3497_v53, %s6281_s30  ;;  %v2285_v33 = vsel %vm6368_vm2, %v2280_v4, %v2284_v11  ;;  %v2612_v8 = vsel %vm6623_vm7, %v2610_v12, %v2611_v49  ;;  %v2609_v3 = vsel %vm6623_vm7, %v2607_v37, %v2608_v50  ;;  %v8858_v11 = vpop.f32.mrf.mxu2  ;;  %v1808_v50 = vld [vmem:[%s6358_s27 + $0x70] sm:$0xf] }
 0x2fe   : > { %3005 = vrot.lane.b32.xlu0 %v2878_v38, %s6280_s29  ;;  %v2295_v23 = vsel %vm6368_vm2, %v2290_v10, %v8831_v1  ;;  %v8852_v53 = vpop.permute.xlu2 %3714  ;;  %2408 = vst.msk [vmem:[#allocation2 + $0x214] sm:$0xf] %vm277_vm3, %v2285_v33  ;;  %v2076_v41 = vshrl.u32 %v8749_v47, 16  ;;  %v3518_v38 = vshrl.u32 %v3168_v35, 16  ;;  %v3516_v22 = vrot.slane %v3514_v0, 5  ;;  %v8873_v37 = vpop.f32.mrf.mxu3 }
 0x2ff   : > { %6098 = vst [vmem:[%s8368_s3 + $0x28] sm:$0xff] %v6002_v26   ;;  %v3753_v7 = vpop.permute.xlu1 %3752  ;;  %v3169_v47 = vld [vmem:[%s6358_s27 + $0xa0] sm:$0xf]  ;;  %v2082_v26 = vshll.u32 %v1808_v50, 16  ;;  %v2086_v18 = vshrl.u32 %v1808_v50, 16  ;;  %v2614_v12 = vrot.slane %v8865_v61, 5 }
 0x300   : > { %v3030_v60 = vpop.permute.xlu0 %3029  ;;  %3854 = vst.msk [vmem:[#allocation2 + $0x1fc] sm:$0xf] %vm1734_vm10, %v3753_v7  ;;  %v3520_v35 = vrot.slane %v3518_v38, 4  ;;  %v2078_v7 = vrot.slane %v2076_v41, 4  ;;  %v8884_v41 = vld [vmem:[%s6358_s27 + $0x74] sm:$0xf] }
 0x301   : > { %3130 = vst.msk [vmem:[#allocation2 + $0x208] sm:$0xf] %vm1445_vm8, %v3030_v60  ;;  %v3517_v60 = vsel %vm6368_vm2, %v3512_v44, %v3516_v22  ;;  %v2088_v33 = vrot.slane %v2086_v18, 4  ;;  %v2880_v38 = vld [vmem:[%s6358_s27 + $0x9c] sm:$0xf]  ;;  %v2092_v61 = vshll.u32 %v8884_v41, 16 }
 0x302   : > { %3855 = vst.msk [vmem:[#allocation2 + $0x208] sm:$0xf] %vm1734_vm10, %v8784_v43  ;;  %v3507_v43 = vsel %vm6368_vm2, %v3502_v6, %v3506_v29  ;;  %v2084_v6 = vrot.slane %v2082_v26, 5  ;;  %v2879_v44 = vld [vmem:[%s6358_s27 + $0x98] sm:$0xf]  ;;  %v3521_v50 = vor.u32 %v3520_v35, %v3516_v22  ;;  %v2613_v35 = vrot.slane %v2611_v49, 4 }
 0x303   : > { %2409 = vst.msk [vmem:[#allocation2 + $0x220] sm:$0xf] %vm277_vm3, %v2295_v23  ;;  %v3524_v23 = vshll.u32 %v3169_v47, 16  ;;  %v4913_v26 = vpop.f32.mrf.mxu0  ;;  %v2296_v34 = vshrl.u32 %v8817_v9, 16 }
 0x304   : > { %3730 = vrot.lane.b32.xlu2 %v3507_v43, %s6281_s30  ;;  %v2089_v43 = vor.u32 %v2088_v33, %v2084_v6 }
 0x305   : > { %2721 = vrot.lane.b32.xlu1 %v2612_v8, %s6279_s28  ;;  %v3528_v8 = vshrl.u32 %v3169_v47, 16  ;;  %v8893_v47 = vpop.f32.mrf.mxu2  ;;  %v3526_v18 = vrot.slane %v3524_v23, 5 }
 0x306   : > { %2719 = vrot.lane.b32.xlu0 %v2609_v3, %s6279_s28  ;;  %v8880_v0 = vpop.permute.xlu2 %3031  ;;  %v2079_v3 = vor.u32 %v2078_v7, %v8758_v45  ;;  %v2616_v45 = vrot.slane %v2614_v12, 4 }
 0x307   : > { %v2702_v4 = vpop.permute.xlu1 %2701  ;;  %v5947_v42 = vld [vmem:[#allocation2 + $0x1fc] sm:$0xf] }
 0x308   : > { %v5040_v16 = vpop.f32.mrf.mxu1  ;;  %v2700_v29 = vpop.permute.xlu0 %2699  ;;  %2822 = vst.msk [vmem:[#allocation2 + $0x118] sm:$0xf] %vm1006_vm4, %v2702_v4  ;;  %v2080_v4 = vrot.slane %v2079_v3, 4  ;;  %v3522_v3 = vrot.slane %v3521_v50, 4  ;;  %v2618_v49 = vsel %vm6623_vm7, %v2616_v45, %v9216_v54 }
 0x309   : > { %2821 = vst.msk [vmem:[#allocation2 + $0x10c] sm:$0xf] %vm1006_vm4, %v2700_v29  ;;  %v5753_v10 = vld [vmem:[#allocation2 + $0x204] sm:$0xf0]  ;;  %v3530_v29 = vrot.slane %v3528_v8, 4 }
 0x30a   : > { %3109 = vst.msk [vmem:[#allocation2 + $0x10c] sm:$0xf] %vm1445_vm8, %v8813_v55  ;;  %v5756_v15 = vor.u32 %v5947_v42, %v5753_v10  ;;  %v2090_v55 = vrot.slane %v2089_v43, 4  ;;  %v8890_v42 = vrot.slane %v2092_v61, 5  ;;  %v2085_v7 = vsel %vm6368_vm2, %v2080_v4, %v2084_v6 }
 0x30b   : > { %v5041_v10 = vadd.f32 %v5040_v16, %v4911_v32  ;;  %2388 = vst.msk [vmem:[#allocation2 + $0x124] sm:$0xf] %vm277_vm3, %v2085_v7  ;;  %v3531_v32 = vor.u32 %v3530_v29, %v3526_v18  ;;  %v3527_v50 = vsel %vm6368_vm2, %v3522_v3, %v3526_v18 }
 0x30c   : > { %5114 = vmatmul.bf16.gmra.mxu3 %v5756_v15  ;;  %3007 = vrot.lane.b32.xlu2 %v2879_v44, %s6280_s29  ;;  %v2095_v23 = vsel %vm6368_vm2, %v2090_v55, %v8890_v42  ;;  %v2615_v44 = vsel %vm6623_vm7, %v2613_v35, %v2614_v12  ;;  %v1830_v55 = vld [vmem:[%s6358_s27 + $0xc8] sm:$0xf] }
 0x30d   : > { %3732 = vrot.lane.b32.xlu1 %v3517_v60, %s6281_s30  ;;  %v3170_v60 = vld [vmem:[%s6358_s27 + $0xa4] sm:$0xf]  ;;  %v5170_v43 = vadd.f32 %v7934_v31, %v5041_v10  ;;  %2389 = vst.msk [vmem:[#allocation2 + $0x130] sm:$0xf] %vm277_vm3, %v2095_v23  ;;  %v2302_v29 = vshll.u32 %v1830_v55, 16  ;;  %v2306_v9 = vshrl.u32 %v1830_v55, 16 }
 0x30e   : > { %3009 = vrot.lane.b32.xlu0 %v2880_v38, %s6280_s29  ;;  %v3534_v16 = vshll.u32 %v3170_v60, 16  ;;  %v3759_v8 = vpop.permute.xlu2 %3758  ;;  %v8913_v38 = vpop.f32.mrf.mxu3 }
 0x30f   : > { %v3713_v22 = vpop.permute.xlu1 %3712 }
 0x310   : > { %v5042_v33 = vpop.f32.mrf.mxu1  ;;  %v2990_v15 = vpop.permute.xlu0 %2989  ;;  %3834 = vst.msk [vmem:[#allocation2 + $0x10c] sm:$0xf] %vm1734_vm10, %v3713_v22  ;;  %v3536_v31 = vrot.slane %v3534_v16, 5  ;;  %v2298_v22 = vrot.slane %v2296_v34, 4 }
 0x311   : > { %v5043_v6 = vadd.f32 %v5042_v33, %v4913_v26  ;;  %3110 = vst.msk [vmem:[#allocation2 + $0x118] sm:$0xf] %vm1445_vm8, %v2990_v15  ;;  %v3532_v26 = vrot.slane %v3531_v32, 4  ;;  %v8929_v18 = vpop.f32.mrf.mxu2  ;;  %v2304_v33 = vrot.slane %v2302_v29, 5  ;;  %v2308_v15 = vrot.slane %v2306_v9, 4 }
 0x312   : > { %3835 = vst.msk [vmem:[#allocation2 + $0x118] sm:$0xf] %vm1734_vm10, %v8852_v53  ;;  %v3538_v53 = vshrl.u32 %v3170_v60, 16  ;;  %v2299_v54 = vor.u32 %v2298_v22, %v8831_v1  ;;  %v2882_v32 = vld [vmem:[%s6358_s27 + $0xa4] sm:$0xf] }
 0x313   : > { %v5172_v61 = vadd.f32 %v7988_v52, %v5043_v6  ;;  %v4916_v52 = vpop.f32.mrf.mxu0  ;;  %v3537_v23 = vsel %vm6368_vm2, %v3532_v26, %v3536_v31  ;;  %v2309_v16 = vor.u32 %v2308_v15, %v2304_v33  ;;  %v9219_v15 = vld [vmem:[#allocation6_spill] sm:$0xff] }
 0x314   : > { %3734 = vrot.lane.b32.xlu2 %v3527_v50, %s6281_s30  ;;  %v3540_v10 = vrot.slane %v3538_v53, 4  ;;  %v2300_v34 = vrot.slane %v2299_v54, 4  ;;  %v1810_v54 = vld [vmem:[%s6358_s27 + $0x78] sm:$0xf] }
 0x315   : > { %v6007_v4 = vpack.c.bf16 %v5172_v61, %v5170_v43  ;;  %2725 = vrot.lane.b32.xlu1 %v2618_v49, %s6279_s28  ;;  %v1831_v49 = vld [vmem:[%s6358_s27 + $0xcc] sm:$0x1]  ;;  %v2881_v61 = vld [vmem:[%s6358_s27 + $0xa0] sm:$0xf] }
 0x316   : > { %2723 = vrot.lane.b32.xlu0 %v2615_v44, %s6279_s28  ;;  %v2992_v6 = vpop.permute.xlu2 %2991  ;;  %v2312_v43 = vshll.u32 %v1831_v49, 16  ;;  %v3541_v44 = vor.u32 %v3540_v10, %v3536_v31  ;;  %v8940_v53 = vpop.f32.mrf.mxu3 }
 0x317   : > { %6099 = vst [vmem:[%s8368_s3 + $0x30] sm:$0xff] %v6007_v4   ;;  %v2746_v45 = vpop.permute.xlu1 %2745  ;;  %v5917_v12 = vld [vmem:[#allocation2 + $0x10c] sm:$0xf]  ;;  %v2305_v4 = vsel %vm6368_vm2, %v2300_v34, %v2304_v33  ;;  %v2096_v33 = vshrl.u32 %v8884_v41, 16 }
 0x318   : > { %v2744_v7 = vpop.permute.xlu0 %2743  ;;  %2844 = vst.msk [vmem:[#allocation2 + $0x220] sm:$0xf] %vm1006_vm4, %v2746_v45  ;;  %v2314_v50 = vrot.slane %v2312_v43, 5  ;;  %v3542_v31 = vrot.slane %v3541_v44, 4  ;;  %v2106_v43 = vshrl.u32 %v1810_v54, 16 }
 0x319   : > { %2843 = vst.msk [vmem:[#allocation2 + $0x214] sm:$0xf] %vm1006_vm4, %v2744_v7  ;;  %v5045_v35 = vpop.f32.mrf.mxu1  ;;  %v5633_v60 = vld [vmem:[#allocation2 + $0x114] sm:$0xf0]  ;;  %v8953_v7 = vpop.f32.mrf.mxu2  ;;  %v2098_v44 = vrot.slane %v2096_v33, 4 }
 0x31a   : > { %3131 = vst.msk [vmem:[#allocation2 + $0x214] sm:$0xf] %vm1445_vm8, %v8880_v0  ;;  %v5636_v3 = vor.u32 %v5917_v12, %v5633_v60  ;;  %v2310_v0 = vrot.slane %v2309_v16, 4  ;;  %v5046_v26 = vadd.f32 %v5045_v35, %v4916_v52  ;;  %v9217_v52 = vld [vmem:[#allocation7_spill] sm:$0xff]  ;;  %v9218_v35 = vld [vmem:[#allocation8_spill] sm:$0xff]  ;;  %v2102_v16 = vshll.u32 %v1810_v54, 16 }
 0x31b   : > { %2410 = vst.msk [vmem:[#allocation2 + $0x22c] sm:$0xf] %vm277_vm3, %v2305_v4  ;;  %v4918_v12 = vpop.f32.mrf.mxu0  ;;  %v3901_v33 = vld [vmem:[%s6358_s27 + $0xbc] sm:$0xf]  ;;  %v3902_v54 = vld [vmem:[%s6358_s27 + $0xc0] sm:$0xf] }
 0x31c   : > { %5064 = vmatmul.bf16.gmra.mxu1 %v5636_v3  ;;  %3011 = vrot.lane.b32.xlu2 %v2881_v61, %s6280_s29  ;;  %v2315_v45 = vsel %vm6368_vm2, %v2310_v0, %v2314_v50  ;;  %v5175_v22 = vadd.f32 %v9217_v52, %v5046_v26  ;;  %v3547_v3 = vsel %vm6368_vm2, %v3542_v31, %v9219_v15  ;;  %v2104_v34 = vrot.slane %v2102_v16, 5  ;;  %v1811_v26 = vld [vmem:[%s6358_s27 + $0x7c] sm:$0xf] }
 0x31d   : > { %3736 = vrot.lane.b32.xlu1 %v3537_v23, %s6281_s30  ;;  %2411 = vst.msk [vmem:[#allocation2 + $0x238] sm:$0xf] %vm277_vm3, %v2315_v45  ;;  %v2108_v0 = vrot.slane %v2106_v43, 4  ;;  %v2112_v31 = vshll.u32 %v1811_v26, 16  ;;  %v4079_v15 = vrot.slane %v4077_v17, 4 }
 0x31e   : > { %3013 = vrot.lane.b32.xlu0 %v2882_v32, %s6280_s29  ;;  %v3719_v10 = vpop.permute.xlu2 %3718  ;;  %v1812_v43 = vld [vmem:[%s6358_s27 + $0x80] sm:$0xf] }
 0x31f   : > { %v3757_v1 = vpop.permute.xlu1 %3756 }
 0x320   : > { %v3034_v55 = vpop.permute.xlu0 %3033  ;;  %3856 = vst.msk [vmem:[#allocation2 + $0x214] sm:$0xf] %vm1734_vm10, %v3757_v1  ;;  %v2099_v1 = vor.u32 %v2098_v44, %v8890_v42  ;;  %v4083_v44 = vrot.slane %v3902_v54, 5 }
 0x321   : > { %3132 = vst.msk [vmem:[#allocation2 + $0x220] sm:$0xf] %vm1445_vm8, %v3034_v55  ;;  %v5047_v29 = vpop.f32.mrf.mxu1  ;;  %v2109_v55 = vor.u32 %v2108_v0, %v2104_v34  ;;  %v5229_v45 = vpop.f32.mrf.mxu2  ;;  %v2122_v0 = vshll.u32 %v1812_v43, 16 }
 0x322   : > { %3857 = vst.msk [vmem:[#allocation2 + $0x220] sm:$0xf] %vm1734_vm10, %v3759_v8  ;;  %v5048_v9 = vadd.f32 %v5047_v29, %v4918_v12  ;;  %v8963_v8 = vpop.f32.mrf.mxu3  ;;  %v2100_v12 = vrot.slane %v2099_v1, 4 }
 0x323   : > { %v2110_v29 = vrot.slane %v2109_v55, 4 }
 0x324   : > { %v5177_v60 = vadd.f32 %v9218_v35, %v5048_v9  ;;  %3738 = vrot.lane.b32.xlu2 %v3547_v3, %s6281_s30  ;;  %v2114_v9 = vrot.slane %v2112_v31, 5  ;;  %v2105_v52 = vsel %vm6368_vm2, %v2100_v12, %v2104_v34  ;;  %v2116_v3 = vshrl.u32 %v1811_v26, 16 }
 0x325   : > { %2390 = vst.msk [vmem:[#allocation2 + $0x13c] sm:$0xf] %vm277_vm3, %v2105_v52  ;;  %v2124_v31 = vrot.slane %v2122_v0, 5  ;;  %v9220_v0 = vld [vmem:[#allocation9_spill] sm:$0xff] }
 0x326   : > { %v6012_v23 = vpack.c.bf16 %v5177_v60, %v5175_v22  ;;  %v3036_v4 = vpop.permute.xlu2 %3035  ;;  %v2115_v35 = vsel %vm6368_vm2, %v2110_v29, %v2114_v9  ;;  %v2118_v62 = vrot.slane %v2116_v3, 4 }
 0x327   : > { %v2706_v49 = vpop.permute.xlu1 %2705  ;;  %v5950_v32 = vld [vmem:[#allocation2 + $0x214] sm:$0xf]  ;;  %2391 = vst.msk [vmem:[#allocation2 + $0x148] sm:$0xf] %vm277_vm3, %v2115_v35  ;;  %v1813_v35 = vld [vmem:[%s6358_s27 + $0x84] sm:$0xf] }
 0x328   : > { %6100 = vst [vmem:[%s8368_s3 + $0x38] sm:$0xff] %v6012_v23   ;;  %v2704_v61 = vpop.permute.xlu0 %2703  ;;  %v4080_v23 = vrot.slane %v3901_v33, 5 }
 0x329   : > { %2823 = vst.msk [vmem:[#allocation2 + $0x124] sm:$0xf] %vm1006_vm4, %v2704_v61  ;;  %v5765_v41 = vld [vmem:[#allocation2 + $0x21c] sm:$0xf0]  ;;  %v5231_v16 = vpop.f32.mrf.mxu2 }
 0x32a   : > { %3111 = vst.msk [vmem:[#allocation2 + $0x124] sm:$0xf] %vm1445_vm8, %v2992_v6  ;;  %v5768_v50 = vor.u32 %v5950_v32, %v5765_v41  ;;  %v4082_v61 = vrot.slane %v4080_v23, 4  ;;  %v4081_v17 = vsel %vm6623_vm7, %v4079_v15, %v4080_v23  ;;  %v2132_v15 = vshll.u32 %v1813_v35, 16 }
 0x32b   : > { %2824 = vst.msk [vmem:[#allocation2 + $0x130] sm:$0xf] %vm1006_vm4, %v2706_v49  ;;  %v4921_v49 = vpop.f32.mrf.mxu0 }
 0x32c   : > { %5119 = vmatmul.bf16.gmra.mxu3 %v5768_v50  ;;  %v2126_v50 = vshrl.u32 %v1812_v43, 16  ;;  %v4084_v29 = vsel %vm6623_vm7, %v4082_v61, %v4083_v44  ;;  %4191 = vst.msk [vmem:[#allocation2 + $0x1e8] sm:$0xf] %vm277_vm3, %v4081_v17  ;;  %v2134_v43 = vrot.slane %v2132_v15, 5 }
 0x32d   : > { %4192 = vst.msk [vmem:[#allocation2 + $0x1f4] sm:$0xf] %vm277_vm3, %v4084_v29 }
 0x32e   : > { %v3763_v60 = vpop.permute.xlu2 %3762  ;;  %v2128_v12 = vrot.slane %v2126_v50, 4 }
 0x32f   : > { %v5100_v6 = vpop.f32.mrf.mxu3  ;;  %v3717_v22 = vpop.permute.xlu1 %3716 }
 0x330   : > { %v2994_v42 = vpop.permute.xlu0 %2993  ;;  %3836 = vst.msk [vmem:[#allocation2 + $0x124] sm:$0xf] %vm1734_vm10, %v3717_v22  ;;  %v5101_v32 = vadd.f32 %v5100_v6, %v8543_v25  ;;  %v2129_v33 = vor.u32 %v2128_v12, %v2124_v31  ;;  %v4085_v12 = vrot.slane %v4083_v44, 4 }
 0x331   : > { %3112 = vst.msk [vmem:[#allocation2 + $0x130] sm:$0xf] %vm1445_vm8, %v2994_v42  ;;  %v2119_v42 = vor.u32 %v2118_v62, %v2114_v9  ;;  %v2136_v62 = vshrl.u32 %v1813_v35, 16 }
 0x332   : > { %3837 = vst.msk [vmem:[#allocation2 + $0x130] sm:$0xf] %vm1734_vm10, %v3719_v10  ;;  %v5230_v52 = vadd.f32 %v5229_v45, %v5101_v32  ;;  %v2130_v54 = vrot.slane %v2129_v33, 4 }
 0x333   : > { %v2120_v23 = vrot.slane %v2119_v42, 4  ;;  %v4923_v61 = vpop.f32.mrf.mxu0  ;;  %v2138_v15 = vrot.slane %v2136_v62, 4 }
 0x336   : > { %v2996_v22 = vpop.permute.xlu2 %2995 }
 0x337   : > { %v5102_v41 = vpop.f32.mrf.mxu3  ;;  %v2750_v34 = vpop.permute.xlu1 %2749  ;;  %v5920_v10 = vld [vmem:[#allocation2 + $0x124] sm:$0xf] }
 0x338   : > { %v5103_v1 = vadd.f32 %v5102_v41, %v8587_v59  ;;  %v2748_v55 = vpop.permute.xlu0 %2747  ;;  %2846 = vst.msk [vmem:[#allocation2 + $0x238] sm:$0xf] %vm1006_vm4, %v2750_v34 }
 0x339   : > { %2845 = vst.msk [vmem:[#allocation2 + $0x22c] sm:$0xf] %vm1006_vm4, %v2748_v55  ;;  %v5050_v25 = vpop.f32.mrf.mxu1  ;;  %v5645_v26 = vld [vmem:[#allocation2 + $0x12c] sm:$0xf0] }
 0x33a   : > { %v5232_v59 = vadd.f32 %v5231_v16, %v5103_v1  ;;  %3133 = vst.msk [vmem:[#allocation2 + $0x22c] sm:$0xf] %vm1445_vm8, %v3036_v4  ;;  %v5648_v6 = vor.u32 %v5920_v10, %v5645_v26  ;;  %v2125_v4 = vsel %vm6368_vm2, %v2120_v23, %v2124_v31  ;;  %v5051_v9 = vadd.f32 %v5050_v25, %v4921_v49  ;;  %v3903_v49 = vld [vmem:[%s6358_s27 + $0xc4] sm:$0xf]  ;;  %v9221_v1 = vld [vmem:[#allocation11_spill] sm:$0xff] }
 0x33b   : > { %2392 = vst.msk [vmem:[#allocation2 + $0x154] sm:$0xf] %vm277_vm3, %v2125_v4  ;;  %v2135_v16 = vsel %vm6368_vm2, %v2130_v54, %v2134_v43  ;;  %v4086_v17 = vrot.slane %v3903_v49, 5  ;;  %v3904_v25 = vld [vmem:[%s6358_s27 + $0xc8] sm:$0xf] }
 0x33c   : > { %v6067_v3 = vpack.c.bf16 %v5232_v59, %v5230_v52  ;;  %5069 = vmatmul.bf16.gmra.mxu1 %v5648_v6  ;;  %2393 = vst.msk [vmem:[#allocation2 + $0x160] sm:$0xf] %vm277_vm3, %v2135_v16  ;;  %v5180_v50 = vadd.f32 %v9220_v0, %v5051_v9  ;;  %v1814_v31 = vld [vmem:[%s6358_s27 + $0x88] sm:$0xf]  ;;  %v4089_v52 = vrot.slane %v3904_v25, 5 }
 0x33d   : > { %v4088_v29 = vrot.slane %v4086_v17, 4  ;;  %v2142_v6 = vshll.u32 %v1814_v31, 16  ;;  %v2146_v42 = vshrl.u32 %v1814_v31, 16  ;;  %v4087_v54 = vsel %vm6623_vm7, %v4085_v12, %v4086_v17  ;;  %v1815_v9 = vld [vmem:[%s6358_s27 + $0x8c] sm:$0xf] }
 0x33e   : > { %6111 = vst [vmem:[%s8368_s3 + $0x90] sm:$0xff] %v6067_v3   ;;  %v3723_v10 = vpop.permute.xlu2 %3722  ;;  %v3905_v17 = vld [vmem:[%s6358_s27 + $0xcc] sm:$0xf]  ;;  %v2156_v25 = vshrl.u32 %v1815_v9, 16  ;;  %v5747_v31 = vld [vmem:[#allocation2 + $0x1e8] sm:$0xf] }
 0x33f   : > { %v3761_v45 = vpop.permute.xlu1 %3760  ;;  %v2144_v23 = vrot.slane %v2142_v6, 5  ;;  %v2148_v35 = vrot.slane %v2146_v42, 4  ;;  %4193 = vst.msk [vmem:[#allocation2 + $0x200] sm:$0xf] %vm277_vm3, %v4087_v54  ;;  %v5946_v12 = vld [vmem:[#allocation2 + $0x1f0] sm:$0xf0] }
 0x340   : > { %v3038_v32 = vpop.permute.xlu0 %3037  ;;  %3858 = vst.msk [vmem:[#allocation2 + $0x22c] sm:$0xf] %vm1734_vm10, %v3761_v45  ;;  %v2139_v45 = vor.u32 %v2138_v15, %v2134_v43  ;;  %v1816_v42 = vld [vmem:[%s6358_s27 + $0x90] sm:$0xf] }
 0x341   : > { %3134 = vst.msk [vmem:[#allocation2 + $0x238] sm:$0xf] %vm1445_vm8, %v3038_v32  ;;  %v5052_v41 = vpop.f32.mrf.mxu1  ;;  %v4090_v32 = vsel %vm6623_vm7, %v4088_v29, %v4089_v52  ;;  %v2149_v16 = vor.u32 %v2148_v35, %v2144_v23  ;;  %v9035_v29 = vld [vmem:[%s6358_s27 + $0xd0] sm:$0xf]  ;;  %v2162_v54 = vshll.u32 %v1816_v42, 16 }
 0x342   : > { %3859 = vst.msk [vmem:[#allocation2 + $0x238] sm:$0xf] %vm1734_vm10, %v3763_v60  ;;  %v5053_v34 = vadd.f32 %v5052_v41, %v4923_v61  ;;  %v2152_v61 = vshll.u32 %v1815_v9, 16  ;;  %v5234_v41 = vpop.f32.mrf.mxu2 }
 0x343   : > { %v2150_v49 = vrot.slane %v2149_v16, 4  ;;  %4194 = vst.msk [vmem:[#allocation2 + $0x20c] sm:$0xf] %vm277_vm3, %v4090_v32  ;;  %v5748_v32 = vor.u32 %v5946_v12, %v5747_v31  ;;  %v2158_v16 = vrot.slane %v2156_v25, 4 }
 0x344   : > { %v5182_v55 = vadd.f32 %v9221_v1, %v5053_v34  ;;  %v2140_v34 = vrot.slane %v2139_v45, 4  ;;  %v2154_v0 = vrot.slane %v2152_v61, 5 }
 0x346   : > { %v6017_v26 = vpack.c.bf16 %v5182_v55, %v5180_v50  ;;  %v3000_v4 = vpop.permute.xlu2 %2999  ;;  %v2155_v55 = vsel %vm6368_vm2, %v2150_v49, %v2154_v0 }
 0x347   : > { %v2710_v59 = vpop.permute.xlu1 %2709  ;;  %v5953_v60 = vld [vmem:[#allocation2 + $0x22c] sm:$0xf]  ;;  %2395 = vst.msk [vmem:[#allocation2 + $0x178] sm:$0xf] %vm277_vm3, %v2155_v55  ;;  %v1817_v55 = vld [vmem:[%s6358_s27 + $0x94] sm:$0xf] }
 0x348   : > { %6101 = vst [vmem:[%s8368_s3 + $0x40] sm:$0xff] %v6017_v26   ;;  %v2708_v33 = vpop.permute.xlu0 %2707  ;;  %v4092_v26 = vrot.slane %v3905_v17, 5  ;;  %v2172_v25 = vshll.u32 %v1817_v55, 16 }
 0x349   : > { %2825 = vst.msk [vmem:[#allocation2 + $0x13c] sm:$0xf] %vm1006_vm4, %v2708_v33  ;;  %v5777_v3 = vld [vmem:[#allocation2 + $0x234] sm:$0xf0]  ;;  %v4091_v33 = vrot.slane %v4089_v52, 4 }
 0x34a   : > { %3113 = vst.msk [vmem:[#allocation2 + $0x13c] sm:$0xf] %vm1445_vm8, %v2996_v22  ;;  %v5780_v44 = vor.u32 %v5953_v60, %v5777_v3  ;;  %v2145_v22 = vsel %vm6368_vm2, %v2140_v34, %v2144_v23  ;;  %v5236_v6 = vpop.f32.mrf.mxu2  ;;  %v4094_v15 = vrot.slane %v4092_v26, 4  ;;  %v4095_v3 = vrot.slane %v9035_v29, 5 }
 0x34b   : > { %2826 = vst.msk [vmem:[#allocation2 + $0x148] sm:$0xf] %vm1006_vm4, %v2710_v59  ;;  %v4926_v59 = vpop.f32.mrf.mxu0  ;;  %v2164_v34 = vrot.slane %v2162_v54, 5  ;;  %v2174_v29 = vrot.slane %v2172_v25, 5 }
 0x34c   : > { %5124 = vmatmul.bf16.gmra.mxu3 %v5780_v44  ;;  %2394 = vst.msk [vmem:[#allocation2 + $0x16c] sm:$0xf] %vm277_vm3, %v2145_v22  ;;  %v2166_v44 = vshrl.u32 %v1816_v42, 16  ;;  %v4096_v22 = vsel %vm6623_vm7, %v4094_v15, %v4095_v3 }
 0x34d   : > { %4196 = vst.msk [vmem:[#allocation2 + $0x224] sm:$0xf] %vm277_vm3, %v4096_v22 }
 0x34e   : > { %v3727_v62 = vpop.permute.xlu2 %3726  ;;  %v2168_v49 = vrot.slane %v2166_v44, 4  ;;  %v2176_v44 = vshrl.u32 %v1817_v55, 16 }
 0x34f   : > { %v5105_v43 = vpop.f32.mrf.mxu3  ;;  %v3721_v50 = vpop.permute.xlu1 %3720 }
 0x350   : > { %v2998_v1 = vpop.permute.xlu0 %2997  ;;  %3838 = vst.msk [vmem:[#allocation2 + $0x13c] sm:$0xf] %vm1734_vm10, %v3721_v50  ;;  %v5106_v60 = vadd.f32 %v5105_v43, %v8617_v13  ;;  %v4093_v13 = vsel %vm6623_vm7, %v4091_v33, %v4092_v26  ;;  %v2169_v17 = vor.u32 %v2168_v49, %v2164_v34 }
 0x351   : > { %3114 = vst.msk [vmem:[#allocation2 + $0x148] sm:$0xf] %vm1445_vm8, %v2998_v1  ;;  %v2159_v1 = vor.u32 %v2158_v16, %v2154_v0  ;;  %v3908_v16 = vld [vmem:[%s6358_s27 + $0xd8] sm:$0x1] }
 0x352   : > { %3839 = vst.msk [vmem:[#allocation2 + $0x148] sm:$0xf] %vm1734_vm10, %v3723_v10  ;;  %v5235_v43 = vadd.f32 %v5234_v41, %v5106_v60  ;;  %v2170_v41 = vrot.slane %v2169_v17, 4  ;;  %v4101_v49 = vrot.slane %v3908_v16, 5 }
 0x353   : > { %4195 = vst.msk [vmem:[#allocation2 + $0x218] sm:$0xf] %vm277_vm3, %v4093_v13  ;;  %v2160_v31 = vrot.slane %v2159_v1, 4  ;;  %v4928_v33 = vpop.f32.mrf.mxu0 }
 0x354   : > { %v2175_v42 = vsel %vm6368_vm2, %v2170_v41, %v2174_v29 }
 0x355   : > { %2397 = vst.msk [vmem:[#allocation2 + $0x190] sm:$0xf] %vm277_vm3, %v2175_v42 }
 0x356   : > { %v3004_v12 = vpop.permute.xlu2 %3003 }
 0x357   : > { %v5107_v10 = vpop.f32.mrf.mxu3  ;;  %v2714_v23 = vpop.permute.xlu1 %2713  ;;  %v5923_v35 = vld [vmem:[#allocation2 + $0x13c] sm:$0xf] }
 0x358   : > { %v5108_v45 = vadd.f32 %v5107_v10, %v8669_v20  ;;  %v2712_v9 = vpop.permute.xlu0 %2711  ;;  %2828 = vst.msk [vmem:[#allocation2 + $0x160] sm:$0xf] %vm1006_vm4, %v2714_v23  ;;  %v3907_v23 = vld [vmem:[%s6358_s27 + $0xd4] sm:$0xf] }
 0x359   : > { %2827 = vst.msk [vmem:[#allocation2 + $0x154] sm:$0xf] %vm1006_vm4, %v2712_v9  ;;  %v5055_v52 = vpop.f32.mrf.mxu1  ;;  %v5657_v61 = vld [vmem:[#allocation2 + $0x144] sm:$0xf0]  ;;  %v5759_v9 = vld [vmem:[#allocation2 + $0x200] sm:$0xf] }
 0x35a   : > { %v5237_v20 = vadd.f32 %v5236_v6, %v5108_v45  ;;  %3115 = vst.msk [vmem:[#allocation2 + $0x154] sm:$0xf] %vm1445_vm8, %v3000_v4  ;;  %v5660_v50 = vor.u32 %v5923_v35, %v5657_v61  ;;  %v2165_v4 = vsel %vm6368_vm2, %v2160_v31, %v2164_v34  ;;  %v5056_v60 = vadd.f32 %v5055_v52, %v4926_v59  ;;  %v9222_v35 = vld [vmem:[#allocation12_spill] sm:$0xff]  ;;  %v1818_v52 = vld [vmem:[%s6358_s27 + $0x98] sm:$0xf]  ;;  %s6137_s27 = smul.u32 192, %s6269_s12 }
 0x35b   : > { %2396 = vst.msk [vmem:[#allocation2 + $0x184] sm:$0xf] %vm277_vm3, %v2165_v4  ;;  %v4098_v45 = vrot.slane %v3907_v23, 5  ;;  %v4097_v61 = vrot.slane %v4095_v3, 4  ;;  %v5952_v23 = vld [vmem:[#allocation2 + $0x220] sm:$0xf0] }
 0x35c   : > { %v6072_v26 = vpack.c.bf16 %v5237_v20, %v5235_v43  ;;  %5074 = vmatmul.bf16.gmra.mxu1 %v5660_v50  ;;  %5877 = vmatmul.msk.bf16.vlgmr.msra.gmra.mxu3 %vm4799_vm9, %v5748_v32  ;;  %v5185_v59 = vadd.f32 %v9222_v35, %v5056_v60  ;;  %v5949_v32 = vld [vmem:[#allocation2 + $0x208] sm:$0xf0]  ;;  %v2182_v20 = vshll.u32 %v1818_v52, 16  ;;  %v2186_v50 = vshrl.u32 %v1818_v52, 16  ;;  %v4931_v35 = vpop.f32.mrf.mxu0  ;;  %s5370_s4 = scalar_lea.hbm %s9187_s2, %s6137_s27  ;;  %s5356_s12 = scalar_lea.sflag [#allocation4], %s205_s25 }
 0x35d   : > { %v4100_v34 = vrot.slane %v4098_v45, 4  ;;  %v5760_v17 = vor.u32 %v5949_v32, %v5759_v9  ;;  %v4099_v31 = vsel %vm6623_vm7, %v4097_v61, %v4098_v45  ;;  %s5373_s6 = sshll.u32 %s5370_s4, 4  ;;  %s5374_s6 = int_to_ptr.hbm [resolvable:$true] %s5373_s6 }
 0x35e   : > { %6112 = vst [vmem:[%s8368_s3 + $0x98] sm:$0xff] %v6072_v26   ;;  %v3731_v43 = vpop.permute.xlu2 %3730  ;;  %v2184_v25 = vrot.slane %v2182_v20, 5  ;;  %v2188_v26 = vrot.slane %v2186_v50, 4  ;;  %s6213_s7 = sshra.s32 %s5374_s6, 4  ;;  %s6214_s7 = int_to_ptr.hbm [resolvable:$true] %s6213_s7 }
 0x35f   : > { %v3725_v0 = vpop.permute.xlu1 %3724  ;;  %v4102_v4 = vsel %vm6623_vm7, %v4100_v34, %v4101_v49  ;;  %4197 = vst.msk [vmem:[#allocation2 + $0x230] sm:$0xf] %vm277_vm3, %v4099_v31  ;;  %s6215_s8 = scalar_lea.hbm %s6214_s7, 192  ;;  %p6220_p1 = scmp.lt.s32.totalorder %s6214_s7, %s9187_s2 }
 0x360   : > { %v3002_v6 = vpop.permute.xlu0 %3001  ;;  %3840 = vst.msk [vmem:[#allocation2 + $0x154] sm:$0xf] %vm1734_vm10, %v3725_v0  ;;  %v2189_v0 = vor.u32 %v2188_v26, %v2184_v25  ;;  %p6216_p12 = scmp.ne.s32.totalorder %s6214_s7, %s6215_s8  ;;  %p6221_p2 = scmp.lt.s32.totalorder %s6219_s18, %s6215_s8 }
 0x361   : > { %3116 = vst.msk [vmem:[#allocation2 + $0x160] sm:$0xf] %vm1445_vm8, %v3002_v6  ;;  %v5057_v15 = vpop.f32.mrf.mxu1 }
 0x362   : > { %3841 = vst.msk [vmem:[#allocation2 + $0x160] sm:$0xf] %vm1734_vm10, %v3727_v62  ;;  %v5058_v10 = vadd.f32 %v5057_v15, %v4928_v33  ;;  %v2190_v6 = vrot.slane %v2189_v0, 4  ;;  %p6217_p13 = pnand %p6216_p12, %p6338_p4  ;;  %p6222_p3 = por %p6221_p2, %p6220_p1 }
 0x363   : > { %4198 = vst.msk [vmem:[#allocation2 + $0x23c] sm:$0xf] %vm277_vm3, %v4102_v4 }
 0x364   : > { %v5187_v54 = vadd.f32 %v8296_v5, %v5058_v10  ;;  %v2178_v5 = vrot.slane %v2176_v44, 4  ;;  %v5771_v10 = vld [vmem:[#allocation2 + $0x218] sm:$0xf]  ;;  %v4933_v34 = vpop.f32.mrf.mxu0  ;;  %p6218_p0 = pneg %p6217_p13 }
 0x365   : > { %v5772_v45 = vor.u32 %v5952_v23, %v5771_v10 }
 0x366   : > { %v6022_v13 = vpack.c.bf16 %v5187_v54, %v5185_v59  ;;  %v2179_v41 = vor.u32 %v2178_v5, %v2174_v29  ;;  %v9223_v29 = vld [vmem:[#allocation10_spill] sm:$0xff]  ;;  %v3008_v15 = vpop.permute.xlu2 %3007  ;;  %v5783_v50 = vld [vmem:[#allocation2 + $0x230] sm:$0xf]  ;;  %p6223_p5 = pnand %p6222_p3, %p6218_p0 }
 0x367   : > { %v2718_v62 = vpop.permute.xlu1 %2717  ;;  %v5926_v22 = vld [vmem:[#allocation2 + $0x154] sm:$0xf]  ;;  %v2195_v33 = vsel %vm6368_vm2, %v2190_v6, %v9223_v29 }
 0x368   : > { %6102 = vst [vmem:[%s8368_s3 + $0x48] sm:$0xff] %v6022_v13   ;;  %v2716_v1 = vpop.permute.xlu0 %2715  ;;  %v2180_v60 = vrot.slane %v2179_v41, 4 }
 0x369   : > { %2829 = vst.msk [vmem:[#allocation2 + $0x16c] sm:$0xf] %vm1006_vm4, %v2716_v1  ;;  %v5669_v55 = vld [vmem:[#allocation2 + $0x15c] sm:$0xf0] }
 0x36a   : > { %3117 = vst.msk [vmem:[#allocation2 + $0x16c] sm:$0xf] %vm1445_vm8, %v3004_v12  ;;  %v5672_v3 = vor.u32 %v5926_v22, %v5669_v55  ;;  %v2185_v12 = vsel %vm6368_vm2, %v2180_v60, %v2184_v25  ;;  %v5955_v1 = vld [vmem:[#allocation2 + $0x238] sm:$0xf0] }
 0x36b   : > { %2830 = vst.msk [vmem:[#allocation2 + $0x178] sm:$0xf] %vm1006_vm4, %v2718_v62  ;;  %v5784_v26 = vor.u32 %v5955_v1, %v5783_v50 }
 0x36c   : > { %5079 = vmatmul.bf16.gmra.mxu1 %v5672_v3  ;;  %5878 = vmatmul.msk.bf16.gmra.mxu3 %vm4799_vm9, %v5760_v17  ;;  %2398 = vst.msk [vmem:[#allocation2 + $0x19c] sm:$0xf] %vm277_vm3, %v2185_v12  ;;  %v4936_v4 = vpop.f32.mrf.mxu0 }
 0x36d   : > { %2399 = vst.msk [vmem:[#allocation2 + $0x1a8] sm:$0xf] %vm277_vm3, %v2195_v33 }
 0x36e   : > { %v3735_v16 = vpop.permute.xlu2 %3734 }
 0x36f   : > { %v3729_v42 = vpop.permute.xlu1 %3728  ;;  %v5110_v60 = vpop.f32.mrf.mxu3 }
 0x370   : > { %v3006_v36 = vpop.permute.xlu0 %3005  ;;  %3842 = vst.msk [vmem:[#allocation2 + $0x16c] sm:$0xf] %vm1734_vm10, %v3729_v42 }
 0x371   : > { %3118 = vst.msk [vmem:[#allocation2 + $0x178] sm:$0xf] %vm1445_vm8, %v3006_v36 }
 0x372   : > { %3843 = vst.msk [vmem:[#allocation2 + $0x178] sm:$0xf] %vm1734_vm10, %v3731_v43 }
 0x374   : > { %v4938_v29 = vpop.f32.mrf.mxu0 }
 0x376   : > { %v3012_v20 = vpop.permute.xlu2 %3011 }
 0x377   : > { %v2722_v59 = vpop.permute.xlu1 %2721  ;;  %v5929_v54 = vld [vmem:[#allocation2 + $0x16c] sm:$0xf]  ;;  %v5112_v10 = vpop.f32.mrf.mxu3 }
 0x378   : > { %v2720_v44 = vpop.permute.xlu0 %2719  ;;  %2832 = vst.msk [vmem:[#allocation2 + $0x190] sm:$0xf] %vm1006_vm4, %v2722_v59 }
 0x379   : > { %2831 = vst.msk [vmem:[#allocation2 + $0x184] sm:$0xf] %vm1006_vm4, %v2720_v44  ;;  %v5060_v24 = vpop.f32.mrf.mxu1  ;;  %v5681_v9 = vld [vmem:[#allocation2 + $0x174] sm:$0xf0] }
 0x37a   : > { %3119 = vst.msk [vmem:[#allocation2 + $0x184] sm:$0xf] %vm1445_vm8, %v3008_v15  ;;  %v5684_v32 = vor.u32 %v5929_v54, %v5681_v9  ;;  %v5061_v52 = vadd.f32 %v5060_v24, %v4931_v35 }
 0x37c   : > { %5084 = vmatmul.bf16.gmra.mxu1 %v5684_v32  ;;  %5879 = vmatmul.msk.bf16.gmra.mxu3 %vm4799_vm9, %v5772_v45  ;;  %v5190_v22 = vadd.f32 %v8345_v39, %v5061_v52  ;;  %v4941_v44 = vpop.f32.mrf.mxu0 }
 0x37e   : > { %v3739_v39 = vpop.permute.xlu2 %3738 }
 0x37f   : > { %v3733_v13 = vpop.permute.xlu1 %3732 }
 0x380   : > { %v3010_v61 = vpop.permute.xlu0 %3009  ;;  %3844 = vst.msk [vmem:[#allocation2 + $0x184] sm:$0xf] %vm1734_vm10, %v3733_v13 }
 0x381   : > { %3120 = vst.msk [vmem:[#allocation2 + $0x190] sm:$0xf] %vm1445_vm8, %v3010_v61  ;;  %v5062_v49 = vpop.f32.mrf.mxu1 }
 0x382   : > { %3845 = vst.msk [vmem:[#allocation2 + $0x190] sm:$0xf] %vm1734_vm10, %v3735_v16  ;;  %v5063_v62 = vadd.f32 %v5062_v49, %v4933_v34 }
 0x384   : > { %v5192_v43 = vadd.f32 %v8392_v21, %v5063_v62  ;;  %v4943_v9 = vpop.f32.mrf.mxu0 }
 0x386   : > { %v6027_v17 = vpack.c.bf16 %v5192_v43, %v5190_v22 }
 0x387   : > { %v2726_v5 = vpop.permute.xlu1 %2725  ;;  %v5932_v55 = vld [vmem:[#allocation2 + $0x184] sm:$0xf] }
 0x388   : > { %6103 = vst [vmem:[%s8368_s3 + $0x50] sm:$0xff] %v6027_v17   ;;  %v2724_v25 = vpop.permute.xlu0 %2723 }
 0x389   : > { %2833 = vst.msk [vmem:[#allocation2 + $0x19c] sm:$0xf] %vm1006_vm4, %v2724_v25  ;;  %v5693_v31 = vld [vmem:[#allocation2 + $0x18c] sm:$0xf0] }
 0x38a   : > { %3121 = vst.msk [vmem:[#allocation2 + $0x19c] sm:$0xf] %vm1445_vm8, %v3012_v20  ;;  %v5696_v3 = vor.u32 %v5932_v55, %v5693_v31  ;;  %v5113_v31 = vadd.f32 %v5112_v10, %v8760_v27 }
 0x38b   : > { %2834 = vst.msk [vmem:[#allocation2 + $0x1a8] sm:$0xf] %vm1006_vm4, %v2726_v5 }
 0x38c   : > { %5089 = vmatmul.bf16.gmra.mxu1 %v5696_v3  ;;  %5880 = vmatmul.msk.bf16.gmra.mxu3 %vm4799_vm9, %v5784_v26  ;;  %v5111_v26 = vadd.f32 %v5110_v60, %v8721_v2 }
 0x38f   : > { %v3737_v21 = vpop.permute.xlu1 %3736  ;;  %v5115_v54 = vpop.f32.mrf.mxu3 }
 0x390   : > { %v3014_v41 = vpop.permute.xlu0 %3013  ;;  %3846 = vst.msk [vmem:[#allocation2 + $0x19c] sm:$0xf] %vm1734_vm10, %v3737_v21  ;;  %v5116_v27 = vadd.f32 %v5115_v54, %v8796_v28 }
 0x391   : > { %3122 = vst.msk [vmem:[#allocation2 + $0x1a8] sm:$0xf] %vm1445_vm8, %v3014_v41 }
 0x392   : > { %3847 = vst.msk [vmem:[#allocation2 + $0x1a8] sm:$0xf] %vm1734_vm10, %v3739_v39 }
 0x397   : > { %v5935_v0 = vld [vmem:[#allocation2 + $0x19c] sm:$0xf]  ;;  %v5117_v45 = vpop.f32.mrf.mxu3 }
 0x398   : > { %v5118_v60 = vadd.f32 %v5117_v45, %v8840_v63 }
 0x399   : > { %v5065_v6 = vpop.f32.mrf.mxu1  ;;  %v5705_v12 = vld [vmem:[#allocation2 + $0x1a4] sm:$0xf0] }
 0x39a   : > { %v5708_v42 = vor.u32 %v5935_v0, %v5705_v12  ;;  %v5066_v36 = vadd.f32 %v5065_v6, %v4936_v4 }
 0x39c   : > { %5094 = vmatmul.bf16.gmra.mxu1 %v5708_v42  ;;  %v5195_v23 = vadd.f32 %v8442_v14, %v5066_v36  ;;  %v4946_v14 = vpop.f32.mrf.mxu0 }
 0x3a1   : > { %v5067_v33 = vpop.f32.mrf.mxu1 }
 0x3a2   : > { %v5068_v15 = vadd.f32 %v5067_v33, %v4938_v29 }
 0x3a4   : > { %v5197_v35 = vadd.f32 %v8487_v19, %v5068_v15  ;;  %v4948_v22 = vpop.f32.mrf.mxu0 }
 0x3a6   : > { %v6032_v59 = vpack.c.bf16 %v5197_v35, %v5195_v23 }
 0x3a8   : > { %6104 = vst [vmem:[%s8368_s3 + $0x58] sm:$0xff] %v6032_v59  }
 0x3ac   : > { %v4951_v50 = vpop.f32.mrf.mxu0 }
 0x3af   : > { %v5120_v32 = vpop.f32.mrf.mxu3 }
 0x3b0   : > { %v5121_v54 = vadd.f32 %v5120_v32, %v8873_v37 }
 0x3b4   : > { %v4953_v25 = vpop.f32.mrf.mxu0 }
 0x3b7   : > { %v5122_v62 = vpop.f32.mrf.mxu3 }
 0x3b8   : > { %v5123_v45 = vadd.f32 %v5122_v62, %v8913_v38 }
 0x3b9   : > { %v5070_v24 = vpop.f32.mrf.mxu1 }
 0x3ba   : > { %v5071_v16 = vadd.f32 %v5070_v24, %v4941_v44 }
 0x3bc   : > { %v5200_v61 = vadd.f32 %v8537_v51, %v5071_v16  ;;  %v4956_v6 = vpop.f32.mrf.mxu0 }
 0x3c1   : > { %v5072_v13 = vpop.f32.mrf.mxu1 }
 0x3c2   : > { %v5073_v52 = vadd.f32 %v5072_v13, %v4943_v9 }
 0x3c4   : > { %v5202_v34 = vadd.f32 %v8584_v58, %v5073_v52  ;;  %v4958_v23 = vpop.f32.mrf.mxu0 }
 0x3c6   : > { %v6037_v49 = vpack.c.bf16 %v5202_v34, %v5200_v61 }
 0x3c8   : > { %6105 = vst [vmem:[%s8368_s3 + $0x60] sm:$0xff] %v6037_v49  }
 0x3cf   : > { %v9111_v19 = vpop.f32.mrf.mxu3 }
 0x3d0   : > { %v5126_v32 = vadd.f32 %v9111_v19, %v8940_v53 }
 0x3d7   : > { %v9113_v43 = vpop.f32.mrf.mxu3 }
 0x3d8   : > { %v5128_v62 = vadd.f32 %v9113_v43, %v8963_v8 }
 0x3d9   : > { %v5075_v20 = vpop.f32.mrf.mxu1 }
 0x3da   : > { %v5076_v17 = vadd.f32 %v5075_v20, %v4946_v14 }
 0x3dc   : > { %v5205_v51 = vadd.f32 %v8628_v30, %v5076_v17 }
 0x3df   : > { %v5239_v1 = vpop.f32.mrf.mxu3 }
 0x3e0   : > { %v5240_v21 = vadd.f32 %v5239_v1, %v5111_v26 }
 0x3e1   : > { %v5077_v5 = vpop.f32.mrf.mxu1 }
 0x3e2   : > { %v5078_v55 = vadd.f32 %v5077_v5, %v4948_v22 }
 0x3e4   : > { %v5207_v58 = vadd.f32 %v8665_v46, %v5078_v55 }
 0x3e6   : > { %v6042_v3 = vpack.c.bf16 %v5207_v58, %v5205_v51 }
 0x3e7   : > { %v5241_v39 = vpop.f32.mrf.mxu3 }
 0x3e8   : > { %6106 = vst [vmem:[%s8368_s3 + $0x68] sm:$0xff] %v6042_v3   ;;  %v5242_v41 = vadd.f32 %v5241_v39, %v5113_v31 }
 0x3e9   : > { %v5080_v4 = vpop.f32.mrf.mxu1 }
 0x3ea   : > { %v6077_v0 = vpack.c.bf16 %v5242_v41, %v5240_v21  ;;  %v5081_v30 = vadd.f32 %v5080_v4, %v4951_v50 }
 0x3ec   : > { %6113 = vst [vmem:[%s8368_s3 + $0xa0] sm:$0xff] %v6077_v0   ;;  %v5210_v36 = vadd.f32 %v8699_v57, %v5081_v30 }
 0x3ef   : > { %v5244_v12 = vpop.f32.mrf.mxu3 }
 0x3f0   : > { %v5245_v15 = vadd.f32 %v5244_v12, %v5116_v27 }
 0x3f1   : > { %v5082_v42 = vpop.f32.mrf.mxu1 }
 0x3f2   : > { %v5083_v46 = vadd.f32 %v5082_v42, %v4953_v25 }
 0x3f4   : > { %v5212_v2 = vadd.f32 %v8734_v40, %v5083_v46  ;;  %v4961_v40 = vpop.f32.mrf.mxu0 }
 0x3f6   : > { %v6047_v29 = vpack.c.bf16 %v5212_v2, %v5210_v36 }
 0x3f7   : > { %v5246_v33 = vpop.f32.mrf.mxu3 }
 0x3f8   : > { %6107 = vst [vmem:[%s8368_s3 + $0x70] sm:$0xff] %v6047_v29   ;;  %v5247_v10 = vadd.f32 %v5246_v33, %v5118_v60 }
 0x3f9   : > { %v5085_v35 = vpop.f32.mrf.mxu1 }
 0x3fa   : > { %v6082_v59 = vpack.c.bf16 %v5247_v10, %v5245_v15  ;;  %v5086_v24 = vadd.f32 %v5085_v35, %v4956_v6 }
 0x3fc   : > { %6114 = vst [vmem:[%s8368_s3 + $0xa8] sm:$0xff] %v6082_v59   ;;  %v5215_v28 = vadd.f32 %v8770_v48, %v5086_v24  ;;  %v4963_v14 = vpop.f32.mrf.mxu0 }
 0x3ff   : > { %v5249_v44 = vpop.f32.mrf.mxu3 }
 0x400   : > { %v5250_v52 = vadd.f32 %v5249_v44, %v5121_v54 }
 0x401   : > { %v5087_v57 = vpop.f32.mrf.mxu1 }
 0x402   : > { %v5088_v9 = vadd.f32 %v5087_v57, %v4958_v23 }
 0x404   : > { %v5217_v63 = vadd.f32 %v8811_v56, %v5088_v9  ;;  %v4966_v1 = vpop.f32.mrf.mxu0 }
 0x406   : > { %v6052_v16 = vpack.c.bf16 %v5217_v63, %v5215_v28 }
 0x407   : > { %v5251_v13 = vpop.f32.mrf.mxu3 }
 0x408   : > { %6108 = vst [vmem:[%s8368_s3 + $0x78] sm:$0xff] %v6052_v16   ;;  %v5252_v61 = vadd.f32 %v5251_v13, %v5123_v45 }
 0x409   : > { %v5090_v34 = vpop.f32.mrf.mxu1 }
 0x40a   : > { %v6087_v49 = vpack.c.bf16 %v5252_v61, %v5250_v52  ;;  %v5091_v20 = vadd.f32 %v5090_v34, %v4961_v40 }
 0x40c   : > { %6115 = vst [vmem:[%s8368_s3 + $0xb0] sm:$0xff] %v6087_v49   ;;  %v5220_v37 = vadd.f32 %v8858_v11, %v5091_v20 }
 0x40f   : > { %v5254_v22 = vpop.f32.mrf.mxu3 }
 0x410   : > { %v5255_v5 = vadd.f32 %v5254_v22, %v5126_v32 }
 0x411   : > { %v5092_v48 = vpop.f32.mrf.mxu1 }
 0x412   : > { %v5093_v56 = vadd.f32 %v5092_v48, %v4963_v14 }
 0x414   : > { %v5222_v38 = vadd.f32 %v8893_v47, %v5093_v56  ;;  %v4968_v47 = vpop.f32.mrf.mxu0 }
 0x416   : > { %v6057_v50 = vpack.c.bf16 %v5222_v38, %v5220_v37 }
 0x417   : > { %v5256_v17 = vpop.f32.mrf.mxu3 }
 0x418   : > { %6109 = vst [vmem:[%s8368_s3 + $0x80] sm:$0xff] %v6057_v50   ;;  %v5257_v55 = vadd.f32 %v5256_v17, %v5128_v62 }
 0x419   : > { %v5095_v51 = vpop.f32.mrf.mxu1 }
 0x41a   : > { %v6092_v58 = vpack.c.bf16 %v5257_v55, %v5255_v5  ;;  %v5096_v11 = vadd.f32 %v5095_v51, %v4966_v1 }
 0x41c   : > { %6116 = vst [vmem:[%s8368_s3 + $0xb8] sm:$0xff] %v6092_v58   ;;  %v5225_v19 = vadd.f32 %v8929_v18, %v5096_v11 }
 0x421   : > { %v5097_v53 = vpop.f32.mrf.mxu1 }
 0x422   : > { %v5098_v8 = vadd.f32 %v5097_v53, %v4968_v47 }
 0x424   : > { %v5227_v43 = vadd.f32 %v8953_v7, %v5098_v8 }
 0x426   : > { %v6062_v25 = vpack.c.bf16 %v5227_v43, %v5225_v19 }
 0x428   : > { %6110 = vst [vmem:[%s8368_s3 + $0x88] sm:$0xff] %v6062_v25  }
 0x429   : > { %6226 = shalt.err (!%p6223_p5)
}
 0x42a   : > { %s6282_s24 = smov 4  }
 0x42b   : > { %6138 = dma.vmem_to_hbm [thread:$0]  (%p6338_p4), %s5372_s5, 3072, %s5374_s6, %s5356_s12, %s6280_s29, %s6280_s29, %s6282_s24  }
 0x42c PF: > { %p6144_p6 = scmp.ge.s32.totalorder %s6277_s14, 2  ;;  %s5388_s25 = sand.u32 1, %s6257_s9  }
 0x42d   : > { %s5389_s26 = scalar_lea.sflag [#allocation4], %s5388_s25 }
 0x42e   : > { %p6141_p7 = pnand %p6144_p6, %p6345_p8 }
 0x430   : > { %p6142_p9 = pneg %p6141_p7 }
 0x432   : > { %6252 = dma.done.wait (%p6142_p9), %s5389_s26, 3072  }
 0x433   : > { %6254 = vsyncadd (%p6142_p9), %s5389_s26, 4294964224  ;;  %s15_s14 = sadd.s32 1, %s6277_s14   ;;  %s9224_s9 = smov %s6261_s10 }
 0x434   : > { %p12_p10 = scmp.ge.s32.totalorder %s15_s14, 4   ;;  %s9225_s10 = smov %s6265_s11 }
 0x435   : > { %s9226_s11 = smov %s6351_s22  ;;  %s9227_s12 = smov %s6273_s13 }
 0x436   : > { %s9228_s13 = smov %s9230_s17  ;;  %14 = sbr.rel (!%p12_p10) target bundleno = 4 (0x4), region = 66 }
 0x43b   :  { %5395 = vsyncpa [#allocation4], 1 }
 0x43c   :  { %5397 = vsyncpa [#allocation4 + $0x1], 1 }

</bundles_post_ra>
